<compile_context>
chip_gen: v7x
topology: tpu7x:2x2x1
jax: 0.10.0
libtpu: 0.0.40
codegen_flags: <defaults>
</compile_context>

<pallas_src>
import functools

import jax
import jax.numpy as jnp
from jax.experimental import pallas as pl
from jax.experimental.pallas import tpu as pltpu


def _mlp_kernel(idx_ref, xd_ref, xs_ref, w1_ref, b1_ref, w2_ref, b2_ref, o_ref):
    # idx_ref: (TE, 2) int32     xd_ref: (Nd, C) bf16   xs_ref: (Ns, C) bf16
    # w1_ref:  (2C, H) bf16      b1_ref: (1, H) f32     w2_ref: (1, H) f32
    # b2_ref:  (1,)  f32 (SMEM)  o_ref:  (1, TE) f32
    te = idx_ref.shape[0]
    n_drug = xd_ref.shape[0]
    n_dis = xs_ref.shape[0]

    idx = idx_ref[...]                       # (TE, 2)
    idx_d = idx[:, 0:1]                      # (TE, 1) drug row ids
    idx_s = idx[:, 1:2]                      # (TE, 1) disorder row ids

    # ---- in-kernel row gather via one-hot matmul (always lowers; MXU) ------
    # TODO(synk): replace with dynamic-gather / DMA gather for large tables.
    iota_d = jax.lax.broadcasted_iota(jnp.int32, (te, n_drug), 1)
    iota_s = jax.lax.broadcasted_iota(jnp.int32, (te, n_dis), 1)
    onehot_d = jnp.where(idx_d == iota_d, 1.0, 0.0).astype(jnp.bfloat16)
    onehot_s = jnp.where(idx_s == iota_s, 1.0, 0.0).astype(jnp.bfloat16)
    d = jnp.dot(onehot_d, xd_ref[...], preferred_element_type=jnp.float32)
    s = jnp.dot(onehot_s, xs_ref[...], preferred_element_type=jnp.float32)
    feats = jnp.concatenate(
        [d.astype(jnp.bfloat16), s.astype(jnp.bfloat16)], axis=-1)   # (TE, 2C)

    # ---- fc1: single fused K=2C MXU matmul, bias + ReLU in f32 on the VPU --
    h = jnp.dot(feats, w1_ref[...], preferred_element_type=jnp.float32)
    h = jnp.maximum(h + b1_ref[...], 0.0)    # (TE, H) f32

    # ---- fc2 as VPU multiply + lane reduction (no N=1 MXU matmul) ----------
    logit = jnp.sum(h * w2_ref[...], axis=-1) + b2_ref[0]            # (TE,)

    # Lane-dense store: one full (1, TE) row per grid step.
    o_ref[0, :] = logit.astype(o_ref.dtype)


def _round_up(x, m):
    return ((x + m - 1) // m) * m


@functools.partial(jax.jit, static_argnames=("tile_e",))
def classifier_mlp_forward(x_drug, x_disorder, edge_label_index, params,
                           tile_e=1024):
    """Pallas implementation of ClassifierMLP.forward.

    x_drug:           (N_drug, C) float32
    x_disorder:       (N_dis,  C) float32
    edge_label_index: (2, E) int32
    returns:          (E,) float32 logits
    """
    w1, b1, w2, b2 = params["w1"], params["b1"], params["w2"], params["b2"]
    n_drug, C = x_drug.shape
    n_dis = x_disorder.shape[0]
    H = w1.shape[-1]
    E = edge_label_index.shape[1]

    assert tile_e % 256 == 0 and tile_e >= 256, \
        "tile_e must be a multiple of 256 (MXU M granule / bf16 min tile)"

    # Effective tile: multiple of 256, no larger than tile_e, and small enough
    # that the grid has >= 2 steps when E allows (v7x megacore sharding).
    tile_e_eff = min(tile_e, max(256, _round_up(pl.cdiv(E, 2), 256)))
    e_pad = _round_up(E, tile_e_eff)
    grid_e = e_pad // tile_e_eff

    # Edge indices as (E_pad, 2); padded rows use index 0 (a valid row) and
    # their logits are dropped by the final slice.
    idx = edge_label_index.T.astype(jnp.int32)
    idx = jnp.pad(idx, ((0, e_pad - E), (0, 0)))

    # bf16 MXU operands; everything else stays f32.
    xd_bf = x_drug.astype(jnp.bfloat16)
    xs_bf = x_disorder.astype(jnp.bfloat16)
    w1_bf = w1.astype(jnp.bfloat16)
    b1_2d = b1.reshape(1, H).astype(jnp.float32)
    w2_row = w2.reshape(1, H).astype(jnp.float32)
    b2_1d = b2.reshape(1).astype(jnp.float32)

    flops = (2 * e_pad * (n_drug + n_dis) * C      # one-hot gather matmuls
             + 2 * e_pad * (2 * C) * H             # fc1
             + 3 * e_pad * H)                      # fc2 mul + reduce + bias
    bytes_accessed = (idx.size * 4
                      + (xd_bf.size + xs_bf.size + w1_bf.size) * 2
                      + (b1_2d.size + w2_row.size + b2_1d.size) * 4
                      + e_pad * 4)
    cost = pl.CostEstimate(flops=flops, transcendentals=0,
                           bytes_accessed=bytes_accessed)

    out = pl.pallas_call(
        _mlp_kernel,
        out_shape=jax.ShapeDtypeStruct((1, e_pad), jnp.float32),
        grid_spec=pltpu.PrefetchScalarGridSpec(
            num_scalar_prefetch=0,
            grid=(grid_e,),
            in_specs=[
                pl.BlockSpec((tile_e_eff, 2), lambda i: (i, 0)),    # edge ids
                pl.BlockSpec((n_drug, C), lambda i: (0, 0)),        # x_drug (resident)
                pl.BlockSpec((n_dis, C), lambda i: (0, 0)),         # x_disorder (resident)
                pl.BlockSpec((2 * C, H), lambda i: (0, 0)),         # W1 (resident)
                pl.BlockSpec((1, H), lambda i: (0, 0)),             # b1
                pl.BlockSpec((1, H), lambda i: (0, 0)),             # w2 row
                pl.BlockSpec(memory_space=pltpu.MemorySpace.SMEM),  # b2 scalar
            ],
            out_specs=pl.BlockSpec((1, tile_e_eff), lambda i: (0, i)),
        ),
        compiler_params=pltpu.CompilerParams(
            dimension_semantics=("parallel",),
        ),
        cost_estimate=cost,
    )(idx, xd_bf, xs_bf, w1_bf, b1_2d, w2_row, b2_1d)

    return out[0, :E]


def init_params(key, in_channels, hidden_channels):
    """Deterministic init mirroring nn.Linear's U(-1/sqrt(fan_in), 1/sqrt(fan_in))."""
    k1, k2, k3, k4 = jax.random.split(key, 4)
    fan1 = in_channels * 2
    lim1 = 1.0 / jnp.sqrt(jnp.float32(fan1))
    fan2 = hidden_channels
    lim2 = 1.0 / jnp.sqrt(jnp.float32(fan2))
    return {
        "w1": jax.random.uniform(k1, (fan1, hidden_channels), jnp.float32, -lim1, lim1),
        "b1": jax.random.uniform(k2, (hidden_channels,), jnp.float32, -lim1, lim1),
        "w2": jax.random.uniform(k3, (hidden_channels, 1), jnp.float32, -lim2, lim2),
        "b2": jax.random.uniform(k4, (1,), jnp.float32, -lim2, lim2),
    }


def reference_forward(x_drug, x_disorder, edge_label_index, params, cast_bf16=False):
    """Pure-JAX reference matching the PyTorch module (optionally bf16-quantized)."""
    d = x_drug[edge_label_index[0]]
    s = x_disorder[edge_label_index[1]]
    x = jnp.concatenate([d, s], axis=-1)
    w1 = params["w1"]
    if cast_bf16:
        x = x.astype(jnp.bfloat16)
        w1 = w1.astype(jnp.bfloat16)
    h = jax.nn.relu(
        jnp.dot(x, w1, preferred_element_type=jnp.float32) + params["b1"]
    )
    return (h @ params["w2"] + params["b2"])[..., 0]


if __name__ == "__main__":
    # Small shapes consistent with the module (scaled-down channels); E chosen
    # so the edge grid splits into 2 tiles (both v7x TensorCores get work).
    in_channels = 128
    hidden_channels = 128
    n_drug = 64
    n_disorder = 64
    n_edges = 1024            # -> tile_e_eff = 512, grid = (2,)

    key = jax.random.PRNGKey(0)
    kp, kd, ks, ke0, ke1 = jax.random.split(key, 5)

    params = init_params(kp, in_channels, hidden_channels)
    x_drug = jax.random.normal(kd, (n_drug, in_channels), jnp.float32)
    x_disorder = jax.random.normal(ks, (n_disorder, in_channels), jnp.float32)
    edge_label_index = jnp.stack(
        [
            jax.random.randint(ke0, (n_edges,), 0, n_drug),
            jax.random.randint(ke1, (n_edges,), 0, n_disorder),
        ],
        axis=0,
    ).astype(jnp.int32)

    out = classifier_mlp_forward(x_drug, x_disorder, edge_label_index, params)
    out = jax.block_until_ready(out)
    assert out.shape == (n_edges,)

    # Primary check: against a reference using the same bf16 MXU operands
    # (f32 accumulation), so only kernel-vs-XLA differences remain.
    ref_bf16 = reference_forward(x_drug, x_disorder, edge_label_index, params,
                                 cast_bf16=True)
    assert jnp.allclose(out, ref_bf16, atol=2e-2, rtol=2e-2), \
        "mismatch vs bf16-quantized reference"

    # Sanity check against the full-f32 reference (loose tolerance for bf16
    # operand quantization).
    ref_f32 = reference_forward(x_drug, x_disorder, edge_label_index, params)
    assert jnp.allclose(out, ref_f32, atol=1e-1, rtol=1e-1), \
        "mismatch vs f32 reference"

    print("KERNEL_OK")
</pallas_src>

<mosaic_0001>
module attributes {stable_mosaic.version = 11 : i64} {
  func.func @_mlp_kernel(%arg0: i32, %arg1: memref<512x2xi32, #tpu.memory_space<vmem>>, %arg2: memref<64x128xbf16, #tpu.memory_space<vmem>>, %arg3: memref<64x128xbf16, #tpu.memory_space<vmem>>, %arg4: memref<256x128xbf16, #tpu.memory_space<vmem>>, %arg5: memref<1x128xf32, #tpu.memory_space<vmem>>, %arg6: memref<1x128xf32, #tpu.memory_space<vmem>>, %arg7: memref<1xf32, #tpu.memory_space<smem>>, %arg8: memref<1x512xf32, #tpu.memory_space<vmem>>) attributes {dimension_semantics = [#tpu.dimension_semantics<parallel>], iteration_bounds = array<i64: 2>, scalar_prefetch = 0 : i64, scratch_operands = 0 : i64, tpu.core_type = #tpu.core_type<tc>, window_params = [{transform_indices = @transform_0, window_bounds = array<i64: 512, 2>}, {pipeline_mode = #tpu.pipeline_mode<synchronous>, transform_indices = @transform_1, window_bounds = array<i64: 64, 128>}, {pipeline_mode = #tpu.pipeline_mode<synchronous>, transform_indices = @transform_2, window_bounds = array<i64: 64, 128>}, {pipeline_mode = #tpu.pipeline_mode<synchronous>, transform_indices = @transform_3, window_bounds = array<i64: 256, 128>}, {pipeline_mode = #tpu.pipeline_mode<synchronous>, transform_indices = @transform_4, window_bounds = array<i64: 1, 128>}, {pipeline_mode = #tpu.pipeline_mode<synchronous>, transform_indices = @transform_5, window_bounds = array<i64: 1, 128>}, {transform_indices = @transform_6, window_bounds = array<i64: 1>}, {transform_indices = @transform_7, window_bounds = array<i64: 1, 512>}]} {
    %c0 = arith.constant 0 : index
    %c0_0 = arith.constant 0 : index
    %0 = vector.load %arg1[%c0, %c0_0] : memref<512x2xi32, #tpu.memory_space<vmem>>, vector<512x2xi32>
    %1 = vector.extract_strided_slice %0 {offsets = [0, 0], sizes = [512, 1], strides = [1, 1]} : vector<512x2xi32> to vector<512x1xi32>
    %2 = vector.extract_strided_slice %0 {offsets = [0, 1], sizes = [512, 1], strides = [1, 1]} : vector<512x2xi32> to vector<512x1xi32>
    %3 = tpu.iota {dimensions = array<i32: 1>} : vector<512x64xi32>
    %4 = tpu.iota {dimensions = array<i32: 1>} : vector<512x64xi32>
    %5 = vector.broadcast %1 : vector<512x1xi32> to vector<512x64xi32>
    %6 = arith.cmpi eq, %5, %3 : vector<512x64xi32>
    %cst = arith.constant 1.000000e+00 : f32
    %cst_1 = arith.constant 0.000000e+00 : f32
    %7 = vector.broadcast %cst : f32 to vector<512x64xf32>
    %8 = vector.broadcast %cst_1 : f32 to vector<512x64xf32>
    %9 = arith.select %6, %7, %8 : vector<512x64xi1>, vector<512x64xf32>
    %10 = arith.truncf %9 : vector<512x64xf32> to vector<512x64xbf16>
    %11 = vector.broadcast %2 : vector<512x1xi32> to vector<512x64xi32>
    %12 = arith.cmpi eq, %11, %4 : vector<512x64xi32>
    %cst_2 = arith.constant 1.000000e+00 : f32
    %cst_3 = arith.constant 0.000000e+00 : f32
    %13 = vector.broadcast %cst_2 : f32 to vector<512x64xf32>
    %14 = vector.broadcast %cst_3 : f32 to vector<512x64xf32>
    %15 = arith.select %12, %13, %14 : vector<512x64xi1>, vector<512x64xf32>
    %16 = arith.truncf %15 : vector<512x64xf32> to vector<512x64xbf16>
    %c0_4 = arith.constant 0 : index
    %c0_5 = arith.constant 0 : index
    %17 = vector.load %arg2[%c0_4, %c0_5] : memref<64x128xbf16, #tpu.memory_space<vmem>>, vector<64x128xbf16>
    %cst_6 = arith.constant dense<0.000000e+00> : vector<512x128xf32>
    %18 = tpu.matmul %10, %17, %cst_6 {dimension_numbers = #tpu.dot_dimension_numbers<[1], [0], [0], [1], [0, 0, 1, 1], [], []>} : vector<512x64xbf16>, vector<64x128xbf16>, vector<512x128xf32> -> vector<512x128xf32>
    %c0_7 = arith.constant 0 : index
    %c0_8 = arith.constant 0 : index
    %19 = vector.load %arg3[%c0_7, %c0_8] : memref<64x128xbf16, #tpu.memory_space<vmem>>, vector<64x128xbf16>
    %cst_9 = arith.constant dense<0.000000e+00> : vector<512x128xf32>
    %20 = tpu.matmul %16, %19, %cst_9 {dimension_numbers = #tpu.dot_dimension_numbers<[1], [0], [0], [1], [0, 0, 1, 1], [], []>} : vector<512x64xbf16>, vector<64x128xbf16>, vector<512x128xf32> -> vector<512x128xf32>
    %21 = arith.truncf %18 : vector<512x128xf32> to vector<512x128xbf16>
    %22 = arith.truncf %20 : vector<512x128xf32> to vector<512x128xbf16>
    %23 = tpu.concatenate %21, %22 in 1 : vector<512x128xbf16>, vector<512x128xbf16> -> vector<512x256xbf16>
    %c0_10 = arith.constant 0 : index
    %c0_11 = arith.constant 0 : index
    %24 = vector.load %arg4[%c0_10, %c0_11] : memref<256x128xbf16, #tpu.memory_space<vmem>>, vector<256x128xbf16>
    %cst_12 = arith.constant dense<0.000000e+00> : vector<512x128xf32>
    %25 = tpu.matmul %23, %24, %cst_12 {dimension_numbers = #tpu.dot_dimension_numbers<[1], [0], [0], [1], [0, 0, 1, 1], [], []>} : vector<512x256xbf16>, vector<256x128xbf16>, vector<512x128xf32> -> vector<512x128xf32>
    %c0_13 = arith.constant 0 : index
    %c0_14 = arith.constant 0 : index
    %26 = vector.load %arg5[%c0_13, %c0_14] : memref<1x128xf32, #tpu.memory_space<vmem>>, vector<1x128xf32>
    %27 = vector.broadcast %26 : vector<1x128xf32> to vector<512x128xf32>
    %28 = arith.addf %25, %27 : vector<512x128xf32>
    %cst_15 = arith.constant 0.000000e+00 : f32
    %29 = vector.broadcast %cst_15 : f32 to vector<512x128xf32>
    %30 = arith.maximumf %28, %29 : vector<512x128xf32>
    %c0_16 = arith.constant 0 : index
    %c0_17 = arith.constant 0 : index
    %31 = vector.load %arg6[%c0_16, %c0_17] : memref<1x128xf32, #tpu.memory_space<vmem>>, vector<1x128xf32>
    %32 = vector.broadcast %31 : vector<1x128xf32> to vector<512x128xf32>
    %33 = arith.mulf %30, %32 : vector<512x128xf32>
    %cst_18 = arith.constant dense<0.000000e+00> : vector<512xf32>
    %34 = vector.multi_reduction <add>, %33, %cst_18 [1] : vector<512x128xf32> to vector<512xf32>
    %c0_19 = arith.constant 0 : index
    %35 = memref.load %arg7[%c0_19] : memref<1xf32, #tpu.memory_space<smem>>
    %36 = vector.broadcast %35 : f32 to vector<512xf32>
    %37 = arith.addf %34, %36 : vector<512xf32>
    %c0_20 = arith.constant 0 : index
    %c0_21 = arith.constant 0 : index
    %38 = vector.load %arg8[%c0_20, %c0_21] : memref<1x512xf32, #tpu.memory_space<vmem>>, vector<1x512xf32>
    %39 = vector.shape_cast %38 : vector<1x512xf32> to vector<512xf32>
    %40 = vector.shape_cast %37 : vector<512xf32> to vector<1x512xf32>
    tpu.vector_store %arg8[%c0_20, %c0_21], %40 {strides = array<i32>} : memref<1x512xf32, #tpu.memory_space<vmem>>, vector<1x512xf32>,
    return
  }
  func.func @transform_0(%arg0: i32) -> (i32, i32) {
    %c0_i32 = arith.constant 0 : i32
    %c0_i32_0 = arith.constant 0 : i32
    return %arg0, %c0_i32 : i32, i32
  }
  func.func @transform_1(%arg0: i32) -> (i32, i32) {
    %c0_i32 = arith.constant 0 : i32
    %c0_i32_0 = arith.constant 0 : i32
    %c0_i32_1 = arith.constant 0 : i32
    return %c0_i32, %c0_i32_0 : i32, i32
  }
  func.func @transform_2(%arg0: i32) -> (i32, i32) {
    %c0_i32 = arith.constant 0 : i32
    %c0_i32_0 = arith.constant 0 : i32
    %c0_i32_1 = arith.constant 0 : i32
    return %c0_i32, %c0_i32_0 : i32, i32
  }
  func.func @transform_3(%arg0: i32) -> (i32, i32) {
    %c0_i32 = arith.constant 0 : i32
    %c0_i32_0 = arith.constant 0 : i32
    %c0_i32_1 = arith.constant 0 : i32
    return %c0_i32, %c0_i32_0 : i32, i32
  }
  func.func @transform_4(%arg0: i32) -> (i32, i32) {
    %c0_i32 = arith.constant 0 : i32
    %c0_i32_0 = arith.constant 0 : i32
    %c0_i32_1 = arith.constant 0 : i32
    return %c0_i32, %c0_i32_0 : i32, i32
  }
  func.func @transform_5(%arg0: i32) -> (i32, i32) {
    %c0_i32 = arith.constant 0 : i32
    %c0_i32_0 = arith.constant 0 : i32
    %c0_i32_1 = arith.constant 0 : i32
    return %c0_i32, %c0_i32_0 : i32, i32
  }
  func.func @transform_6(%arg0: i32) -> i32 {
    %c0_i32 = arith.constant 0 : i32
    %c0_i32_0 = arith.constant 0 : i32
    return %c0_i32 : i32
  }
  func.func @transform_7(%arg0: i32) -> (i32, i32) {
    %c0_i32 = arith.constant 0 : i32
    %c0_i32_0 = arith.constant 0 : i32
    return %c0_i32, %arg0 : i32, i32
  }
}

</mosaic_0001>

<bundles_post_ra>
// kernel: classifier_mlp_forward.1
= control target key start
LH: loop header
LB: loop body
LE: loop exit
PB: predicated region body
PF: predicated region fallthrough
CT: control target
= control target key end

     0   :  { %s12514_s0 = inlined_call_operand.vmem [shape: s32[1024,2], index: 0, kind: input, shape index: {}]   ;;  %s12515_s1 = inlined_call_operand.vmem [shape: bf16[64,128], index: 1, kind: input, shape index: {}]   ;;  %s12516_s2 = inlined_call_operand.vmem [shape: bf16[64,128], index: 2, kind: input, shape index: {}]   ;;  %s12517_s3 = inlined_call_operand.vmem [shape: bf16[256,128], index: 3, kind: input, shape index: {}]   ;;  %s12518_s4 = inlined_call_operand.vmem [shape: f32[1,128], index: 4, kind: input, shape index: {}]   ;;  %s12519_s5 = inlined_call_operand.vmem [shape: f32[1,128], index: 5, kind: input, shape index: {}]   ;;  %s12520_s6 = inlined_call_operand.<no memory space> [shape: f32[1], index: 6, kind: input, shape index: {}]   ;;  %s12521_s7 = inlined_call_operand.hbm [shape: f32[1,1024], index: 7, kind: output, shape index: {}]  }
   0x1   :  { %12 = sst [smem:[#allocation2]] %s12520_s6 }
   0x2   :  { %13 = vsyncpa [#allocation4], 0 }
   0x3   :  { %15 = vsyncpa [#allocation4 + $0x1], 0  ;;  %s9181_s26 = smov 0   ;;  %s9183_s27 = smov 0  }
   0x4   :  { %s9185_s28 = smov 0   ;;  %s9187_s29 = smov 0  }
   0x5 LB: > { %s8593_s6 = sadd.s32 4294967295, %s9131_s29   ;;  %s8594_s30 = sadd.s32 4294967294, %s9131_s29   ;;  %s9131_s29 = sphi %s9187_s29, %s12683_s29   ;;  %s9127_s28 = sphi %s9185_s28, %s12682_s28   ;;  %s9123_s27 = sphi %s9183_s27, %s12681_s27   ;;  %s9119_s26 = sphi %s9181_s26, %s12680_s26  }
   0x6   : > { %s9204_s8 = sadd.s32 1, %s9131_s29   ;;  %s180_s9 = sadd.s32 1, %s9127_s28 }
   0x7   : > { %s177_s10 = ssub.s32 %s9131_s29, %s9204_s8  ;;  %p190_p0 = scmp.ne.s32.totalorder %s9127_s28, %s9123_s27 }
   0x8   : > { %p178_p1 = scmp.eq.s32.totalorder %s177_s10, 0  ;;  %p191_p2 = scmp.eq.s32.totalorder %s8593_s6, 1 }
   0x9   : > { %p196_p3 = scmp.ne.s32.totalorder %s9123_s27, %s9119_s26  ;;  %p197_p4 = scmp.eq.s32.totalorder %s8594_s30, 1 }
   0xa   : > { %s9214_s11 = scalar_select %p178_p1, %s9127_s28, %s180_s9  }
   0xb   : > { %p9216_p5 = por %p191_p2, %p190_p0  ;;  %p9220_p6 = por %p197_p4, %p196_p3 }
   0xc   : > { %p8597_p7 = scmp.ge.s32.totalorder %s9131_s29, 1  ;;  %p242_p8 = scmp.lt.s32.totalorder %s9131_s29, 3 }
   0xe   : > { %p243_p9 = pnand %p8597_p7, %p242_p8 }
  0x10   : > { %246 = sbr.rel (%p243_p9) target bundleno = 1428 (0x594), region = 48 }
  0x17   : > { %s9226_s14 = sshll.u32 %s8593_s6, 6  ;;  %v9133_v0 = vmov 1   ;;  %v9134_v1 = vmov 0   ;;  %v9043_v20 = vld [vmem:[%s12516_s2] sm:$0xff]   ;;  %v9044_v23 = vld [vmem:[%s12516_s2 + $0x8] sm:$0xff]   ;;  %v9045_v25 = vld [vmem:[%s12516_s2 + $0x10] sm:$0xff]  }
  0x18   : > { %8990 = vset.pattern.permute.xlu0 %v9133_v0  ;;  %8988 = vset.pattern.permute.xlu1 %v9134_v1  ;;  %p275_p10 = scmp.lt.s32.totalorder %s9226_s14, 127  ;;  %v9046_v27 = vld [vmem:[%s12516_s2 + $0x18] sm:$0xff]   ;;  %v9047_v28 = vld [vmem:[%s12515_s1] sm:$0xff]   ;;  %v9048_v30 = vld [vmem:[%s12515_s1 + $0x8] sm:$0xff]   ;;  %vm1084_vm2 = vcmask 523264   ;;  %s2638_s9 = sld [smem:[#allocation2]] }
  0x19   : > { %8841 = vmatprep.subr.bf16.mxu1 %v9043_v20  ;;  %8769 = vmatprep.subr.bf16.mxu0 %v9047_v28  ;;  %v9049_v31 = vld [vmem:[%s12515_s1 + $0x10] sm:$0xff]   ;;  %v9050_v32 = vld [vmem:[%s12515_s1 + $0x18] sm:$0xff]   ;;  %s271_s18 = sand.u32 1, %s9123_s27   ;;  %s12472_s25 = scalar_lea.hbm %s12521_s7, %s9226_s14 }
  0x1a   : > { %s276_s15 = scalar_select %p275_p10, %s9226_s14, 127  ;;  %8842 = vmatpush3.bf16.msra.mxu1 %v9043_v20  ;;  %8770 = vmatpush3.bf16.msra.mxu0 %v9047_v28 }
  0x1b   : > { %8843 = vmatprep.subr.bf16.mxu1 %v9044_v23  ;;  %8771 = vmatprep.subr.bf16.mxu0 %v9048_v30  ;;  %s8598_s20 = sshll.u32 %s271_s18, 2  ;;  %s8521_s6 = scalar_lea.sflag [#allocation4], %s271_s18 }
  0x1c   : > { %s8600_s16 = sshll.u32 %s276_s15, 3  ;;  %s273_s21 = scalar_lea.vmem [#allocation3], %s8598_s20 }
  0x1d   : > { %s9235_s19 = scalar_lea.vmem %s12514_s0, %s8600_s16  ;;  %s8535_s22 = sshll.u32 %s273_s21, 4  ;;  %s12474_s22 = int_to_ptr.vmem [resolvable:$true] %s8535_s22 }
  0x1e   : > { %v284_v2 = vld [vmem:[%s9235_s19 + $0x10] sm:$0xff]  ;;  %v9239_v3 = vld [vmem:[%s9235_s19 + $0x8] sm:$0xff]  ;;  %v285_v4 = vld [vmem:[%s9235_s19 + $0x18] sm:$0xff]  ;;  %8844 = vmatpush3.bf16.msra.mxu1 %v9044_v23  ;;  %8772 = vmatpush3.bf16.msra.mxu0 %v9048_v30  ;;  %s9069_s30 = scalar_lea.vmem %s12474_s22, 64 }
  0x1f   : > { %355 = vperm.xlu1 %8988, %v284_v2   ;;  %704 = vperm.xlu0 %8990, %v9239_v3   ;;  %v9244_v5 = vld [vmem:[%s9235_s19 + $0x20] sm:$0xff]  ;;  %v287_v6 = vld [vmem:[%s9235_s19 + $0x28] sm:$0xff]  ;;  %v9249_v7 = vld [vmem:[%s9235_s19 + $0x30] sm:$0xff]  ;;  %p9070_p11 = scmp.ne.s32.totalorder %s12474_s22, %s9069_s30 }
  0x20   : > { %v289_v8 = vld [vmem:[%s9235_s19 + $0x38] sm:$0xff]  ;;  %v9254_v9 = vld [vmem:[%s9235_s19 + $0x40] sm:$0xff]  ;;  %v291_v10 = vld [vmem:[%s9235_s19 + $0x48] sm:$0xff]  ;;  %8845 = vmatprep.subr.bf16.mxu1 %v9045_v25  ;;  %8773 = vmatprep.subr.bf16.mxu0 %v9049_v31 }
  0x21   : > { %v9258_v11 = vld [vmem:[%s9235_s19 + $0x50] sm:$0xff]  ;;  %v9262_v12 = vld [vmem:[%s9235_s19 + $0x58] sm:$0xff]  ;;  %v9265_v13 = vld [vmem:[%s9235_s19 + $0x60] sm:$0xff]  ;;  %p9071_p12 = pnand %p9070_p11, %p9216_p5 }
  0x22   : > { %v295_v14 = vld [vmem:[%s9235_s19 + $0x68] sm:$0xff]  ;;  %v9270_v15 = vld [vmem:[%s9235_s19 + $0x70] sm:$0xff]  ;;  %v297_v16 = vld [vmem:[%s9235_s19 + $0x78] sm:$0xff]  ;;  %8846 = vmatpush3.bf16.msra.mxu1 %v9045_v25  ;;  %8774 = vmatpush3.bf16.msra.mxu0 %v9049_v31 }
  0x23   : > { %358 = vperm.xlu1 %8988, %v285_v4   ;;  %713 = vperm.xlu0 %8990, %v9244_v5   ;;  %v9277_v17 = vld [vmem:[%s9235_s19 + $0x80] sm:$0xff]  ;;  %v299_v18 = vld [vmem:[%s9235_s19 + $0x88] sm:$0xff]  ;;  %v9282_v19 = vld [vmem:[%s9235_s19 + $0x90] sm:$0xff]  ;;  %p9072_p13 = pneg %p9071_p12 }
  0x24   : > { %v9289_v21 = vld [vmem:[%s9235_s19 + $0xb0] sm:$0xff]  ;;  %v282_v22 = vld [vmem:[%s9235_s19] sm:$0xff]  ;;  %8847 = vmatprep.subr.bf16.mxu1 %v9046_v27  ;;  %8775 = vmatprep.subr.bf16.mxu0 %v9050_v32  ;;  %v301_v33 = vld [vmem:[%s9235_s19 + $0x98] sm:$0xff] }
  0x25   : > { %v9298_v24 = vld [vmem:[%s9235_s19 + $0xd0] sm:$0xff]  ;;  %v302_v34 = vld [vmem:[%s9235_s19 + $0xa0] sm:$0xff]  ;;  %v303_v35 = vld [vmem:[%s9235_s19 + $0xa8] sm:$0xff] }
  0x26   : > { %v9305_v26 = vld [vmem:[%s9235_s19 + $0xf0] sm:$0xff]  ;;  %8848 = vmatpush3.bf16.msra.mxu1 %v9046_v27  ;;  %8776 = vmatpush3.bf16.msra.mxu0 %v9050_v32  ;;  %v305_v36 = vld [vmem:[%s9235_s19 + $0xb8] sm:$0xff]  ;;  %v306_v37 = vld [vmem:[%s9235_s19 + $0xc0] sm:$0xff] }
  0x27   : > { %364 = vperm.xlu1 %8988, %v287_v6   ;;  %719 = vperm.xlu0 %8990, %v9249_v7   ;;  %v9315_v29 = vld [vmem:[%s9235_s19 + $0x110] sm:$0xff]  ;;  %v307_v38 = vld [vmem:[%s9235_s19 + $0xc8] sm:$0xff]  ;;  %v309_v39 = vld [vmem:[%s9235_s19 + $0xd8] sm:$0xff] }
  0x28   : > { %8913 = vmatprep.subr.bf16.mxu1 %v9134_v1  ;;  %2086 = vmatprep.subr.bf16.mxu0 %v9134_v1  ;;  %v310_v40 = vld [vmem:[%s9235_s19 + $0xe0] sm:$0xff]  ;;  %v313_v41 = vld [vmem:[%s9235_s19 + $0xf8] sm:$0xff]  ;;  %v311_v47 = vld [vmem:[%s9235_s19 + $0xe8] sm:$0xff] }
  0x29   : > { %v314_v42 = vld [vmem:[%s9235_s19 + $0x100] sm:$0xff]  ;;  %v9358_v43 = vld [vmem:[%s9235_s19 + $0x118] sm:$0xff]  ;;  %v9384_v53 = vld [vmem:[%s9235_s19 + $0x130] sm:$0xff] }
  0x2a   : > { %v9364_v44 = vld [vmem:[%s9235_s19 + $0x120] sm:$0xff]  ;;  %v9372_v48 = vld [vmem:[%s9235_s19 + $0x138] sm:$0xff]  ;;  %v9394_v56 = vld [vmem:[%s9235_s19 + $0x150] sm:$0xff] }
  0x2b   : > { %370 = vperm.xlu1 %8988, %v289_v8   ;;  %725 = vperm.xlu0 %8990, %v9254_v9   ;;  %v9403_v59 = vld [vmem:[%s9235_s19 + $0x140] sm:$0xff]  ;;  %v9414_v62 = vld [vmem:[%s9235_s19 + $0x158] sm:$0xff] }
  0x2f   : > { %376 = vperm.xlu1 %8988, %v291_v10   ;;  %731 = vperm.xlu0 %8990, %v9258_v11  }
  0x33   : > { %382 = vperm.xlu1 %8988, %v9262_v12   ;;  %737 = vperm.xlu0 %8990, %v9265_v13  }
  0x37   : > { %388 = vperm.xlu1 %8988, %v295_v14   ;;  %743 = vperm.xlu0 %8990, %v9270_v15  }
  0x3b   : > { %394 = vperm.xlu1 %8988, %v297_v16   ;;  %749 = vperm.xlu0 %8990, %v9277_v17  }
  0x3f   : > { %400 = vperm.xlu1 %8988, %v299_v18   ;;  %755 = vperm.xlu0 %8990, %v9282_v19  }
  0x43   : > { %8989 = vset.pattern.permute.xlu1 %v9133_v0  ;;  %767 = vperm.xlu0 %8990, %v9289_v21  }
  0x44   : > { %701 = vperm.xlu1 %8989, %v282_v22  }
  0x47   : > { %779 = vperm.xlu0 %8990, %v9298_v24  }
  0x48   : > { %707 = vperm.xlu1 %8989, %v284_v2  }
  0x4b   : > { %791 = vperm.xlu0 %8990, %v9305_v26  }
  0x4c   : > { %710 = vperm.xlu1 %8989, %v285_v4   ;;  %v9424_v4 = vld [vmem:[%s9235_s19 + $0x160] sm:$0xff] }
  0x4f   : > { %803 = vperm.xlu0 %8990, %v9315_v29  }
  0x50   : > { %716 = vperm.xlu1 %8989, %v287_v6  }
  0x53   : > { %9004 = vset.pattern.permute.xlu0 %v9134_v1 }
  0x54   : > { %349 = vperm.xlu0 %9004, %v282_v22   ;;  %722 = vperm.xlu1 %8989, %v289_v8   ;;  %v9432_v8 = vld [vmem:[%s9235_s19 + $0x178] sm:$0xff] }
  0x58   : > { %352 = vperm.xlu0 %9004, %v9239_v3   ;;  %728 = vperm.xlu1 %8989, %v291_v10   ;;  %v315_v3 = vld [vmem:[%s9235_s19 + $0x108] sm:$0xff] }
  0x5c   : > { %361 = vperm.xlu0 %9004, %v9244_v5   ;;  %734 = vperm.xlu1 %8989, %v9262_v12   ;;  %v12522_v5 = vlaneseq  ;;  %v9445_v12 = vld [vmem:[%s9235_s19 + $0x170] sm:$0xff] }
  0x60   : > { %367 = vperm.xlu0 %9004, %v9249_v7   ;;  %740 = vperm.xlu1 %8989, %v295_v14  }
  0x64   : > { %373 = vperm.xlu0 %9004, %v9254_v9   ;;  %746 = vperm.xlu1 %8989, %v297_v16   ;;  %v9435_v9 = vand.u32 127, %v12522_v5 }
  0x66   : > { %12558 = vst [vmem:[#allocation6_spill] sm:$0xff] %v9435_v9 }
  0x68   : > { %379 = vperm.xlu0 %9004, %v9258_v11   ;;  %752 = vperm.xlu1 %8989, %v299_v18  }
  0x6c   : > { %385 = vperm.xlu0 %9004, %v9265_v13   ;;  %758 = vperm.xlu1 %8989, %v301_v33  }
  0x70   : > { %391 = vperm.xlu0 %9004, %v9270_v15   ;;  %761 = vperm.xlu1 %8989, %v302_v34   ;;  %v9135_v15 = vmov 0.0  }
  0x74   : > { %397 = vperm.xlu0 %9004, %v9277_v17   ;;  %764 = vperm.xlu1 %8989, %v303_v35   ;;  %v9454_v17 = vld [vmem:[%s9235_s19 + $0x190] sm:$0xff] }
  0x78   : > { %403 = vperm.xlu0 %9004, %v9282_v19   ;;  %8991 = vset.pattern.permute.xlu1 %v9134_v1 }
  0x79   : > { %412 = vperm.xlu1 %8991, %v303_v35   ;;  %v9494_v35 = vld [vmem:[%s9235_s19 + $0x1a0] sm:$0xff] }
  0x7c   : > { %406 = vperm.xlu0 %9004, %v301_v33   ;;  %v319_v33 = vld [vmem:[%s9235_s19 + $0x128] sm:$0xff] }
  0x7d   : > { %8992 = vset.pattern.permute.xlu1 %v9133_v0 }
  0x7e   : > { %770 = vperm.xlu1 %8992, %v305_v36  }
  0x80   : > { %409 = vperm.xlu0 %9004, %v302_v34  }
  0x82   : > { %8993 = vset.pattern.permute.xlu1 %v9134_v1 }
  0x83   : > { %415 = vperm.xlu1 %8993, %v9289_v21  }
  0x84   : > { %418 = vperm.xlu0 %9004, %v305_v36  }
  0x87   : > { %8994 = vset.pattern.permute.xlu1 %v9133_v0 }
  0x88   : > { %773 = vperm.xlu1 %8994, %v306_v37   ;;  %421 = vperm.xlu0 %9004, %v306_v37  }
  0x8c   : > { %776 = vperm.xlu1 %8994, %v307_v38   ;;  %430 = vperm.xlu0 %9004, %v309_v39  }
  0x90   : > { %8995 = vset.pattern.permute.xlu1 %v9134_v1  ;;  %433 = vperm.xlu0 %9004, %v310_v40  }
  0x91   : > { %424 = vperm.xlu1 %8995, %v307_v38  }
  0x94   : > { %442 = vperm.xlu0 %9004, %v313_v41  }
  0x95   : > { %8996 = vset.pattern.permute.xlu1 %v9133_v0 }
  0x96   : > { %782 = vperm.xlu1 %8996, %v309_v39  }
  0x98   : > { %445 = vperm.xlu0 %9004, %v314_v42  }
  0x9a   : > { %8997 = vset.pattern.permute.xlu1 %v9134_v1 }
  0x9b   : > { %427 = vperm.xlu1 %8997, %v9298_v24   ;;  %v9469_v24 = vld [vmem:[%s9235_s19 + $0x180] sm:$0xff] }
  0x9c   : > { %454 = vperm.xlu0 %9004, %v9358_v43  }
  0x9e   : > { %v9366_v45 = vpop.permute.xlu1 %355  ;;  %v705_v46 = vpop.permute.xlu0 %704 }
  0x9f   : > { %8998 = vset.pattern.permute.xlu1 %v9133_v0  ;;  %vm893_vm0 = vcmp.eq.s32.totalorder %v705_v46, %v9435_v9  ;;  %vm542_vm12 = vcmp.eq.s32.totalorder %v9366_v45, %v9435_v9 }
  0xa0   : > { %785 = vperm.xlu1 %8998, %v310_v40   ;;  %457 = vperm.xlu0 %9004, %v9364_v44   ;;  %v957_v16 = vsel %vm893_vm0, 1.0, %v9135_v15 }
  0xa2   : > { %v9374_v49 = vpop.permute.xlu1 %358  ;;  %v9376_v50 = vpop.permute.xlu0 %713 }
  0xa3   : > { %vm896_vm4 = vcmp.eq.s32.totalorder %v9376_v50, %v9435_v9  ;;  %vm543_vm11 = vcmp.eq.s32.totalorder %v9374_v49, %v9435_v9  ;;  %v606_v50 = vsel %vm542_vm12, 1.0, %v9135_v15 }
  0xa4   : > { %788 = vperm.xlu1 %8998, %v311_v47   ;;  %466 = vperm.xlu0 %9004, %v9372_v48   ;;  %v960_v30 = vsel %vm896_vm4, 1.0, %v9135_v15 }
  0xa6   : > { %v9379_v51 = vpop.permute.xlu1 %364  ;;  %v9381_v52 = vpop.permute.xlu0 %719 }
  0xa7   : > { %vm898_vm6 = vcmp.eq.s32.totalorder %v9381_v52, %v9435_v9  ;;  %vm545_vm0 = vcmp.eq.s32.totalorder %v9379_v51, %v9435_v9 }
  0xa8   : > { %8999 = vset.pattern.permute.xlu1 %v9134_v1  ;;  %9011 = vset.pattern.permute.xlu0 %v9133_v0  ;;  %v962_v36 = vsel %vm898_vm6, 1.0, %v9135_v15  ;;  %v609_v51 = vsel %vm545_vm0, 1.0, %v9135_v15 }
  0xa9   : > { %436 = vperm.xlu1 %8999, %v311_v47   ;;  %815 = vperm.xlu0 %9011, %v9384_v53   ;;  %v607_v47 = vsel %vm543_vm11, 1.0, %v9135_v15 }
  0xaa   : > { %v9389_v54 = vpop.permute.xlu1 %370  ;;  %v9391_v55 = vpop.permute.xlu0 %725 }
  0xab   : > { %vm900_vm8 = vcmp.eq.s32.totalorder %v9391_v55, %v9435_v9 }
  0xad   : > { %9000 = vset.pattern.permute.xlu1 %v9133_v0  ;;  %827 = vperm.xlu0 %9011, %v9394_v56  }
  0xae   : > { %v9398_v57 = vpop.permute.xlu1 %376  ;;  %794 = vperm.xlu1 %9000, %v313_v41   ;;  %v9400_v58 = vpop.permute.xlu0 %731  ;;  %v9507_v41 = vld [vmem:[%s9235_s19 + $0x1b8] sm:$0xff] }
  0xaf   : > { %vm902_vm13 = vcmp.eq.s32.totalorder %v9400_v58, %v9435_v9  ;;  %v669_v58 = vpack.c.bf16 %v607_v47, %v606_v50 }
  0xb1   : > { %9014 = vset.pattern.permute.xlu0 %v9134_v1 }
  0xb2   : > { %v9406_v60 = vpop.permute.xlu1 %382  ;;  %9001 = vset.pattern.permute.xlu1 %v9134_v1  ;;  %v9409_v61 = vpop.permute.xlu0 %737  ;;  %469 = vperm.xlu0 %9014, %v9403_v59  }
  0xb3   : > { %439 = vperm.xlu1 %9001, %v9305_v26  }
  0xb6   : > { %v9416_v63 = vpop.permute.xlu1 %388  ;;  %v9418_v2 = vpop.permute.xlu0 %743  ;;  %478 = vperm.xlu0 %9014, %v9414_v62  }
  0xb7   : > { %9002 = vset.pattern.permute.xlu1 %v9133_v0  ;;  %vm906_vm6 = vcmp.eq.s32.totalorder %v9418_v2, %v9435_v9 }
  0xb8   : > { %797 = vperm.xlu1 %9002, %v314_v42   ;;  %v964_v42 = vsel %vm900_vm8, 1.0, %v9135_v15 }
  0xba   : > { %v9426_v6 = vpop.permute.xlu1 %394  ;;  %v9428_v7 = vpop.permute.xlu0 %749  ;;  %481 = vperm.xlu0 %9014, %v9424_v4  }
  0xbc   : > { %800 = vperm.xlu1 %9002, %v315_v3  }
  0xbe   : > { %v9437_v10 = vpop.permute.xlu1 %400  ;;  %v9439_v11 = vpop.permute.xlu0 %755  ;;  %490 = vperm.xlu0 %9014, %v9432_v8  }
  0xc0   : > { %9003 = vset.pattern.permute.xlu1 %v9134_v1 }
  0xc1   : > { %448 = vperm.xlu1 %9003, %v315_v3   ;;  %v966_v3 = vsel %vm902_vm13, 1.0, %v9135_v15  ;;  %vm551_vm13 = vcmp.eq.s32.totalorder %v9406_v60, %v9435_v9  ;;  %v9589_v60 = vld [vmem:[%s9235_s19 + $0x1c0] sm:$0xff] }
  0xc2   : > { %v9447_v13 = vpop.permute.xlu0 %767  ;;  %9021 = vset.pattern.permute.xlu0 %v9133_v0 }
  0xc3   : > { %v702_v14 = vpop.permute.xlu1 %701  ;;  %839 = vperm.xlu0 %9021, %v9445_v12  }
  0xc4   : > { %vm892_vm1 = vcmp.eq.s32.totalorder %v702_v14, %v9435_v9 }
  0xc5   : > { %9005 = vset.pattern.permute.xlu1 %v9133_v0  ;;  %v956_v18 = vsel %vm892_vm1, 1.0, %v9135_v15  ;;  %vm904_vm1 = vcmp.eq.s32.totalorder %v9409_v61, %v9435_v9 }
  0xc6   : > { %806 = vperm.xlu1 %9005, %v9358_v43   ;;  %v9459_v19 = vpop.permute.xlu0 %779  ;;  %v1020_v20 = vpack.c.bf16 %v957_v16, %v956_v18  ;;  %v9534_v18 = vld [vmem:[%s9235_s19 + $0x1b0] sm:$0xff] }
  0xc7   : > { %v708_v21 = vpop.permute.xlu1 %707  ;;  %851 = vperm.xlu0 %9021, %v9454_v17  }
  0xc8   : > { %8849 = vmatprep.mubr.msk.bf16.mxu1 %vm1084_vm2, %v1020_v20  ;;  %vm894_vm3 = vcmp.eq.s32.totalorder %v708_v21, %v9435_v9 }
  0xc9   : > { %v958_v25 = vsel %vm894_vm3, 1.0, %v9135_v15 }
  0xca   : > { %9006 = vset.pattern.permute.xlu1 %v9134_v1  ;;  %v9465_v22 = vpop.permute.xlu0 %791 }
  0xcb   : > { %451 = vperm.xlu1 %9006, %v9315_v29   ;;  %v711_v23 = vpop.permute.xlu1 %710  ;;  %9024 = vset.pattern.permute.xlu0 %v9134_v1  ;;  %v9481_v29 = vld [vmem:[%s9235_s19 + $0x198] sm:$0xff] }
  0xcc   : > { %vm895_vm5 = vcmp.eq.s32.totalorder %v711_v23, %v9435_v9  ;;  %493 = vperm.xlu0 %9024, %v9469_v24  }
  0xcd   : > { %v959_v26 = vsel %vm895_vm5, 1.0, %v9135_v15  ;;  %vm547_vm5 = vcmp.eq.s32.totalorder %v9389_v54, %v9435_v9 }
  0xce   : > { %v1021_v27 = vpack.c.bf16 %v959_v26, %v958_v25  ;;  %v9478_v28 = vpop.permute.xlu0 %803  ;;  %v968_v26 = vsel %vm904_vm1, 1.0, %v9135_v15  ;;  %v611_v54 = vsel %vm547_vm5, 1.0, %v9135_v15  ;;  %vm553_vm1 = vcmp.eq.s32.totalorder %v9416_v63, %v9435_v9 }
  0xcf   : > { %9007 = vset.pattern.permute.xlu1 %v9133_v0  ;;  %v717_v31 = vpop.permute.xlu1 %716  ;;  %vm555_vm5 = vcmp.eq.s32.totalorder %v9426_v6, %v9435_v9 }
  0xd0   : > { %vm897_vm7 = vcmp.eq.s32.totalorder %v717_v31, %v9435_v9  ;;  %809 = vperm.xlu1 %9007, %v9364_v44   ;;  %8850 = vmatmul.mubr.msk.bf16.vlgmr.msra.gmra.mrb[0].mxu1 %vm1084_vm2, %v1021_v27 }
  0xd1   : > { %v961_v32 = vsel %vm897_vm7, 1.0, %v9135_v15  ;;  %502 = vperm.xlu0 %9024, %v9481_v29  }
  0xd2   : > { %v1022_v34 = vpack.c.bf16 %v961_v32, %v960_v30 }
  0xd3   : > { %v350_v37 = vpop.permute.xlu0 %349  ;;  %v723_v38 = vpop.permute.xlu1 %722 }
  0xd4   : > { %vm540_vm9 = vcmp.eq.s32.totalorder %v350_v37, %v9435_v9  ;;  %vm899_vm10 = vcmp.eq.s32.totalorder %v723_v38, %v9435_v9  ;;  %812 = vperm.xlu1 %9007, %v319_v33   ;;  %8853 = vmatprep.mubr.msk.bf16.mxu1 %vm1084_vm2, %v1022_v34 }
  0xd5   : > { %v963_v39 = vsel %vm899_vm10, 1.0, %v9135_v15  ;;  %505 = vperm.xlu0 %9024, %v9494_v35   ;;  %v604_v46 = vsel %vm540_vm9, 1.0, %v9135_v15  ;;  %vm549_vm9 = vcmp.eq.s32.totalorder %v9398_v57, %v9435_v9  ;;  %vm908_vm10 = vcmp.eq.s32.totalorder %v9428_v7, %v9435_v9 }
  0xd6   : > { %v1023_v40 = vpack.c.bf16 %v963_v39, %v962_v36  ;;  %v613_v57 = vsel %vm549_vm9, 1.0, %v9135_v15  ;;  %v972_v39 = vsel %vm908_vm10, 1.0, %v9135_v15 }
  0xd7   : > { %v353_v43 = vpop.permute.xlu0 %352  ;;  %v729_v44 = vpop.permute.xlu1 %728 }
  0xd8   : > { %vm541_vm14 = vcmp.eq.s32.totalorder %v353_v43, %v9435_v9  ;;  %vm901_vm15 = vcmp.eq.s32.totalorder %v729_v44, %v9435_v9  ;;  %9008 = vset.pattern.permute.xlu1 %v9134_v1  ;;  %8854 = vmatmul.mubr.msk.bf16.gmra.mrb[4].mxu1 %vm1084_vm2, %v1023_v40  ;;  %v615_v43 = vsel %vm551_vm13, 1.0, %v9135_v15 }
  0xd9   : > { %v965_v45 = vsel %vm901_vm15, 1.0, %v9135_v15  ;;  %460 = vperm.xlu1 %9008, %v319_v33   ;;  %v605_v49 = vsel %vm541_vm14, 1.0, %v9135_v15  ;;  %514 = vperm.xlu0 %9024, %v9507_v41   ;;  %v970_v33 = vsel %vm906_vm6, 1.0, %v9135_v15  ;;  %vm910_vm14 = vcmp.eq.s32.totalorder %v9439_v11, %v9435_v9  ;;  %v323_v11 = vld [vmem:[%s9235_s19 + $0x148] sm:$0xff] }
  0xda   : > { %v1024_v52 = vpack.c.bf16 %v965_v45, %v964_v42  ;;  %v668_v55 = vpack.c.bf16 %v605_v49, %v604_v46 }
  0xdb   : > { %v362_v14 = vpop.permute.xlu0 %361  ;;  %v735_v16 = vpop.permute.xlu1 %734 }
  0xdc   : > { %vm544_vm3 = vcmp.eq.s32.totalorder %v362_v14, %v9435_v9  ;;  %vm903_vm4 = vcmp.eq.s32.totalorder %v735_v16, %v9435_v9  ;;  %8777 = vmatprep.mubr.msk.bf16.mxu0 %vm1084_vm2, %v668_v55  ;;  %8857 = vmatprep.mubr.msk.bf16.mxu1 %vm1084_vm2, %v1024_v52  ;;  %v9604_v52 = vld [vmem:[%s9235_s19 + $0x1d8] sm:$0xff]  ;;  %v617_v55 = vsel %vm553_vm1, 1.0, %v9135_v15 }
  0xdd   : > { %v608_v20 = vsel %vm544_vm3, 1.0, %v9135_v15  ;;  %v967_v21 = vsel %vm903_vm4, 1.0, %v9135_v15  ;;  %8778 = vmatmul.mubr.msk.bf16.vlgmr.msra.gmra.mrb[0].mxu0 %vm1084_vm2, %v669_v58  ;;  %9009 = vset.pattern.permute.xlu1 %v9133_v0 }
  0xde   : > { %v670_v23 = vpack.c.bf16 %v609_v51, %v608_v20  ;;  %v1025_v25 = vpack.c.bf16 %v967_v21, %v966_v3  ;;  %818 = vperm.xlu1 %9009, %v9372_v48   ;;  %9031 = vset.pattern.permute.xlu0 %v9133_v0  ;;  %v9557_v48 = vld [vmem:[%s9235_s19 + $0x1d0] sm:$0xff]  ;;  %v619_v21 = vsel %vm555_vm5, 1.0, %v9135_v15 }
  0xdf   : > { %v368_v27 = vpop.permute.xlu0 %367  ;;  %v741_v30 = vpop.permute.xlu1 %740  ;;  %863 = vperm.xlu0 %9031, %v9534_v18   ;;  %v9617_v20 = vld [vmem:[%s9235_s19 + $0x1f0] sm:$0xff] }
  0xe0   : > { %vm546_vm7 = vcmp.eq.s32.totalorder %v368_v27, %v9435_v9  ;;  %vm905_vm8 = vcmp.eq.s32.totalorder %v741_v30, %v9435_v9  ;;  %8781 = vmatprep.mubr.msk.bf16.mxu0 %vm1084_vm2, %v670_v23  ;;  %8858 = vmatmul.mubr.msk.bf16.gmra.mrb[8].mxu1 %vm1084_vm2, %v1025_v25 }
  0xe1   : > { %v610_v61 = vsel %vm546_vm7, 1.0, %v9135_v15  ;;  %v969_v31 = vsel %vm905_vm8, 1.0, %v9135_v15  ;;  %vm557_vm7 = vcmp.eq.s32.totalorder %v9437_v10, %v9435_v9 }
  0xe2   : > { %v671_v2 = vpack.c.bf16 %v611_v54, %v610_v61  ;;  %v1026_v32 = vpack.c.bf16 %v969_v31, %v968_v26  ;;  %9010 = vset.pattern.permute.xlu1 %v9134_v1  ;;  %v621_v27 = vsel %vm557_vm7, 1.0, %v9135_v15 }
  0xe3   : > { %v374_v34 = vpop.permute.xlu0 %373  ;;  %463 = vperm.xlu1 %9010, %v9384_v53   ;;  %v747_v36 = vpop.permute.xlu1 %746  ;;  %875 = vperm.xlu0 %9031, %v9557_v48  }
  0xe4   : > { %vm548_vm11 = vcmp.eq.s32.totalorder %v374_v34, %v9435_v9  ;;  %vm907_vm12 = vcmp.eq.s32.totalorder %v747_v36, %v9435_v9  ;;  %8861 = vmatprep.mubr.msk.bf16.mxu1 %vm1084_vm2, %v1026_v32 }
  0xe5   : > { %v612_v37 = vsel %vm548_vm11, 1.0, %v9135_v15  ;;  %v971_v38 = vsel %vm907_vm12, 1.0, %v9135_v15  ;;  %8782 = vmatmul.mubr.msk.bf16.gmra.mrb[4].mxu0 %vm1084_vm2, %v671_v2  ;;  %vm914_vm12 = vcmp.eq.s32.totalorder %v9447_v13, %v9435_v9 }
  0xe6   : > { %v672_v53 = vpack.c.bf16 %v613_v57, %v612_v37  ;;  %v1027_v7 = vpack.c.bf16 %v971_v38, %v970_v33  ;;  %v9641_v33 = vld [vmem:[%s9235_s19 + $0x1e0] sm:$0xff] }
  0xe7   : > { %v380_v40 = vpop.permute.xlu0 %379  ;;  %9012 = vset.pattern.permute.xlu1 %v9133_v0  ;;  %v753_v42 = vpop.permute.xlu1 %752  ;;  %9034 = vset.pattern.permute.xlu0 %v9134_v1 }
  0xe8   : > { %vm550_vm15 = vcmp.eq.s32.totalorder %v380_v40, %v9435_v9  ;;  %vm909_vm0 = vcmp.eq.s32.totalorder %v753_v42, %v9435_v9  ;;  %8785 = vmatprep.mubr.msk.bf16.mxu0 %vm1084_vm2, %v672_v53  ;;  %821 = vperm.xlu1 %9012, %v9403_v59   ;;  %v974_v59 = vsel %vm910_vm14, 1.0, %v9135_v15  ;;  %v327_v42 = vld [vmem:[%s9235_s19 + $0x168] sm:$0xff] }
  0xe9   : > { %v614_v44 = vsel %vm550_vm15, 1.0, %v9135_v15  ;;  %v973_v46 = vsel %vm909_vm0, 1.0, %v9135_v15  ;;  %8862 = vmatmul.mubr.msk.bf16.gmra.mrb[12].mxu1 %vm1084_vm2, %v1027_v7  ;;  %517 = vperm.xlu0 %9034, %v9589_v60  }
  0xea   : > { %v673_v47 = vpack.c.bf16 %v615_v43, %v614_v44  ;;  %v1028_v45 = vpack.c.bf16 %v973_v46, %v972_v39 }
  0xeb   : > { %v386_v49 = vpop.permute.xlu0 %385  ;;  %v759_v50 = vpop.permute.xlu1 %758 }
  0xec   : > { %vm552_vm3 = vcmp.eq.s32.totalorder %v386_v49, %v9435_v9  ;;  %vm911_vm4 = vcmp.eq.s32.totalorder %v759_v50, %v9435_v9  ;;  %824 = vperm.xlu1 %9012, %v323_v11   ;;  %8865 = vmatprep.mubr.msk.bf16.mxu1 %vm1084_vm2, %v1028_v45 }
  0xed   : > { %v616_v63 = vsel %vm552_vm3, 1.0, %v9135_v15  ;;  %v975_v58 = vsel %vm911_vm4, 1.0, %v9135_v15  ;;  %8786 = vmatmul.mubr.msk.bf16.gmra.mrb[8].mxu0 %vm1084_vm2, %v673_v47  ;;  %526 = vperm.xlu0 %9034, %v9604_v52  }
  0xee   : > { %v674_v3 = vpack.c.bf16 %v617_v55, %v616_v63  ;;  %v1029_v14 = vpack.c.bf16 %v975_v58, %v974_v59 }
  0xef   : > { %v392_v16 = vpop.permute.xlu0 %391  ;;  %v762_v51 = vpop.permute.xlu1 %761 }
  0xf0   : > { %vm554_vm6 = vcmp.eq.s32.totalorder %v392_v16, %v9435_v9  ;;  %8789 = vmatprep.mubr.msk.bf16.mxu0 %vm1084_vm2, %v674_v3  ;;  %9013 = vset.pattern.permute.xlu1 %v9134_v1  ;;  %vm912_vm8 = vcmp.eq.s32.totalorder %v762_v51, %v9435_v9 }
  0xf1   : > { %v618_v23 = vsel %vm554_vm6, 1.0, %v9135_v15  ;;  %8866 = vmatmul.mubr.msk.bf16.gmra.mrb[16].mxu1 %vm1084_vm2, %v1029_v14  ;;  %472 = vperm.xlu1 %9013, %v323_v11   ;;  %v976_v30 = vsel %vm912_vm8, 1.0, %v9135_v15  ;;  %vm918_vm8 = vcmp.eq.s32.totalorder %v9459_v19, %v9435_v9 }
  0xf2   : > { %v675_v6 = vpack.c.bf16 %v619_v21, %v618_v23  ;;  %9039 = vset.pattern.permute.xlu0 %v9133_v0  ;;  %v982_v21 = vsel %vm918_vm8, 1.0, %v9135_v15 }
  0xf3   : > { %v398_v25 = vpop.permute.xlu0 %397  ;;  %v765_v26 = vpop.permute.xlu1 %764  ;;  %887 = vperm.xlu0 %9039, %v9617_v20  }
  0xf4   : > { %vm556_vm9 = vcmp.eq.s32.totalorder %v398_v25, %v9435_v9  ;;  %vm913_vm10 = vcmp.eq.s32.totalorder %v765_v26, %v9435_v9 }
  0xf5   : > { %v620_v10 = vsel %vm556_vm9, 1.0, %v9135_v15  ;;  %v977_v54 = vsel %vm913_vm10, 1.0, %v9135_v15  ;;  %8790 = vmatmul.mubr.msk.bf16.gmra.mrb[12].mxu0 %vm1084_vm2, %v675_v6  ;;  %9015 = vset.pattern.permute.xlu1 %v9133_v0 }
  0xf6   : > { %v676_v61 = vpack.c.bf16 %v621_v27, %v620_v10  ;;  %v1030_v31 = vpack.c.bf16 %v977_v54, %v976_v30  ;;  %830 = vperm.xlu1 %9015, %v9414_v62   ;;  %v9651_v62 = vld [vmem:[%s9235_s19 + $0x1f8] sm:$0xff]  ;;  %v9051_v30 = vld [vmem:[%s12517_s3] sm:$0xff]  }
  0xf7   : > { %v404_v2 = vpop.permute.xlu0 %403  ;;  %9040 = vset.pattern.permute.xlu0 %v9134_v1  ;;  %2087 = vmatpush1.bf16.msra.mxu0 %v9051_v30 }
  0xf8   : > { %vm558_vm11 = vcmp.eq.s32.totalorder %v404_v2, %v9435_v9  ;;  %8793 = vmatprep.mubr.msk.bf16.mxu0 %vm1084_vm2, %v676_v61  ;;  %8869 = vmatprep.mubr.msk.bf16.mxu1 %vm1084_vm2, %v1030_v31  ;;  %v413_v32 = vpop.permute.xlu1 %412  ;;  %v9052_v61 = vld [vmem:[%s12517_s3 + $0x8] sm:$0xff]  }
  0xf9   : > { %529 = vperm.xlu0 %9040, %v9641_v33   ;;  %v622_v34 = vsel %vm558_vm11, 1.0, %v9135_v15  ;;  %vm561_vm14 = vcmp.eq.s32.totalorder %v413_v32, %v9435_v9  ;;  %2088 = vmatprep.subr.bf16.mxu0 %v9134_v1 }
  0xfa   : > { %9016 = vset.pattern.permute.xlu1 %v9134_v1  ;;  %v625_v39 = vsel %vm561_vm14, 1.0, %v9135_v15  ;;  %8929 = vmatpush1.bf16.msra.mxu1 %v9051_v30 }
  0xfb   : > { %v407_v36 = vpop.permute.xlu0 %406  ;;  %475 = vperm.xlu1 %9016, %v9394_v56   ;;  %v978_v56 = vsel %vm914_vm12, 1.0, %v9135_v15  ;;  %8914 = vmatprep.subr.bf16.mxu1 %v9134_v1 }
  0xfc   : > { %vm559_vm13 = vcmp.eq.s32.totalorder %v407_v36, %v9435_v9  ;;  %2089 = vmatpush1.bf16.msra.mxu0 %v9052_v61 }
  0xfd   : > { %v623_v57 = vsel %vm559_vm13, 1.0, %v9135_v15  ;;  %v771_v37 = vpop.permute.xlu1 %770  ;;  %538 = vperm.xlu0 %9040, %v9651_v62   ;;  %2090 = vmatprep.subr.bf16.mxu0 %v9134_v1 }
  0xfe   : > { %v677_v38 = vpack.c.bf16 %v623_v57, %v622_v34  ;;  %vm915_vm15 = vcmp.eq.s32.totalorder %v771_v37, %v9435_v9  ;;  %8930 = vmatpush1.bf16.msra.mxu1 %v9052_v61 }
  0xff   : > { %v979_v53 = vsel %vm915_vm15, 1.0, %v9135_v15  ;;  %v410_v13 = vpop.permute.xlu0 %409  ;;  %9017 = vset.pattern.permute.xlu1 %v9133_v0  ;;  %8915 = vmatprep.subr.bf16.mxu1 %v9134_v1 }
 0x100   : > { %v1031_v7 = vpack.c.bf16 %v979_v53, %v978_v56  ;;  %vm560_vm0 = vcmp.eq.s32.totalorder %v410_v13, %v9435_v9  ;;  %8794 = vmatmul.mubr.msk.bf16.gmra.mrb[16].mxu0 %vm1084_vm2, %v677_v38  ;;  %833 = vperm.xlu1 %9017, %v9424_v4   ;;  %v9053_v38 = vld [vmem:[%s12517_s3 + $0x10] sm:$0xff]  }
 0x101   : > { %v624_v40 = vsel %vm560_vm0, 1.0, %v9135_v15  ;;  %vm922_vm0 = vcmp.eq.s32.totalorder %v9465_v22, %v9435_v9  ;;  %2091 = vmatpush1.bf16.msra.mxu0 %v9053_v38  ;;  %v335_v22 = vld [vmem:[%s9235_s19 + $0x1a8] sm:$0xff] }
 0x102   : > { %v678_v43 = vpack.c.bf16 %v625_v39, %v624_v40  ;;  %8870 = vmatmul.mubr.msk.bf16.gmra.mrb[20].mxu1 %vm1084_vm2, %v1031_v7  ;;  %v416_v44 = vpop.permute.xlu1 %415  ;;  %v986_v56 = vsel %vm922_vm0, 1.0, %v9135_v15  ;;  %2092 = vmatprep.subr.bf16.mxu0 %v9134_v1 }
 0x103   : > { %vm562_vm1 = vcmp.eq.s32.totalorder %v416_v44, %v9435_v9  ;;  %v419_v46 = vpop.permute.xlu0 %418  ;;  %8931 = vmatpush1.bf16.msra.mxu1 %v9053_v38 }
 0x104   : > { %v626_v11 = vsel %vm562_vm1, 1.0, %v9135_v15  ;;  %vm563_vm3 = vcmp.eq.s32.totalorder %v419_v46, %v9435_v9  ;;  %836 = vperm.xlu1 %9017, %v327_v42   ;;  %8797 = vmatprep.mubr.msk.bf16.mxu0 %vm1084_vm2, %v678_v43  ;;  %v9054_v43 = vld [vmem:[%s12517_s3 + $0x18] sm:$0xff]  }
 0x105   : > { %v627_v4 = vsel %vm563_vm3, 1.0, %v9135_v15  ;;  %8916 = vmatprep.subr.bf16.mxu1 %v9134_v1  ;;  %2093 = vmatpush1.bf16.msra.mxu0 %v9054_v43 }
 0x106   : > { %v679_v47 = vpack.c.bf16 %v627_v4, %v626_v11  ;;  %2094 = vmatprep.subr.bf16.mxu0 %v9134_v1  ;;  %v9055_v4 = vld [vmem:[%s12517_s3 + $0x20] sm:$0xff]  }
 0x107   : > { %v774_v45 = vpop.permute.xlu1 %773  ;;  %v422_v49 = vpop.permute.xlu0 %421  ;;  %8932 = vmatpush1.bf16.msra.mxu1 %v9054_v43 }
 0x108   : > { %9018 = vset.pattern.permute.xlu1 %v9134_v1  ;;  %8798 = vmatmul.mubr.msk.bf16.gmra.mrb[20].mxu0 %vm1084_vm2, %v679_v47  ;;  %vm916_vm4 = vcmp.eq.s32.totalorder %v774_v45, %v9435_v9  ;;  %vm564_vm6 = vcmp.eq.s32.totalorder %v422_v49, %v9435_v9 }
 0x109   : > { %484 = vperm.xlu1 %9018, %v327_v42   ;;  %v980_v50 = vsel %vm916_vm4, 1.0, %v9135_v15  ;;  %v628_v58 = vsel %vm564_vm6, 1.0, %v9135_v15  ;;  %8917 = vmatprep.subr.bf16.mxu1 %v9134_v1 }
 0x10a   : > { %2095 = vmatpush1.bf16.msra.mxu0 %v9055_v4 }
 0x10b   : > { %v777_v59 = vpop.permute.xlu1 %776  ;;  %v431_v51 = vpop.permute.xlu0 %430  ;;  %8933 = vmatpush1.bf16.msra.mxu1 %v9055_v4  ;;  %2096 = vmatprep.subr.bf16.mxu0 %v9134_v1 }
 0x10c   : > { %vm917_vm5 = vcmp.eq.s32.totalorder %v777_v59, %v9435_v9  ;;  %vm567_vm10 = vcmp.eq.s32.totalorder %v431_v51, %v9435_v9  ;;  %8918 = vmatprep.subr.bf16.mxu1 %v9134_v1 }
 0x10d   : > { %v981_v55 = vsel %vm917_vm5, 1.0, %v9135_v15  ;;  %9019 = vset.pattern.permute.xlu1 %v9133_v0  ;;  %v631_v19 = vsel %vm567_vm10, 1.0, %v9135_v15 }
 0x10e   : > { %v1032_v63 = vpack.c.bf16 %v981_v55, %v980_v50  ;;  %842 = vperm.xlu1 %9019, %v9432_v8  }
 0x10f   : > { %v434_v54 = vpop.permute.xlu0 %433 }
 0x110   : > { %8873 = vmatprep.mubr.msk.bf16.mxu1 %vm1084_vm2, %v1032_v63  ;;  %v425_v3 = vpop.permute.xlu1 %424  ;;  %vm568_vm14 = vcmp.eq.s32.totalorder %v434_v54, %v9435_v9  ;;  %v9056_v63 = vld [vmem:[%s12517_s3 + $0x28] sm:$0xff]  }
 0x111   : > { %vm565_vm7 = vcmp.eq.s32.totalorder %v425_v3, %v9435_v9  ;;  %v632_v34 = vsel %vm568_vm14, 1.0, %v9135_v15  ;;  %2097 = vmatpush1.bf16.msra.mxu0 %v9056_v63  ;;  %8934 = vmatpush1.bf16.msra.mxu1 %v9056_v63 }
 0x112   : > { %v629_v14 = vsel %vm565_vm7, 1.0, %v9135_v15  ;;  %9020 = vset.pattern.permute.xlu1 %v9134_v1  ;;  %2098 = vmatprep.subr.bf16.mxu0 %v9134_v1 }
 0x113   : > { %v680_v16 = vpack.c.bf16 %v629_v14, %v628_v58  ;;  %487 = vperm.xlu1 %9020, %v9445_v12   ;;  %v331_v12 = vld [vmem:[%s9235_s19 + $0x188] sm:$0xff]  ;;  %8919 = vmatprep.subr.bf16.mxu1 %v9134_v1 }
 0x115   : > { %8801 = vmatprep.mubr.msk.bf16.mxu0 %vm1084_vm2, %v680_v16  ;;  %v783_v8 = vpop.permute.xlu1 %782 }
 0x116   : > { %vm919_vm9 = vcmp.eq.s32.totalorder %v783_v8, %v9435_v9 }
 0x117   : > { %v983_v23 = vsel %vm919_vm9, 1.0, %v9135_v15  ;;  %9022 = vset.pattern.permute.xlu1 %v9133_v0  ;;  %vm926_vm9 = vcmp.eq.s32.totalorder %v9478_v28, %v9435_v9  ;;  %v339_v28 = vld [vmem:[%s9235_s19 + $0x1c8] sm:$0xff] }
 0x118   : > { %v1033_v6 = vpack.c.bf16 %v983_v23, %v982_v21  ;;  %845 = vperm.xlu1 %9022, %v9469_v24   ;;  %v990_v58 = vsel %vm926_vm9, 1.0, %v9135_v15 }
 0x11a   : > { %8874 = vmatmul.mubr.msk.bf16.gmra.mrb[24].mxu1 %vm1084_vm2, %v1033_v6  ;;  %v428_v25 = vpop.permute.xlu1 %427 }
 0x11b   : > { %vm566_vm11 = vcmp.eq.s32.totalorder %v428_v25, %v9435_v9 }
 0x11c   : > { %v630_v26 = vsel %vm566_vm11, 1.0, %v9135_v15  ;;  %848 = vperm.xlu1 %9022, %v331_v12  }
 0x11d   : > { %v681_v27 = vpack.c.bf16 %v631_v19, %v630_v26 }
 0x11f   : > { %8802 = vmatmul.mubr.msk.bf16.gmra.mrb[24].mxu0 %vm1084_vm2, %v681_v27  ;;  %v786_v10 = vpop.permute.xlu1 %785 }
 0x120   : > { %9023 = vset.pattern.permute.xlu1 %v9134_v1  ;;  %vm920_vm12 = vcmp.eq.s32.totalorder %v786_v10, %v9435_v9 }
 0x121   : > { %496 = vperm.xlu1 %9023, %v331_v12   ;;  %v984_v31 = vsel %vm920_vm12, 1.0, %v9135_v15  ;;  %v9058_v12 = vld [vmem:[%s12517_s3 + $0x38] sm:$0xff]  }
 0x123   : > { %v789_v24 = vpop.permute.xlu1 %788 }
 0x124   : > { %vm921_vm13 = vcmp.eq.s32.totalorder %v789_v24, %v9435_v9 }
 0x125   : > { %v985_v2 = vsel %vm921_vm13, 1.0, %v9135_v15  ;;  %9025 = vset.pattern.permute.xlu1 %v9133_v0 }
 0x126   : > { %v1034_v32 = vpack.c.bf16 %v985_v2, %v984_v31  ;;  %854 = vperm.xlu1 %9025, %v9481_v29  }
 0x128   : > { %8877 = vmatprep.mubr.msk.bf16.mxu1 %vm1084_vm2, %v1034_v32  ;;  %v437_v36 = vpop.permute.xlu1 %436  ;;  %v9059_v32 = vld [vmem:[%s12517_s3 + $0x40] sm:$0xff]  }
 0x129   : > { %vm569_vm15 = vcmp.eq.s32.totalorder %v437_v36, %v9435_v9 }
 0x12a   : > { %v633_v57 = vsel %vm569_vm15, 1.0, %v9135_v15  ;;  %9026 = vset.pattern.permute.xlu1 %v9134_v1 }
 0x12b   : > { %v682_v37 = vpack.c.bf16 %v633_v57, %v632_v34  ;;  %499 = vperm.xlu1 %9026, %v9454_v17   ;;  %v443_v17 = vpop.permute.xlu0 %442  ;;  %v9060_v57 = vld [vmem:[%s12517_s3 + $0x48] sm:$0xff]  }
 0x12c   : > { %vm571_vm3 = vcmp.eq.s32.totalorder %v443_v17, %v9435_v9 }
 0x12d   : > { %8805 = vmatprep.mubr.msk.bf16.mxu0 %vm1084_vm2, %v682_v37  ;;  %v795_v29 = vpop.permute.xlu1 %794  ;;  %v635_v39 = vsel %vm571_vm3, 1.0, %v9135_v15 }
 0x12e   : > { %vm923_vm1 = vcmp.eq.s32.totalorder %v795_v29, %v9435_v9 }
 0x12f   : > { %v987_v53 = vsel %vm923_vm1, 1.0, %v9135_v15  ;;  %9027 = vset.pattern.permute.xlu1 %v9133_v0  ;;  %v446_v47 = vpop.permute.xlu0 %445 }
 0x130   : > { %v1035_v13 = vpack.c.bf16 %v987_v53, %v986_v56  ;;  %857 = vperm.xlu1 %9027, %v9494_v35   ;;  %vm572_vm7 = vcmp.eq.s32.totalorder %v446_v47, %v9435_v9  ;;  %v9061_v53 = vld [vmem:[%s12517_s3 + $0x50] sm:$0xff]  }
 0x131   : > { %v636_v49 = vsel %vm572_vm7, 1.0, %v9135_v15 }
 0x132   : > { %8878 = vmatmul.mubr.msk.bf16.gmra.mrb[28].mxu1 %vm1084_vm2, %v1035_v13  ;;  %v440_v7 = vpop.permute.xlu1 %439 }
 0x133   : > { %vm570_vm4 = vcmp.eq.s32.totalorder %v440_v7, %v9435_v9  ;;  %v455_v3 = vpop.permute.xlu0 %454 }
 0x134   : > { %v634_v40 = vsel %vm570_vm4, 1.0, %v9135_v15  ;;  %860 = vperm.xlu1 %9027, %v335_v22   ;;  %vm575_vm11 = vcmp.eq.s32.totalorder %v455_v3, %v9435_v9 }
 0x135   : > { %v683_v42 = vpack.c.bf16 %v635_v39, %v634_v40  ;;  %v639_v8 = vsel %vm575_vm11, 1.0, %v9135_v15 }
 0x137   : > { %8806 = vmatmul.mubr.msk.bf16.gmra.mrb[28].mxu0 %vm1084_vm2, %v683_v42  ;;  %v798_v35 = vpop.permute.xlu1 %797  ;;  %v458_v21 = vpop.permute.xlu0 %457 }
 0x138   : > { %9028 = vset.pattern.permute.xlu1 %v9134_v1  ;;  %vm924_vm5 = vcmp.eq.s32.totalorder %v798_v35, %v9435_v9  ;;  %vm576_vm15 = vcmp.eq.s32.totalorder %v458_v21, %v9435_v9  ;;  %v9063_v35 = vld [vmem:[%s12517_s3 + $0x60] sm:$0xff]  }
 0x139   : > { %508 = vperm.xlu1 %9028, %v335_v22   ;;  %v988_v46 = vsel %vm924_vm5, 1.0, %v9135_v15  ;;  %v640_v54 = vsel %vm576_vm15, 1.0, %v9135_v15  ;;  %v9062_v22 = vld [vmem:[%s12517_s3 + $0x58] sm:$0xff]  }
 0x13b   : > { %v801_v44 = vpop.permute.xlu1 %800  ;;  %v467_v19 = vpop.permute.xlu0 %466 }
 0x13c   : > { %vm925_vm6 = vcmp.eq.s32.totalorder %v801_v44, %v9435_v9  ;;  %vm579_vm4 = vcmp.eq.s32.totalorder %v467_v19, %v9435_v9 }
 0x13d   : > { %v989_v11 = vsel %vm925_vm6, 1.0, %v9135_v15  ;;  %9029 = vset.pattern.permute.xlu1 %v9133_v0 }
 0x13e   : > { %v1036_v45 = vpack.c.bf16 %v989_v11, %v988_v46  ;;  %866 = vperm.xlu1 %9029, %v9507_v41   ;;  %v9064_v46 = vld [vmem:[%s12517_s3 + $0x68] sm:$0xff]  }
 0x13f   : > { %v816_v10 = vpop.permute.xlu0 %815 }
 0x140   : > { %8881 = vmatprep.mubr.msk.bf16.mxu1 %vm1084_vm2, %v1036_v45  ;;  %v449_v59 = vpop.permute.xlu1 %448  ;;  %vm930_vm1 = vcmp.eq.s32.totalorder %v816_v10, %v9435_v9  ;;  %v9065_v45 = vld [vmem:[%s12517_s3 + $0x70] sm:$0xff]  }
 0x141   : > { %vm573_vm8 = vcmp.eq.s32.totalorder %v449_v59, %v9435_v9  ;;  %v994_v31 = vsel %vm930_vm1, 1.0, %v9135_v15 }
 0x142   : > { %v637_v50 = vsel %vm573_vm8, 1.0, %v9135_v15  ;;  %9030 = vset.pattern.permute.xlu1 %v9134_v1 }
 0x143   : > { %v684_v41 = vpack.c.bf16 %v637_v50, %v636_v49  ;;  %511 = vperm.xlu1 %9030, %v9534_v18   ;;  %v828_v38 = vpop.permute.xlu0 %827  ;;  %v9066_v49 = vld [vmem:[%s12517_s3 + $0x78] sm:$0xff]  }
 0x145   : > { %8809 = vmatprep.mubr.msk.bf16.mxu0 %vm1084_vm2, %v684_v41  ;;  %v807_v55 = vpop.permute.xlu1 %806 }
 0x146   : > { %vm927_vm10 = vcmp.eq.s32.totalorder %v807_v55, %v9435_v9 }
 0x147   : > { %v991_v14 = vsel %vm927_vm10, 1.0, %v9135_v15  ;;  %9032 = vset.pattern.permute.xlu1 %v9133_v0  ;;  %v470_v13 = vpop.permute.xlu0 %469  ;;  %vm934_vm10 = vcmp.eq.s32.totalorder %v828_v38, %v9435_v9 }
 0x148   : > { %v1037_v18 = vpack.c.bf16 %v991_v14, %v990_v58  ;;  %869 = vperm.xlu1 %9032, %v9589_v60   ;;  %v9057_v60 = vld [vmem:[%s12517_s3 + $0x30] sm:$0xff]   ;;  %vm580_vm8 = vcmp.eq.s32.totalorder %v470_v13, %v9435_v9  ;;  %v998_v4 = vsel %vm934_vm10, 1.0, %v9135_v15 }
 0x149   : > { %2099 = vmatpush1.bf16.msra.mxu0 %v9057_v60  ;;  %8935 = vmatpush1.bf16.msra.mxu1 %v9057_v60  ;;  %v644_v43 = vsel %vm580_vm8, 1.0, %v9135_v15 }
 0x14a   : > { %8882 = vmatmul.mubr.msk.bf16.gmra.mrb[32].mxu1 %vm1084_vm2, %v1037_v18  ;;  %v452_v16 = vpop.permute.xlu1 %451  ;;  %2100 = vmatprep.subr.bf16.mxu0 %v9134_v1 }
 0x14b   : > { %vm574_vm12 = vcmp.eq.s32.totalorder %v452_v16, %v9435_v9  ;;  %8920 = vmatprep.subr.bf16.mxu1 %v9134_v1  ;;  %v479_v11 = vpop.permute.xlu0 %478 }
 0x14c   : > { %v638_v51 = vsel %vm574_vm12, 1.0, %v9135_v15  ;;  %872 = vperm.xlu1 %9032, %v339_v28   ;;  %vm583_vm12 = vcmp.eq.s32.totalorder %v479_v11, %v9435_v9 }
 0x14d   : > { %v685_v23 = vpack.c.bf16 %v639_v8, %v638_v51  ;;  %2101 = vmatpush1.bf16.msra.mxu0 %v9058_v12  ;;  %8936 = vmatpush1.bf16.msra.mxu1 %v9058_v12  ;;  %v647_v50 = vsel %vm583_vm12, 1.0, %v9135_v15 }
 0x14e   : > { %2102 = vmatprep.subr.bf16.mxu0 %v9134_v1  ;;  %8921 = vmatprep.subr.bf16.mxu1 %v9134_v1 }
 0x14f   : > { %8810 = vmatmul.mubr.msk.bf16.gmra.mrb[32].mxu0 %vm1084_vm2, %v685_v23  ;;  %v810_v6 = vpop.permute.xlu1 %809  ;;  %v482_v55 = vpop.permute.xlu0 %481 }
 0x150   : > { %9033 = vset.pattern.permute.xlu1 %v9134_v1  ;;  %vm928_vm13 = vcmp.eq.s32.totalorder %v810_v6, %v9435_v9 }
 0x151   : > { %520 = vperm.xlu1 %9033, %v339_v28   ;;  %v992_v26 = vsel %vm928_vm13, 1.0, %v9135_v15  ;;  %2103 = vmatpush1.bf16.msra.mxu0 %v9059_v32 }
 0x152   : > { %2104 = vmatprep.subr.bf16.mxu0 %v9134_v1  ;;  %8937 = vmatpush1.bf16.msra.mxu1 %v9059_v32 }
 0x153   : > { %v813_v25 = vpop.permute.xlu1 %812  ;;  %8922 = vmatprep.subr.bf16.mxu1 %v9134_v1  ;;  %v491_v14 = vpop.permute.xlu0 %490 }
 0x154   : > { %vm929_vm14 = vcmp.eq.s32.totalorder %v813_v25, %v9435_v9 }
 0x155   : > { %v993_v27 = vsel %vm929_vm14, 1.0, %v9135_v15  ;;  %9035 = vset.pattern.permute.xlu1 %v9133_v0  ;;  %2105 = vmatpush1.bf16.msra.mxu0 %v9060_v57 }
 0x156   : > { %v1038_v30 = vpack.c.bf16 %v993_v27, %v992_v26  ;;  %878 = vperm.xlu1 %9035, %v9604_v52   ;;  %2106 = vmatprep.subr.bf16.mxu0 %v9134_v1 }
 0x157   : > { %8938 = vmatpush1.bf16.msra.mxu1 %v9060_v57 }
 0x158   : > { %8885 = vmatprep.mubr.msk.bf16.mxu1 %vm1084_vm2, %v1038_v30  ;;  %v461_v24 = vpop.permute.xlu1 %460  ;;  %8923 = vmatprep.subr.bf16.mxu1 %v9134_v1 }
 0x159   : > { %vm577_vm0 = vcmp.eq.s32.totalorder %v461_v24, %v9435_v9  ;;  %2107 = vmatpush1.bf16.msra.mxu0 %v9061_v53 }
 0x15a   : > { %v641_v61 = vsel %vm577_vm0, 1.0, %v9135_v15  ;;  %9036 = vset.pattern.permute.xlu1 %v9134_v1  ;;  %2108 = vmatprep.subr.bf16.mxu0 %v9134_v1  ;;  %vm584_vm0 = vcmp.eq.s32.totalorder %v482_v55, %v9435_v9 }
 0x15b   : > { %v686_v52 = vpack.c.bf16 %v641_v61, %v640_v54  ;;  %523 = vperm.xlu1 %9036, %v9557_v48   ;;  %v343_v48 = vld [vmem:[%s9235_s19 + $0x1e8] sm:$0xff]  ;;  %8939 = vmatpush1.bf16.msra.mxu1 %v9061_v53  ;;  %v648_v51 = vsel %vm584_vm0, 1.0, %v9135_v15  ;;  %s9137_s19 = smov [#allocation3]  }
 0x15c   : > { %8924 = vmatprep.subr.bf16.mxu1 %v9134_v1 }
 0x15d   : > { %8813 = vmatprep.mubr.msk.bf16.mxu0 %vm1084_vm2, %v686_v52  ;;  %v819_v2 = vpop.permute.xlu1 %818  ;;  %2109 = vmatpush1.bf16.msra.mxu0 %v9062_v22 }
 0x15e   : > { %vm931_vm3 = vcmp.eq.s32.totalorder %v819_v2, %v9435_v9  ;;  %2110 = vmatprep.subr.bf16.mxu0 %v9134_v1 }
 0x15f   : > { %v995_v34 = vsel %vm931_vm3, 1.0, %v9135_v15  ;;  %9037 = vset.pattern.permute.xlu1 %v9133_v0  ;;  %8940 = vmatpush1.bf16.msra.mxu1 %v9062_v22 }
 0x160   : > { %v1039_v36 = vpack.c.bf16 %v995_v34, %v994_v31  ;;  %881 = vperm.xlu1 %9037, %v9641_v33   ;;  %v643_v33 = vsel %vm579_vm4, 1.0, %v9135_v15  ;;  %8925 = vmatprep.subr.bf16.mxu1 %v9134_v1 }
 0x161   : > { %2111 = vmatpush1.bf16.msra.mxu0 %v9063_v35 }
 0x162   : > { %8886 = vmatmul.mubr.msk.bf16.gmra.mrb[36].mxu1 %vm1084_vm2, %v1039_v36  ;;  %v464_v37 = vpop.permute.xlu1 %463  ;;  %2112 = vmatprep.subr.bf16.mxu0 %v9134_v1 }
 0x163   : > { %vm578_vm5 = vcmp.eq.s32.totalorder %v464_v37, %v9435_v9  ;;  %8941 = vmatpush1.bf16.msra.mxu1 %v9063_v35 }
 0x164   : > { %v642_v29 = vsel %vm578_vm5, 1.0, %v9135_v15  ;;  %884 = vperm.xlu1 %9037, %v343_v48   ;;  %8926 = vmatprep.subr.bf16.mxu1 %v9134_v1  ;;  %vm587_vm5 = vcmp.eq.s32.totalorder %v491_v14, %v9435_v9 }
 0x165   : > { %v687_v56 = vpack.c.bf16 %v643_v33, %v642_v29  ;;  %2113 = vmatpush1.bf16.msra.mxu0 %v9064_v46  ;;  %v651_v27 = vsel %vm587_vm5, 1.0, %v9135_v15 }
 0x166   : > { %2114 = vmatprep.subr.bf16.mxu0 %v9134_v1 }
 0x167   : > { %8814 = vmatmul.mubr.msk.bf16.gmra.mrb[36].mxu0 %vm1084_vm2, %v687_v56  ;;  %v822_v17 = vpop.permute.xlu1 %821  ;;  %8942 = vmatpush1.bf16.msra.mxu1 %v9064_v46 }
 0x168   : > { %9038 = vset.pattern.permute.xlu1 %v9134_v1  ;;  %vm932_vm6 = vcmp.eq.s32.totalorder %v822_v17, %v9435_v9  ;;  %8927 = vmatprep.subr.bf16.mxu1 %v9134_v1 }
 0x169   : > { %532 = vperm.xlu1 %9038, %v343_v48   ;;  %v996_v39 = vsel %vm932_vm6, 1.0, %v9135_v15  ;;  %2115 = vmatpush1.bf16.msra.mxu0 %v9065_v45 }
 0x16a   : > { %2116 = vmatprep.subr.bf16.mxu0 %v9134_v1 }
 0x16b   : > { %v825_v7 = vpop.permute.xlu1 %824  ;;  %8943 = vmatpush1.bf16.msra.mxu1 %v9065_v45 }
 0x16c   : > { %vm933_vm7 = vcmp.eq.s32.totalorder %v825_v7, %v9435_v9  ;;  %8928 = vmatprep.subr.bf16.mxu1 %v9134_v1 }
 0x16d   : > { %v997_v40 = vsel %vm933_vm7, 1.0, %v9135_v15  ;;  %9041 = vset.pattern.permute.xlu1 %v9133_v0  ;;  %2117 = vmatpush1.bf16.msra.mxu0 %v9066_v49 }
 0x16e   : > { %v1040_v42 = vpack.c.bf16 %v997_v40, %v996_v39  ;;  %890 = vperm.xlu1 %9041, %v9651_v62  }
 0x16f   : > { %8944 = vmatpush1.bf16.msra.mxu1 %v9066_v49 }
 0x170   : > { %8889 = vmatprep.mubr.msk.bf16.mxu1 %vm1084_vm2, %v1040_v42  ;;  %v473_v44 = vpop.permute.xlu1 %472 }
 0x171   : > { %vm581_vm9 = vcmp.eq.s32.totalorder %v473_v44, %v9435_v9 }
 0x172   : > { %v645_v0 = vsel %vm581_vm9, 1.0, %v9135_v15  ;;  %9042 = vset.pattern.permute.xlu1 %v9134_v1  ;;  %v840_v1 = vpop.permute.xlu0 %839 }
 0x173   : > { %v688_v62 = vpack.c.bf16 %v645_v0, %v644_v43  ;;  %535 = vperm.xlu1 %9042, %v9617_v20   ;;  %vm938_vm3 = vcmp.eq.s32.totalorder %v840_v1, %v9435_v9 }
 0x174   : > { %v1002_v6 = vsel %vm938_vm3, 1.0, %v9135_v15 }
 0x175   : > { %8817 = vmatprep.mubr.msk.bf16.mxu0 %vm1084_vm2, %v688_v62  ;;  %v831_v47 = vpop.permute.xlu1 %830 }
 0x176   : > { %vm935_vm11 = vcmp.eq.s32.totalorder %v831_v47, %v9435_v9  ;;  %v852_v10 = vpop.permute.xlu0 %851 }
 0x177   : > { %v999_v20 = vsel %vm935_vm11, 1.0, %v9135_v15  ;;  %vm942_vm11 = vcmp.eq.s32.totalorder %v852_v10, %v9435_v9 }
 0x178   : > { %v1041_v59 = vpack.c.bf16 %v999_v20, %v998_v4  ;;  %v1006_v13 = vsel %vm942_vm11, 1.0, %v9135_v15 }
 0x17a   : > { %8890 = vmatmul.mubr.msk.bf16.gmra.mrb[40].mxu1 %vm1084_vm2, %v1041_v59  ;;  %v476_v41 = vpop.permute.xlu1 %475  ;;  %v494_v61 = vpop.permute.xlu0 %493 }
 0x17b   : > { %vm582_vm13 = vcmp.eq.s32.totalorder %v476_v41, %v9435_v9  ;;  %vm588_vm9 = vcmp.eq.s32.totalorder %v494_v61, %v9435_v9 }
 0x17c   : > { %v646_v63 = vsel %vm582_vm13, 1.0, %v9135_v15  ;;  %v652_v34 = vsel %vm588_vm9, 1.0, %v9135_v15 }
 0x17d   : > { %v689_v58 = vpack.c.bf16 %v647_v50, %v646_v63 }
 0x17e   : > { %v503_v53 = vpop.permute.xlu0 %502 }
 0x17f   : > { %8818 = vmatmul.mubr.msk.bf16.gmra.mrb[40].mxu0 %vm1084_vm2, %v689_v58  ;;  %v834_v3 = vpop.permute.xlu1 %833  ;;  %vm591_vm13 = vcmp.eq.s32.totalorder %v503_v53, %v9435_v9 }
 0x180   : > { %vm936_vm14 = vcmp.eq.s32.totalorder %v834_v3, %v9435_v9  ;;  %v655_v40 = vsel %vm591_vm13, 1.0, %v9135_v15 }
 0x181   : > { %v1000_v28 = vsel %vm936_vm14, 1.0, %v9135_v15 }
 0x182   : > { %v506_v43 = vpop.permute.xlu0 %505 }
 0x183   : > { %v837_v18 = vpop.permute.xlu1 %836 }
 0x184   : > { %vm937_vm15 = vcmp.eq.s32.totalorder %v837_v18, %v9435_v9 }
 0x185   : > { %v1001_v16 = vsel %vm937_vm15, 1.0, %v9135_v15 }
 0x186   : > { %v1042_v8 = vpack.c.bf16 %v1001_v16, %v1000_v28  ;;  %v515_v49 = vpop.permute.xlu0 %514 }
 0x188   : > { %8893 = vmatprep.mubr.msk.bf16.mxu1 %vm1084_vm2, %v1042_v8  ;;  %v485_v60 = vpop.permute.xlu1 %484 }
 0x189   : > { %vm585_vm1 = vcmp.eq.s32.totalorder %v485_v60, %v9435_v9 }
 0x18a   : > { %v649_v21 = vsel %vm585_vm1, 1.0, %v9135_v15  ;;  %vm592_vm1 = vcmp.eq.s32.totalorder %v506_v43, %v9435_v9 }
 0x18b   : > { %v690_v23 = vpack.c.bf16 %v649_v21, %v648_v51  ;;  %v864_v21 = vpop.permute.xlu0 %863 }
 0x18d   : > { %8821 = vmatprep.mubr.msk.bf16.mxu0 %vm1084_vm2, %v690_v23  ;;  %v843_v12 = vpop.permute.xlu1 %842 }
 0x18e   : > { %vm939_vm4 = vcmp.eq.s32.totalorder %v843_v12, %v9435_v9 }
 0x18f   : > { %v1003_v19 = vsel %vm939_vm4, 1.0, %v9135_v15  ;;  %vm946_vm4 = vcmp.eq.s32.totalorder %v864_v21, %v9435_v9  ;;  %v876_v21 = vpop.permute.xlu0 %875 }
 0x190   : > { %v1043_v25 = vpack.c.bf16 %v1003_v19, %v1002_v6  ;;  %v656_v19 = vsel %vm592_vm1, 1.0, %v9135_v15 }
 0x192   : > { %8894 = vmatmul.mubr.msk.bf16.gmra.mrb[44].mxu1 %vm1084_vm2, %v1043_v25  ;;  %v488_v26 = vpop.permute.xlu1 %487 }
 0x193   : > { %vm586_vm6 = vcmp.eq.s32.totalorder %v488_v26, %v9435_v9 }
 0x194   : > { %v650_v30 = vsel %vm586_vm6, 1.0, %v9135_v15  ;;  %vm595_vm6 = vcmp.eq.s32.totalorder %v515_v49, %v9435_v9 }
 0x195   : > { %v691_v24 = vpack.c.bf16 %v651_v27, %v650_v30 }
 0x197   : > { %8822 = vmatmul.mubr.msk.bf16.gmra.mrb[44].mxu0 %vm1084_vm2, %v691_v24  ;;  %v846_v54 = vpop.permute.xlu1 %845 }
 0x198   : > { %vm940_vm7 = vcmp.eq.s32.totalorder %v846_v54, %v9435_v9 }
 0x199   : > { %v1004_v31 = vsel %vm940_vm7, 1.0, %v9135_v15 }
 0x19b   : > { %v849_v52 = vpop.permute.xlu1 %848 }
 0x19c   : > { %vm941_vm8 = vcmp.eq.s32.totalorder %v849_v52, %v9435_v9  ;;  %v1010_v52 = vsel %vm946_vm4, 1.0, %v9135_v15 }
 0x19d   : > { %v1005_v2 = vsel %vm941_vm8, 1.0, %v9135_v15 }
 0x19e   : > { %v1044_v32 = vpack.c.bf16 %v1005_v2, %v1004_v31 }
 0x1a0   : > { %8897 = vmatprep.mubr.msk.bf16.mxu1 %vm1084_vm2, %v1044_v32  ;;  %v497_v36 = vpop.permute.xlu1 %496 }
 0x1a1   : > { %vm589_vm10 = vcmp.eq.s32.totalorder %v497_v36, %v9435_v9 }
 0x1a2   : > { %v653_v48 = vsel %vm589_vm10, 1.0, %v9135_v15 }
 0x1a3   : > { %v692_v57 = vpack.c.bf16 %v653_v48, %v652_v34  ;;  %v9920_v37 = vpop.f32.mrb[0].mxu1 }
 0x1a4   : > { %v9923_v33 = vpop.f32.mrb[1].mxu1 }
 0x1a5   : > { %8825 = vmatprep.mubr.msk.bf16.mxu0 %vm1084_vm2, %v692_v57  ;;  %v9926_v29 = vpop.f32.mrb[2].mxu1  ;;  %v855_v38 = vpop.permute.xlu1 %854 }
 0x1a6   : > { %vm943_vm12 = vcmp.eq.s32.totalorder %v855_v38, %v9435_v9  ;;  %v9931_v17 = vpop.f32.mrb[3].mxu1 }
 0x1a7   : > { %v1007_v22 = vsel %vm943_vm12, 1.0, %v9135_v15  ;;  %vm950_vm12 = vcmp.eq.s32.totalorder %v876_v21, %v9435_v9 }
 0x1a8   : > { %v1045_v39 = vpack.c.bf16 %v1007_v22, %v1006_v13 }
 0x1aa   : > { %8898 = vmatmul.mubr.msk.bf16.gmra.mrb[48].mxu1 %vm1084_vm2, %v1045_v39  ;;  %v500_v42 = vpop.permute.xlu1 %499 }
 0x1ab   : > { %vm590_vm14 = vcmp.eq.s32.totalorder %v500_v42, %v9435_v9  ;;  %v9941_v35 = vpop.f32.mrb[4].mxu1  ;;  %v659_v42 = vsel %vm595_vm6, 1.0, %v9135_v15 }
 0x1ac   : > { %v654_v44 = vsel %vm590_vm14, 1.0, %v9135_v15  ;;  %v9944_v0 = vpop.f32.mrb[5].mxu1 }
 0x1ad   : > { %v693_v62 = vpack.c.bf16 %v655_v40, %v654_v44  ;;  %v9946_v46 = vpop.f32.mrb[6].mxu1 }
 0x1ae   : > { %v9950_v4 = vpop.f32.mrb[7].mxu1 }
 0x1af   : > { %8826 = vmatmul.mubr.msk.bf16.gmra.mrb[48].mxu0 %vm1084_vm2, %v693_v62  ;;  %v858_v20 = vpop.permute.xlu1 %857 }
 0x1b0   : > { %v9955_v45 = vpop.f32.mrb[0].mxu0  ;;  %vm944_vm15 = vcmp.eq.s32.totalorder %v858_v20, %v9435_v9 }
 0x1b1   : > { %v9957_v59 = vpop.f32.mrb[1].mxu0  ;;  %v1008_v28 = vsel %vm944_vm15, 1.0, %v9135_v15 }
 0x1b2   : > { %v9959_v50 = vpop.f32.mrb[2].mxu0 }
 0x1b3   : > { %v9964_v55 = vpop.f32.mrb[3].mxu0  ;;  %v9966_v63 = vpop.f32.mrb[8].mxu1 }
 0x1b4   : > { %v861_v3 = vpop.permute.xlu1 %860  ;;  %v9970_v14 = vpop.f32.mrb[9].mxu1 }
 0x1b5   : > { %vm945_vm0 = vcmp.eq.s32.totalorder %v861_v3, %v9435_v9  ;;  %v9973_v18 = vpop.f32.mrb[10].mxu1 }
 0x1b6   : > { %v1009_v16 = vsel %vm945_vm0, 1.0, %v9135_v15  ;;  %v9979_v1 = vpop.f32.mrb[11].mxu1 }
 0x1b7   : > { %v1046_v51 = vpack.c.bf16 %v1009_v16, %v1008_v28 }
 0x1b8   : > { %v9984_v23 = vpop.f32.mrb[4].mxu0  ;;  %v509_v6 = vpop.permute.xlu1 %508 }
 0x1b9   : > { %8901 = vmatprep.mubr.msk.bf16.mxu1 %vm1084_vm2, %v1046_v51  ;;  %vm593_vm3 = vcmp.eq.s32.totalorder %v509_v6, %v9435_v9  ;;  %v9988_v12 = vpop.f32.mrb[5].mxu0 }
 0x1ba   : > { %v657_v25 = vsel %vm593_vm3, 1.0, %v9135_v15  ;;  %v9992_v26 = vpop.f32.mrb[6].mxu0 }
 0x1bb   : > { %v694_v27 = vpack.c.bf16 %v657_v25, %v656_v19  ;;  %v9997_v10 = vpop.f32.mrb[7].mxu0 }
 0x1bc   : > { %v10001_v54 = vpop.f32.mrb[12].mxu1 }
 0x1bd   : > { %v10003_v61 = vpop.f32.mrb[13].mxu1  ;;  %8829 = vmatprep.mubr.msk.bf16.mxu0 %vm1084_vm2, %v694_v27  ;;  %v867_v31 = vpop.permute.xlu1 %866 }
 0x1be   : > { %v10007_v2 = vpop.f32.mrb[14].mxu1  ;;  %vm947_vm5 = vcmp.eq.s32.totalorder %v867_v31, %v9435_v9 }
 0x1bf   : > { %v1011_v34 = vsel %vm947_vm5, 1.0, %v9135_v15  ;;  %v10013_v36 = vpop.f32.mrb[15].mxu1 }
 0x1c0   : > { %v1047_v48 = vpack.c.bf16 %v1011_v34, %v1010_v52  ;;  %v10017_v38 = vpop.f32.mrb[8].mxu0 }
 0x1c1   : > { %v10020_v53 = vpop.f32.mrb[9].mxu0 }
 0x1c2   : > { %v10022_v13 = vpop.f32.mrb[10].mxu0  ;;  %8902 = vmatmul.mubr.msk.bf16.gmra.mrb[52].mxu1 %vm1084_vm2, %v1047_v48  ;;  %v512_v22 = vpop.permute.xlu1 %511 }
 0x1c3   : > { %vm594_vm7 = vcmp.eq.s32.totalorder %v512_v22, %v9435_v9  ;;  %v10028_v40 = vpop.f32.mrb[11].mxu0 }
 0x1c4   : > { %v658_v43 = vsel %vm594_vm7, 1.0, %v9135_v15  ;;  %v10034_v62 = vpop.f32.mrb[16].mxu1 }
 0x1c5   : > { %v695_v20 = vpack.c.bf16 %v659_v42, %v658_v43  ;;  %v10036_v49 = vpop.f32.mrb[17].mxu1  ;;  %v518_v42 = vpop.permute.xlu0 %517 }
 0x1c6   : > { %v10038_v3 = vpop.f32.mrb[18].mxu1  ;;  %vm596_vm10 = vcmp.eq.s32.totalorder %v518_v42, %v9435_v9 }
 0x1c7   : > { %v10042_v16 = vpop.f32.mrb[19].mxu1  ;;  %8830 = vmatmul.mubr.msk.bf16.gmra.mrb[52].mxu0 %vm1084_vm2, %v695_v20  ;;  %v870_v51 = vpop.permute.xlu1 %869  ;;  %v660_v5 = vsel %vm596_vm10, 1.0, %v9135_v15  ;;  %vm8167_vm10 = vcmask 261312  }
 0x1c8   : > { %v10047_v19 = vpop.f32.mrb[12].mxu0  ;;  %vm948_vm8 = vcmp.eq.s32.totalorder %v870_v51, %v9435_v9 }
 0x1c9   : > { %v10050_v25 = vpop.f32.mrb[13].mxu0  ;;  %v1012_v52 = vsel %vm948_vm8, 1.0, %v9135_v15  ;;  %v527_v32 = vpop.permute.xlu0 %526 }
 0x1ca   : > { %v10052_v27 = vpop.f32.mrb[14].mxu0  ;;  %vm599_vm14 = vcmp.eq.s32.totalorder %v527_v32, %v9435_v9 }
 0x1cb   : > { %v10057_v34 = vpop.f32.mrb[15].mxu0  ;;  %v873_v48 = vpop.permute.xlu1 %872  ;;  %v663_v44 = vsel %vm599_vm14, 1.0, %v9135_v15  ;;  %vm8195_vm14 = vcmask 523712  }
 0x1cc   : > { %vm949_vm9 = vcmp.eq.s32.totalorder %v873_v48, %v9435_v9 }
 0x1cd   : > { %v1013_v43 = vsel %vm949_vm9, 1.0, %v9135_v15  ;;  %v888_v30 = vpop.permute.xlu0 %887  ;;  %vm8160_vm9 = vcmask 195712  }
 0x1ce   : > { %v1048_v20 = vpack.c.bf16 %v1013_v43, %v1012_v52  ;;  %vm954_vm5 = vcmp.eq.s32.totalorder %v888_v30, %v9435_v9 }
 0x1d0   : > { %v521_v51 = vpop.permute.xlu1 %520  ;;  %8905 = vmatprep.mubr.msk.bf16.mxu1 %vm1084_vm2, %v1048_v20 }
 0x1d1   : > { %vm597_vm11 = vcmp.eq.s32.totalorder %v521_v51, %v9435_v9 }
 0x1d2   : > { %v661_v28 = vsel %vm597_vm11, 1.0, %v9135_v15  ;;  %vm8174_vm11 = vcmask 326912  }
 0x1d3   : > { %v696_v6 = vpack.c.bf16 %v661_v28, %v660_v5  ;;  %v10068_v31 = vpop.f32.mrb[16].mxu0  ;;  %v1014_v5 = vsel %vm950_vm12, 1.0, %v9135_v15  ;;  %vm8181_vm12 = vcmask 392512  }
 0x1d4   : > { %v10071_v48 = vpop.f32.mrb[17].mxu0 }
 0x1d5   : > { %v10073_v22 = vpop.f32.mrb[20].mxu1  ;;  %v879_v52 = vpop.permute.xlu1 %878  ;;  %8833 = vmatprep.mubr.msk.bf16.mxu0 %vm1084_vm2, %v696_v6 }
 0x1d6   : > { %vm951_vm13 = vcmp.eq.s32.totalorder %v879_v52, %v9435_v9  ;;  %v10077_v42 = vpop.f32.mrb[21].mxu1  ;;  %v10079_v43 = vpop.f32.mrb[18].mxu0 }
 0x1d7   : > { %v1015_v28 = vsel %vm951_vm13, 1.0, %v9135_v15  ;;  %v10083_v20 = vpop.f32.mrb[22].mxu1  ;;  %v10087_v51 = vpop.f32.mrb[19].mxu0  ;;  %vm8188_vm13 = vcmask 458112  }
 0x1d8   : > { %v1049_v6 = vpack.c.bf16 %v1015_v28, %v1014_v5  ;;  %v10092_v57 = vpop.f32.mrb[23].mxu1 }
 0x1da   : > { %8906 = vmatmul.mubr.msk.bf16.gmra.mrb[56].mxu1 %vm1084_vm2, %v1049_v6  ;;  %v524_v21 = vpop.permute.xlu1 %523 }
 0x1db   : > { %vm598_vm15 = vcmp.eq.s32.totalorder %v524_v21, %v9435_v9  ;;  %v10101_v32 = vpop.f32.mrb[20].mxu0 }
 0x1dc   : > { %v662_v5 = vsel %vm598_vm15, 1.0, %v9135_v15  ;;  %v10104_v28 = vpop.f32.mrb[21].mxu0  ;;  %vm8202_vm15 = vcmask 589312  }
 0x1dd   : > { %v697_v52 = vpack.c.bf16 %v663_v44, %v662_v5  ;;  %v10106_v60 = vpop.f32.mrb[22].mxu0  ;;  %v530_v44 = vpop.permute.xlu0 %529 }
 0x1de   : > { %v10110_v8 = vpop.f32.mrb[23].mxu0  ;;  %vm600_vm3 = vcmp.eq.s32.totalorder %v530_v44, %v9435_v9 }
 0x1df   : > { %8834 = vmatmul.mubr.msk.bf16.gmra.mrb[56].mxu0 %vm1084_vm2, %v697_v52  ;;  %v882_v21 = vpop.permute.xlu1 %881  ;;  %v664_v41 = vsel %vm600_vm3, 1.0, %v9135_v15  ;;  %vm8223_vm3 = vcmask 786112  }
 0x1e0   : > { %vm952_vm0 = vcmp.eq.s32.totalorder %v882_v21, %v9435_v9 }
 0x1e1   : > { %v1016_v11 = vsel %vm952_vm0, 1.0, %v9135_v15  ;;  %v539_v6 = vpop.permute.xlu0 %538  ;;  %vm8209_vm0 = vcmask 654912  }
 0x1e2   : > { %vm603_vm7 = vcmp.eq.s32.totalorder %v539_v6, %v9435_v9 }
 0x1e3   : > { %v885_v24 = vpop.permute.xlu1 %884 }
 0x1e4   : > { %vm953_vm1 = vcmp.eq.s32.totalorder %v885_v24, %v9435_v9  ;;  %v1018_v24 = vsel %vm954_vm5, 1.0, %v9135_v15  ;;  %vm8237_vm5 = vcmask 917312  }
 0x1e5   : > { %v1017_v5 = vsel %vm953_vm1, 1.0, %v9135_v15  ;;  %vm8216_vm1 = vcmask 720512  }
 0x1e6   : > { %v1050_v39 = vpack.c.bf16 %v1017_v5, %v1016_v11 }
 0x1e8   : > { %v533_v47 = vpop.permute.xlu1 %532  ;;  %8909 = vmatprep.mubr.msk.bf16.mxu1 %vm1084_vm2, %v1050_v39 }
 0x1e9   : > { %vm601_vm4 = vcmp.eq.s32.totalorder %v533_v47, %v9435_v9 }
 0x1ea   : > { %v665_v52 = vsel %vm601_vm4, 1.0, %v9135_v15  ;;  %vm8230_vm4 = vcmask 851712  }
 0x1eb   : > { %v698_v21 = vpack.c.bf16 %v665_v52, %v664_v41  ;;  %v667_v52 = vsel %vm603_vm7, 1.0, %v9135_v15  ;;  %vm8251_vm7 = vcmask 1048512  }
 0x1ed   : > { %v10126_v56 = vpop.f32.mrb[24].mxu1  ;;  %v891_v58 = vpop.permute.xlu1 %890  ;;  %8837 = vmatprep.mubr.msk.bf16.mxu0 %vm1084_vm2, %v698_v21 }
 0x1ee   : > { %12559 = vst [vmem:[#allocation7_spill] sm:$0xff] %v10126_v56  ;;  %v10129_v11 = vpop.f32.mrb[25].mxu1  ;;  %vm955_vm6 = vcmp.eq.s32.totalorder %v891_v58, %v9435_v9 }
 0x1ef   : > { %v1019_v39 = vsel %vm955_vm6, 1.0, %v9135_v15  ;;  %v10133_v47 = vpop.f32.mrb[26].mxu1  ;;  %vm8244_vm6 = vcmask 982912  }
 0x1f0   : > { %v1051_v30 = vpack.c.bf16 %v1019_v39, %v1018_v24  ;;  %v10138_v44 = vpop.f32.mrb[27].mxu1 }
 0x1f2   : > { %v10143_v21 = vpop.f32.mrb[24].mxu0  ;;  %v536_v58 = vpop.permute.xlu1 %535  ;;  %8910 = vmatmul.mubr.msk.bf16.gmra.mrb[60].mxu1 %vm1084_vm2, %v1051_v30  ;;  %v12560_v30 = vpack.c.bf16 %v9931_v17, %v9923_v33 }
 0x1f3   : > { %vm602_vm8 = vcmp.eq.s32.totalorder %v536_v58, %v9435_v9  ;;  %v10147_v7 = vpop.f32.mrb[25].mxu0 }
 0x1f4   : > { %v666_v6 = vsel %vm602_vm8, 1.0, %v9135_v15  ;;  %v10150_v24 = vpop.f32.mrb[26].mxu0  ;;  %v12561_v15 = vpack.c.bf16 %v9964_v55, %v9957_v59  ;;  %v12564_v59 = vpack.c.bf16 %v9950_v4, %v9944_v0  ;;  %v12565_v0 = vpack.c.bf16 %v9997_v10, %v9988_v12 }
 0x1f5   : > { %v699_v39 = vpack.c.bf16 %v667_v52, %v666_v6  ;;  %v10154_v5 = vpop.f32.mrb[27].mxu0  ;;  %v12562_v52 = vpack.c.bf16 %v9926_v29, %v9920_v37  ;;  %v12566_v4 = vpack.c.bf16 %v9946_v46, %v9941_v35  ;;  %v12570_v35 = vpack.c.bf16 %v9973_v18, %v9966_v63 }
 0x1f6   : > { %v1899_v56 = vpack.c.bf16 %v10154_v5, %v10147_v7  ;;  %v12573_v63 = vpack.c.bf16 %v10057_v34, %v10050_v25  ;;  %v12574_v18 = vpack.c.bf16 %v10007_v2, %v10001_v54 }
 0x1f7   : > { %8838 = vmatmul.mubr.msk.bf16.gmra.mrb[60].mxu0 %vm1084_vm2, %v699_v39  ;;  %v12563_v39 = vpack.c.bf16 %v9959_v50, %v9955_v45  ;;  %vm8153_vm2 = vcmask 130112  }
 0x1f8   : > { %2118 = vmatprep.mubr.bf16.mxu0 %v12560_v30 }
 0x1ff   : > { %2119 = vmatmul.mubr.bf16.vlgmr.msra.gmra.mrb[64].mxu0 %v12561_v15  ;;  %v12569_v15 = vpack.c.bf16 %v10028_v40, %v10020_v53  ;;  %v12572_v53 = vpack.c.bf16 %v10013_v36, %v10003_v61 }
 0x200   : > { %2126 = vmatprep.mubr.bf16.mxu0 %v12562_v52  ;;  %v12567_v52 = vpack.c.bf16 %v9992_v26, %v9984_v23 }
 0x205   : > { %v10168_v58 = vpop.f32.mrb[28].mxu1 }
 0x206   : > { %v10170_v6 = vpop.f32.mrb[29].mxu1 }
 0x207   : > { %v10172_v41 = vpop.f32.mrb[30].mxu1  ;;  %2127 = vmatmul.mubr.bf16.gmra.mrb[68].mxu0 %v12563_v39  ;;  %v12568_v39 = vpack.c.bf16 %v9979_v1, %v9970_v14 }
 0x208   : > { %v10179_v17 = vpop.f32.mrb[31].mxu1  ;;  %2134 = vmatprep.mubr.bf16.mxu0 %v12564_v59 }
 0x209   : > { %v1933_v37 = vpack.c.bf16 %v10179_v17, %v10170_v6 }
 0x20a   : > { %v10186_v29 = vpop.f32.mrb[28].mxu0 }
 0x20b   : > { %v10188_v55 = vpop.f32.mrb[29].mxu0 }
 0x20c   : > { %v10190_v30 = vpop.f32.mrb[30].mxu0 }
 0x20d   : > { %v10194_v50 = vpop.f32.mrb[31].mxu0 }
 0x20f   : > { %2135 = vmatmul.mubr.bf16.gmra.mrb[72].mxu0 %v12565_v0 }
 0x210   : > { %2142 = vmatprep.mubr.bf16.mxu0 %v12566_v4 }
 0x217   : > { %2143 = vmatmul.mubr.bf16.gmra.mrb[76].mxu0 %v12567_v52  ;;  %v12571_v52 = vpack.c.bf16 %v10022_v13, %v10017_v38  ;;  %v12575_v38 = vpack.c.bf16 %v10052_v27, %v10047_v19  ;;  %v12576_v13 = vpack.c.bf16 %v10042_v16, %v10036_v49  ;;  %v12578_v19 = vpack.c.bf16 %v10038_v3, %v10034_v62 }
 0x218   : > { %2150 = vmatprep.mubr.bf16.mxu0 %v12568_v39  ;;  %v12579_v49 = vpack.c.bf16 %v10079_v43, %v10068_v31  ;;  %v12580_v16 = vpack.c.bf16 %v10092_v57, %v10077_v42 }
 0x21d   : > { %v8883_v59 = vpop.f32.mrb[32].mxu1 }
 0x21e   : > { %v1760_v45 = vpop.f32.mrb[33].mxu1 }
 0x21f   : > { %v8884_v33 = vpop.f32.mrb[34].mxu1  ;;  %2151 = vmatmul.mubr.bf16.gmra.mrb[80].mxu0 %v12569_v15 }
 0x220   : > { %v1936_v12 = vpack.c.bf16 %v8884_v33, %v8883_v59  ;;  %v1763_v10 = vpop.f32.mrb[35].mxu1  ;;  %2158 = vmatprep.mubr.bf16.mxu0 %v12570_v35 }
 0x221   : > { %v1935_v46 = vpack.c.bf16 %v1763_v10, %v1760_v45 }
 0x222   : > { %v8811_v23 = vpop.f32.mrb[32].mxu0 }
 0x223   : > { %v1343_v26 = vpop.f32.mrb[33].mxu0  ;;  %2246 = vmatprep.mubr.bf16.mxu1 %v1935_v46 }
 0x224   : > { %v8812_v0 = vpop.f32.mrb[34].mxu0 }
 0x225   : > { %v1904_v14 = vpack.c.bf16 %v8812_v0, %v8811_v23  ;;  %v1346_v1 = vpop.f32.mrb[35].mxu0  ;;  %v12583_v0 = vpack.c.bf16 %v10106_v60, %v10101_v32  ;;  %v12587_v60 = vpack.c.bf16 %v10150_v24, %v10143_v21  ;;  %v12589_v21 = vpack.c.bf16 %v10172_v41, %v10168_v58 }
 0x226   : > { %v1903_v4 = vpack.c.bf16 %v1346_v1, %v1343_v26  ;;  %v12590_v24 = vpack.c.bf16 %v10190_v30, %v10186_v29 }
 0x227   : > { %2159 = vmatmul.mubr.bf16.gmra.mrb[84].mxu0 %v12571_v52 }
 0x228   : > { %2166 = vmatprep.mubr.bf16.mxu0 %v12572_v53  ;;  %2247 = vmatmul.mubr.bf16.vlgmr.msra.gmra.mrb[64].mxu1 %v1903_v4  ;;  %v12588_v53 = vpack.c.bf16 %v10194_v50, %v10188_v55 }
 0x229   : > { %2254 = vmatprep.mubr.bf16.mxu1 %v1936_v12  ;;  %v12577_v12 = vpack.c.bf16 %v10087_v51, %v10071_v48  ;;  %v12581_v48 = vpack.c.bf16 %v10110_v8, %v10104_v28  ;;  %v12582_v51 = vpack.c.bf16 %v10083_v20, %v10073_v22  ;;  %v12584_v8 = vpack.c.bf16 %v10138_v44, %v10129_v11  ;;  %v12585_v22 = vld [vmem:[#allocation7_spill] sm:$0xff] }
 0x22a   : > { %v12586_v20 = vpack.c.bf16 %v10133_v47, %v12585_v22 }
 0x22f   : > { %2167 = vmatmul.mubr.bf16.gmra.mrb[88].mxu0 %v12573_v63 }
 0x230   : > { %2174 = vmatprep.mubr.bf16.mxu0 %v12574_v18  ;;  %2255 = vmatmul.mubr.bf16.gmra.mrb[68].mxu1 %v1904_v14 }
 0x235   : > { %v8887_v40 = vpop.f32.mrb[36].mxu1 }
 0x236   : > { %v1776_v33 = vpop.f32.mrb[37].mxu1 }
 0x237   : > { %v8888_v45 = vpop.f32.mrb[38].mxu1  ;;  %2175 = vmatmul.mubr.bf16.gmra.mrb[92].mxu0 %v12575_v38 }
 0x238   : > { %v1938_v61 = vpack.c.bf16 %v8888_v45, %v8887_v40  ;;  %v1779_v36 = vpop.f32.mrb[39].mxu1  ;;  %2182 = vmatprep.mubr.bf16.mxu0 %v12576_v13 }
 0x239   : > { %v1937_v25 = vpack.c.bf16 %v1779_v36, %v1776_v33 }
 0x23a   : > { %v8815_v34 = vpop.f32.mrb[36].mxu0 }
 0x23b   : > { %v1359_v15 = vpop.f32.mrb[37].mxu0  ;;  %2262 = vmatprep.mubr.bf16.mxu1 %v1937_v25 }
 0x23c   : > { %v8816_v54 = vpop.f32.mrb[38].mxu0 }
 0x23d   : > { %v1906_v2 = vpack.c.bf16 %v8816_v54, %v8815_v34  ;;  %v1362_v39 = vpop.f32.mrb[39].mxu0 }
 0x23e   : > { %v1905_v59 = vpack.c.bf16 %v1362_v39, %v1359_v15 }
 0x23f   : > { %2183 = vmatmul.mubr.bf16.gmra.mrb[96].mxu0 %v12577_v12 }
 0x240   : > { %2190 = vmatprep.mubr.bf16.mxu0 %v12578_v19  ;;  %2263 = vmatmul.mubr.bf16.gmra.mrb[72].mxu1 %v1905_v59 }
 0x241   : > { %2270 = vmatprep.mubr.bf16.mxu1 %v1938_v61 }
 0x247   : > { %2191 = vmatmul.mubr.bf16.gmra.mrb[100].mxu0 %v12579_v49 }
 0x248   : > { %2198 = vmatprep.mubr.bf16.mxu0 %v12580_v16  ;;  %2271 = vmatmul.mubr.bf16.gmra.mrb[76].mxu1 %v1906_v2 }
 0x24d   : > { %v8891_v27 = vpop.f32.mrb[40].mxu1 }
 0x24e   : > { %v1792_v10 = vpop.f32.mrb[41].mxu1 }
 0x24f   : > { %v8892_v35 = vpop.f32.mrb[42].mxu1  ;;  %2199 = vmatmul.mubr.bf16.gmra.mrb[104].mxu0 %v12581_v48 }
 0x250   : > { %v1940_v62 = vpack.c.bf16 %v8892_v35, %v8891_v27  ;;  %v1795_v3 = vpop.f32.mrb[43].mxu1  ;;  %2206 = vmatprep.mubr.bf16.mxu0 %v12582_v51 }
 0x251   : > { %v1939_v31 = vpack.c.bf16 %v1795_v3, %v1792_v10 }
 0x252   : > { %v8819_v43 = vpop.f32.mrb[40].mxu0 }
 0x253   : > { %v1375_v46 = vpop.f32.mrb[41].mxu0  ;;  %2278 = vmatprep.mubr.bf16.mxu1 %v1939_v31 }
 0x254   : > { %v8820_v57 = vpop.f32.mrb[42].mxu0 }
 0x255   : > { %v1908_v42 = vpack.c.bf16 %v8820_v57, %v8819_v43  ;;  %v1378_v23 = vpop.f32.mrb[43].mxu0 }
 0x256   : > { %v1907_v26 = vpack.c.bf16 %v1378_v23, %v1375_v46 }
 0x257   : > { %2207 = vmatmul.mubr.bf16.gmra.mrb[108].mxu0 %v12583_v0 }
 0x258   : > { %2214 = vmatprep.mubr.bf16.mxu0 %v12584_v8  ;;  %2279 = vmatmul.mubr.bf16.gmra.mrb[80].mxu1 %v1907_v26 }
 0x259   : > { %2286 = vmatprep.mubr.bf16.mxu1 %v1940_v62 }
 0x25f   : > { %2215 = vmatmul.mubr.bf16.gmra.mrb[112].mxu0 %v1899_v56 }
 0x260   : > { %2222 = vmatprep.mubr.bf16.mxu0 %v12586_v20  ;;  %2287 = vmatmul.mubr.bf16.gmra.mrb[84].mxu1 %v1908_v42 }
 0x265   : > { %v8895_v28 = vpop.f32.mrb[44].mxu1 }
 0x266   : > { %v1808_v14 = vpop.f32.mrb[45].mxu1 }
 0x267   : > { %v8896_v1 = vpop.f32.mrb[46].mxu1  ;;  %2223 = vmatmul.mubr.bf16.gmra.mrb[116].mxu0 %v12587_v60 }
 0x268   : > { %v1942_v32 = vpack.c.bf16 %v8896_v1, %v8895_v28  ;;  %v1811_v11 = vpop.f32.mrb[47].mxu1  ;;  %2230 = vmatprep.mubr.bf16.mxu0 %v1933_v37 }
 0x269   : > { %v1941_v7 = vpack.c.bf16 %v1811_v11, %v1808_v14  ;;  %v10282_v14 = vld [vmem:[%s12518_s4] ss:$0 sm:$0xff] }
 0x26a   : > { %v8823_v56 = vpop.f32.mrb[44].mxu0  ;;  %v10288_v11 = vld [vmem:[%s12519_s5] ss:$0 sm:$0xff] }
 0x26b   : > { %v1391_v44 = vpop.f32.mrb[45].mxu0  ;;  %2294 = vmatprep.mubr.bf16.mxu1 %v1941_v7 }
 0x26c   : > { %v8824_v47 = vpop.f32.mrb[46].mxu0 }
 0x26d   : > { %v1910_v5 = vpack.c.bf16 %v8824_v47, %v8823_v56  ;;  %v1394_v4 = vpop.f32.mrb[47].mxu0 }
 0x26e   : > { %v1909_v52 = vpack.c.bf16 %v1394_v4, %v1391_v44 }
 0x26f   : > { %2231 = vmatmul.mubr.bf16.gmra.mrb[120].mxu0 %v12588_v53 }
 0x270   : > { %2238 = vmatprep.mubr.bf16.mxu0 %v12589_v21  ;;  %2295 = vmatmul.mubr.bf16.gmra.mrb[88].mxu1 %v1909_v52 }
 0x271   : > { %2302 = vmatprep.mubr.bf16.mxu1 %v1942_v32 }
 0x277   : > { %2239 = vmatmul.mubr.bf16.gmra.mrb[124].mxu0 %v12590_v24 }
 0x278   : > { %2303 = vmatmul.mubr.bf16.gmra.mrb[92].mxu1 %v1910_v5 }
 0x27d   : > { %v8899_v6 = vpop.f32.mrb[48].mxu1 }
 0x27e   : > { %v1824_v17 = vpop.f32.mrb[49].mxu1 }
 0x27f   : > { %v8900_v37 = vpop.f32.mrb[50].mxu1 }
 0x280   : > { %v1944_v63 = vpack.c.bf16 %v8900_v37, %v8899_v6  ;;  %v1827_v18 = vpop.f32.mrb[51].mxu1 }
 0x281   : > { %v1943_v40 = vpack.c.bf16 %v1827_v18, %v1824_v17 }
 0x282   : > { %v8827_v33 = vpop.f32.mrb[48].mxu0 }
 0x283   : > { %v1407_v55 = vpop.f32.mrb[49].mxu0  ;;  %2310 = vmatprep.mubr.bf16.mxu1 %v1943_v40 }
 0x284   : > { %v8828_v50 = vpop.f32.mrb[50].mxu0 }
 0x285   : > { %v1912_v45 = vpack.c.bf16 %v8828_v50, %v8827_v33  ;;  %v1410_v41 = vpop.f32.mrb[51].mxu0 }
 0x286   : > { %v1911_v58 = vpack.c.bf16 %v1410_v41, %v1407_v55 }
 0x288   : > { %2311 = vmatmul.mubr.bf16.gmra.mrb[96].mxu1 %v1911_v58 }
 0x289   : > { %2318 = vmatprep.mubr.bf16.mxu1 %v1944_v63 }
 0x290   : > { %2319 = vmatmul.mubr.bf16.gmra.mrb[100].mxu1 %v1912_v45 }
 0x295   : > { %v8903_v38 = vpop.f32.mrb[52].mxu1 }
 0x296   : > { %v1840_v29 = vpop.f32.mrb[53].mxu1 }
 0x297   : > { %v8904_v30 = vpop.f32.mrb[54].mxu1 }
 0x298   : > { %v1946_v61 = vpack.c.bf16 %v8904_v30, %v8903_v38  ;;  %v1843_v36 = vpop.f32.mrb[55].mxu1 }
 0x299   : > { %v1945_v13 = vpack.c.bf16 %v1843_v36, %v1840_v29 }
 0x29a   : > { %v8831_v25 = vpop.f32.mrb[52].mxu0 }
 0x29b   : > { %v1423_v34 = vpop.f32.mrb[53].mxu0  ;;  %2326 = vmatprep.mubr.bf16.mxu1 %v1945_v13 }
 0x29c   : > { %v8832_v15 = vpop.f32.mrb[54].mxu0 }
 0x29d   : > { %v1914_v54 = vpack.c.bf16 %v8832_v15, %v8831_v25  ;;  %v1426_v2 = vpop.f32.mrb[55].mxu0 }
 0x29e   : > { %v1913_v39 = vpack.c.bf16 %v1426_v2, %v1423_v34 }
 0x2a0   : > { %2327 = vmatmul.mubr.bf16.gmra.mrb[104].mxu1 %v1913_v39 }
 0x2a1   : > { %2334 = vmatprep.mubr.bf16.mxu1 %v1946_v61 }
 0x2a8   : > { %2335 = vmatmul.mubr.bf16.gmra.mrb[108].mxu1 %v1914_v54 }
 0x2ad   : > { %v8907_v59 = vpop.f32.mrb[56].mxu1 }
 0x2ae   : > { %v1856_v12 = vpop.f32.mrb[57].mxu1 }
 0x2af   : > { %v8908_v19 = vpop.f32.mrb[58].mxu1 }
 0x2b0   : > { %v1948_v49 = vpack.c.bf16 %v8908_v19, %v8907_v59  ;;  %v1859_v16 = vpop.f32.mrb[59].mxu1 }
 0x2b1   : > { %v1947_v27 = vpack.c.bf16 %v1859_v16, %v1856_v12 }
 0x2b2   : > { %v8835_v10 = vpop.f32.mrb[56].mxu0 }
 0x2b3   : > { %v1439_v35 = vpop.f32.mrb[57].mxu0  ;;  %2342 = vmatprep.mubr.bf16.mxu1 %v1947_v27 }
 0x2b4   : > { %v8836_v48 = vpop.f32.mrb[58].mxu0 }
 0x2b5   : > { %v1916_v62 = vpack.c.bf16 %v8836_v48, %v8835_v10  ;;  %v1442_v3 = vpop.f32.mrb[59].mxu0 }
 0x2b6   : > { %v1915_v51 = vpack.c.bf16 %v1442_v3, %v1439_v35 }
 0x2b8   : > { %2343 = vmatmul.mubr.bf16.gmra.mrb[112].mxu1 %v1915_v51 }
 0x2b9   : > { %2350 = vmatprep.mubr.bf16.mxu1 %v1948_v49 }
 0x2c0   : > { %2351 = vmatmul.mubr.bf16.gmra.mrb[116].mxu1 %v1916_v62 }
 0x2c5   : > { %v8911_v31 = vpop.f32.mrb[60].mxu1 }
 0x2c6   : > { %v1872_v43 = vpop.f32.mrb[61].mxu1 }
 0x2c7   : > { %v8912_v46 = vpop.f32.mrb[62].mxu1 }
 0x2c8   : > { %v1950_v57 = vpack.c.bf16 %v8912_v46, %v8911_v31  ;;  %v1875_v42 = vpop.f32.mrb[63].mxu1 }
 0x2c9   : > { %v1949_v23 = vpack.c.bf16 %v1875_v42, %v1872_v43 }
 0x2ca   : > { %v8839_v26 = vpop.f32.mrb[60].mxu0 }
 0x2cb   : > { %v1455_v0 = vpop.f32.mrb[61].mxu0  ;;  %2358 = vmatprep.mubr.bf16.mxu1 %v1949_v23 }
 0x2cc   : > { %v8840_v8 = vpop.f32.mrb[62].mxu0 }
 0x2cd   : > { %v1918_v22 = vpack.c.bf16 %v8840_v8, %v8839_v26  ;;  %v1458_v20 = vpop.f32.mrb[63].mxu0 }
 0x2ce   : > { %v1917_v28 = vpack.c.bf16 %v1458_v20, %v1455_v0 }
 0x2d0   : > { %2359 = vmatmul.mubr.bf16.gmra.mrb[120].mxu1 %v1917_v28 }
 0x2d1   : > { %2366 = vmatprep.mubr.bf16.mxu1 %v1950_v57 }
 0x2d2   : > { %v2120_v1 = vpop.f32.mrb[64].mxu0 }
 0x2d3   : > { %v2121_v60 = vadd.f32 %v10282_v14, %v2120_v1  ;;  %v2122_v32 = vpop.f32.mrb[65].mxu0 }
 0x2d4   : > { %v2123_v7 = vpop.f32.mrb[66].mxu0 }
 0x2d5   : > { %v2375_v56 = vmax.f32 %v2121_v60, 0.0  ;;  %v2124_v44 = vadd.f32 %v10282_v14, %v2123_v7  ;;  %v2125_v47 = vpop.f32.mrb[67].mxu0 }
 0x2d7   : > { %v2446_v5 = vmul.f32 %v10288_v11, %v2375_v56  ;;  %v2376_v4 = vmax.f32 %v2124_v44, 0.0 }
 0x2d8   : > { %2367 = vmatmul.mubr.bf16.gmra.mrb[124].mxu1 %v1918_v22 }
 0x2d9   : > { %v2447_v52 = vmul.f32 %v10288_v11, %v2376_v4  ;;  %2510 = vadd.xlane.f32.xlu1 %v2446_v5 }
 0x2da   : > { %v2128_v53 = vpop.f32.mrb[68].mxu0 }
 0x2db   : > { %v2129_v21 = vadd.f32 %v10282_v14, %v2128_v53  ;;  %v2130_v24 = vpop.f32.mrb[69].mxu0  ;;  %2512 = vadd.xlane.f32.xlu0 %v2447_v52 }
 0x2dc   : > { %v2131_v6 = vpop.f32.mrb[70].mxu0 }
 0x2dd   : > { %v2377_v17 = vmax.f32 %v2129_v21, 0.0  ;;  %v2132_v37 = vadd.f32 %v10282_v14, %v2131_v6  ;;  %v2133_v63 = vpop.f32.mrb[71].mxu0 }
 0x2df   : > { %v2448_v18 = vmul.f32 %v10288_v11, %v2377_v17  ;;  %v2378_v40 = vmax.f32 %v2132_v37, 0.0 }
 0x2e1   : > { %v2449_v33 = vmul.f32 %v10288_v11, %v2378_v40  ;;  %2514 = vadd.xlane.f32.xlu1 %v2448_v18 }
 0x2e2   : > { %v2136_v55 = vpop.f32.mrb[72].mxu0 }
 0x2e3   : > { %v2137_v50 = vadd.f32 %v10282_v14, %v2136_v55  ;;  %v2138_v45 = vpop.f32.mrb[73].mxu0  ;;  %2516 = vadd.xlane.f32.xlu0 %v2449_v33 }
 0x2e4   : > { %v2139_v41 = vpop.f32.mrb[74].mxu0 }
 0x2e5   : > { %v2379_v58 = vmax.f32 %v2137_v50, 0.0  ;;  %v2140_v38 = vadd.f32 %v10282_v14, %v2139_v41  ;;  %v2141_v29 = vpop.f32.mrb[75].mxu0 }
 0x2e7   : > { %v2450_v30 = vmul.f32 %v10288_v11, %v2379_v58  ;;  %v2380_v61 = vmax.f32 %v2140_v38, 0.0 }
 0x2e9   : > { %v2451_v36 = vmul.f32 %v10288_v11, %v2380_v61  ;;  %2518 = vadd.xlane.f32.xlu1 %v2450_v30 }
 0x2ea   : > { %v2144_v13 = vpop.f32.mrb[76].mxu0 }
 0x2eb   : > { %v2145_v25 = vadd.f32 %v10282_v14, %v2144_v13  ;;  %v2146_v34 = vpop.f32.mrb[77].mxu0  ;;  %2520 = vadd.xlane.f32.xlu0 %v2451_v36 }
 0x2ec   : > { %v2147_v15 = vpop.f32.mrb[78].mxu0 }
 0x2ed   : > { %v2381_v54 = vmax.f32 %v2145_v25, 0.0  ;;  %v2148_v2 = vadd.f32 %v10282_v14, %v2147_v15  ;;  %v2149_v39 = vpop.f32.mrb[79].mxu0 }
 0x2ef   : > { %v2452_v59 = vmul.f32 %v10288_v11, %v2381_v54  ;;  %v2382_v12 = vmax.f32 %v2148_v2, 0.0 }
 0x2f1   : > { %v2453_v19 = vmul.f32 %v10288_v11, %v2382_v12  ;;  %2522 = vadd.xlane.f32.xlu1 %v2452_v59 }
 0x2f2   : > { %v2152_v49 = vpop.f32.mrb[80].mxu0 }
 0x2f3   : > { %v2153_v16 = vadd.f32 %v10282_v14, %v2152_v49  ;;  %v2154_v27 = vpop.f32.mrb[81].mxu0  ;;  %2524 = vadd.xlane.f32.xlu0 %v2453_v19 }
 0x2f4   : > { %v2155_v10 = vpop.f32.mrb[82].mxu0 }
 0x2f5   : > { %v2383_v35 = vmax.f32 %v2153_v16, 0.0  ;;  %v2156_v48 = vadd.f32 %v10282_v14, %v2155_v10  ;;  %v2157_v62 = vpop.f32.mrb[83].mxu0 }
 0x2f7   : > { %v2454_v3 = vmul.f32 %v10288_v11, %v2383_v35  ;;  %v2384_v51 = vmax.f32 %v2156_v48, 0.0 }
 0x2f9   : > { %v2455_v31 = vmul.f32 %v10288_v11, %v2384_v51  ;;  %2526 = vadd.xlane.f32.xlu1 %v2454_v3 }
 0x2fa   : > { %v2160_v43 = vpop.f32.mrb[84].mxu0 }
 0x2fb   : > { %v2161_v46 = vadd.f32 %v10282_v14, %v2160_v43  ;;  %v2162_v57 = vpop.f32.mrb[85].mxu0  ;;  %v2248_v42 = vpop.f32.mrb[64].mxu1  ;;  %2528 = vadd.xlane.f32.xlu0 %v2455_v31 }
 0x2fc   : > { %v2163_v23 = vpop.f32.mrb[86].mxu0  ;;  %v2250_v26 = vpop.f32.mrb[65].mxu1  ;;  %v2249_v61 = vadd.f32 %v10282_v14, %v2248_v42 }
 0x2fd   : > { %v2385_v0 = vmax.f32 %v2161_v46, 0.0  ;;  %v2164_v8 = vadd.f32 %v10282_v14, %v2163_v23  ;;  %v2165_v22 = vpop.f32.mrb[87].mxu0  ;;  %v2251_v20 = vpop.f32.mrb[66].mxu1 }
 0x2fe   : > { %v2253_v28 = vpop.f32.mrb[67].mxu1  ;;  %v2252_v54 = vadd.f32 %v10282_v14, %v2251_v20  ;;  %v2407_v49 = vmax.f32 %v2249_v61, 0.0 }
 0x2ff   : > { %v2456_v1 = vmul.f32 %v10288_v11, %v2385_v0  ;;  %v2386_v60 = vmax.f32 %v2164_v8, 0.0 }
 0x300   : > { %v2408_v10 = vmax.f32 %v2252_v54, 0.0  ;;  %v2478_v62 = vmul.f32 %v10288_v11, %v2407_v49 }
 0x301   : > { %v2457_v32 = vmul.f32 %v10288_v11, %v2386_v60  ;;  %2530 = vadd.xlane.f32.xlu1 %v2456_v1 }
 0x302   : > { %v2168_v7 = vpop.f32.mrb[88].mxu0  ;;  %v2479_v42 = vmul.f32 %v10288_v11, %v2408_v10 }
 0x303   : > { %v2169_v56 = vadd.f32 %v10282_v14, %v2168_v7  ;;  %v2170_v44 = vpop.f32.mrb[89].mxu0  ;;  %v2256_v47 = vpop.f32.mrb[68].mxu1  ;;  %2532 = vadd.xlane.f32.xlu0 %v2457_v32 }
 0x304   : > { %v2171_v5 = vpop.f32.mrb[90].mxu0  ;;  %v2258_v4 = vpop.f32.mrb[69].mxu1  ;;  %v2257_v3 = vadd.f32 %v10282_v14, %v2256_v47 }
 0x305   : > { %v2387_v52 = vmax.f32 %v2169_v56, 0.0  ;;  %v2172_v53 = vadd.f32 %v10282_v14, %v2171_v5  ;;  %v2173_v21 = vpop.f32.mrb[91].mxu0  ;;  %v2259_v24 = vpop.f32.mrb[70].mxu1 }
 0x306   : > { %v2261_v6 = vpop.f32.mrb[71].mxu1  ;;  %v2260_v23 = vadd.f32 %v10282_v14, %v2259_v24  ;;  %v2409_v28 = vmax.f32 %v2257_v3, 0.0 }
 0x307   : > { %v2458_v17 = vmul.f32 %v10288_v11, %v2387_v52  ;;  %v2388_v37 = vmax.f32 %v2172_v53, 0.0 }
 0x308   : > { %v2410_v32 = vmax.f32 %v2260_v23, 0.0  ;;  %v2480_v44 = vmul.f32 %v10288_v11, %v2409_v28 }
 0x309   : > { %v2459_v63 = vmul.f32 %v10288_v11, %v2388_v37  ;;  %2534 = vadd.xlane.f32.xlu1 %v2458_v17 }
 0x30a   : > { %v2176_v18 = vpop.f32.mrb[92].mxu0  ;;  %v2481_v53 = vmul.f32 %v10288_v11, %v2410_v32 }
 0x30b   : > { %v2177_v40 = vadd.f32 %v10282_v14, %v2176_v18  ;;  %v2178_v33 = vpop.f32.mrb[93].mxu0  ;;  %2536 = vadd.xlane.f32.xlu0 %v2459_v63 }
 0x30c   : > { %v2179_v55 = vpop.f32.mrb[94].mxu0 }
 0x30d   : > { %v2389_v50 = vmax.f32 %v2177_v40, 0.0  ;;  %v2180_v45 = vadd.f32 %v10282_v14, %v2179_v55  ;;  %v2181_v41 = vpop.f32.mrb[95].mxu0 }
 0x30f   : > { %v2460_v58 = vmul.f32 %v10288_v11, %v2389_v50  ;;  %v2390_v38 = vmax.f32 %v2180_v45, 0.0 }
 0x311   : > { %v2461_v29 = vmul.f32 %v10288_v11, %v2390_v38  ;;  %2538 = vadd.xlane.f32.xlu1 %v2460_v58 }
 0x312   : > { %v2184_v30 = vpop.f32.mrb[96].mxu0 }
 0x313   : > { %v2185_v36 = vadd.f32 %v10282_v14, %v2184_v30  ;;  %v2186_v13 = vpop.f32.mrb[97].mxu0  ;;  %v2264_v25 = vpop.f32.mrb[72].mxu1  ;;  %2540 = vadd.xlane.f32.xlu0 %v2461_v29 }
 0x314   : > { %v2187_v34 = vpop.f32.mrb[98].mxu0  ;;  %v2266_v15 = vpop.f32.mrb[73].mxu1  ;;  %v2265_v47 = vadd.f32 %v10282_v14, %v2264_v25 }
 0x315   : > { %v2391_v2 = vmax.f32 %v2185_v36, 0.0  ;;  %v2188_v39 = vadd.f32 %v10282_v14, %v2187_v34  ;;  %v2189_v59 = vpop.f32.mrb[99].mxu0  ;;  %v2267_v12 = vpop.f32.mrb[74].mxu1 }
 0x316   : > { %v2269_v19 = vpop.f32.mrb[75].mxu1  ;;  %v2268_v21 = vadd.f32 %v10282_v14, %v2267_v12  ;;  %v2411_v37 = vmax.f32 %v2265_v47, 0.0 }
 0x317   : > { %v2462_v16 = vmul.f32 %v10288_v11, %v2391_v2  ;;  %v2392_v27 = vmax.f32 %v2188_v39, 0.0 }
 0x318   : > { %v2412_v40 = vmax.f32 %v2268_v21, 0.0  ;;  %v2482_v50 = vmul.f32 %v10288_v11, %v2411_v37 }
 0x319   : > { %v2463_v35 = vmul.f32 %v10288_v11, %v2392_v27  ;;  %2542 = vadd.xlane.f32.xlu1 %v2462_v16 }
 0x31a   : > { %v2192_v48 = vpop.f32.mrb[100].mxu0  ;;  %v2483_v61 = vmul.f32 %v10288_v11, %v2412_v40 }
 0x31b   : > { %v2193_v51 = vadd.f32 %v10282_v14, %v2192_v48  ;;  %v2194_v31 = vpop.f32.mrb[101].mxu0  ;;  %v2272_v43 = vpop.f32.mrb[76].mxu1  ;;  %2544 = vadd.xlane.f32.xlu0 %v2463_v35 }
 0x31c   : > { %v2195_v46 = vpop.f32.mrb[102].mxu0  ;;  %v2274_v57 = vpop.f32.mrb[77].mxu1  ;;  %v2273_v45 = vadd.f32 %v10282_v14, %v2272_v43 }
 0x31d   : > { %v2393_v26 = vmax.f32 %v2193_v51, 0.0  ;;  %v2196_v0 = vadd.f32 %v10282_v14, %v2195_v46  ;;  %v2197_v8 = vpop.f32.mrb[103].mxu0  ;;  %v2275_v22 = vpop.f32.mrb[78].mxu1  ;;  %2574 = vadd.xlane.f32.xlu1 %v2478_v62 }
 0x31e   : > { %v2277_v20 = vpop.f32.mrb[79].mxu1  ;;  %v2276_v36 = vadd.f32 %v10282_v14, %v2275_v22  ;;  %v2413_v2 = vmax.f32 %v2273_v45, 0.0 }
 0x31f   : > { %v2464_v1 = vmul.f32 %v10288_v11, %v2393_v26  ;;  %v2394_v60 = vmax.f32 %v2196_v0, 0.0  ;;  %2576 = vadd.xlane.f32.xlu0 %v2479_v42 }
 0x320   : > { %v2414_v12 = vmax.f32 %v2276_v36, 0.0  ;;  %v2484_v16 = vmul.f32 %v10288_v11, %v2413_v2 }
 0x321   : > { %v2465_v7 = vmul.f32 %v10288_v11, %v2394_v60  ;;  %2546 = vadd.xlane.f32.xlu1 %v2464_v1 }
 0x322   : > { %v2200_v56 = vpop.f32.mrb[104].mxu0  ;;  %v2485_v51 = vmul.f32 %v10288_v11, %v2414_v12 }
 0x323   : > { %v2201_v5 = vadd.f32 %v10282_v14, %v2200_v56  ;;  %v2202_v4 = vpop.f32.mrb[105].mxu0  ;;  %2548 = vadd.xlane.f32.xlu0 %v2465_v7 }
 0x324   : > { %v2203_v52 = vpop.f32.mrb[106].mxu0 }
 0x325   : > { %v2395_v24 = vmax.f32 %v2201_v5, 0.0  ;;  %v2204_v6 = vadd.f32 %v10282_v14, %v2203_v52  ;;  %v2205_v17 = vpop.f32.mrb[107].mxu0  ;;  %2578 = vadd.xlane.f32.xlu1 %v2480_v44 }
 0x327   : > { %v2466_v63 = vmul.f32 %v10288_v11, %v2395_v24  ;;  %v2396_v18 = vmax.f32 %v2204_v6, 0.0  ;;  %2580 = vadd.xlane.f32.xlu0 %v2481_v53 }
 0x329   : > { %v2467_v33 = vmul.f32 %v10288_v11, %v2396_v18  ;;  %2550 = vadd.xlane.f32.xlu1 %v2466_v63 }
 0x32a   : > { %v2208_v55 = vpop.f32.mrb[108].mxu0 }
 0x32b   : > { %v2209_v41 = vadd.f32 %v10282_v14, %v2208_v55  ;;  %v2210_v58 = vpop.f32.mrb[109].mxu0  ;;  %v2280_v38 = vpop.f32.mrb[80].mxu1  ;;  %2552 = vadd.xlane.f32.xlu0 %v2467_v33 }
 0x32c   : > { %v2211_v29 = vpop.f32.mrb[110].mxu0  ;;  %v2282_v30 = vpop.f32.mrb[81].mxu1  ;;  %v2281_v27 = vadd.f32 %v10282_v14, %v2280_v38 }
 0x32d   : > { %v2397_v13 = vmax.f32 %v2209_v41, 0.0  ;;  %v2212_v25 = vadd.f32 %v10282_v14, %v2211_v29  ;;  %v2213_v34 = vpop.f32.mrb[111].mxu0  ;;  %v2283_v15 = vpop.f32.mrb[82].mxu1  ;;  %2582 = vadd.xlane.f32.xlu1 %v2482_v50 }
 0x32e   : > { %v2285_v54 = vpop.f32.mrb[83].mxu1  ;;  %v2284_v31 = vadd.f32 %v10282_v14, %v2283_v15  ;;  %v2415_v26 = vmax.f32 %v2281_v27, 0.0 }
 0x32f   : > { %v2468_v39 = vmul.f32 %v10288_v11, %v2397_v13  ;;  %v2398_v59 = vmax.f32 %v2212_v25, 0.0  ;;  %2584 = vadd.xlane.f32.xlu0 %v2483_v61 }
 0x330   : > { %v2416_v22 = vmax.f32 %v2284_v31, 0.0  ;;  %v2486_v1 = vmul.f32 %v10288_v11, %v2415_v26 }
 0x331   : > { %v2469_v19 = vmul.f32 %v10288_v11, %v2398_v59  ;;  %2554 = vadd.xlane.f32.xlu1 %v2468_v39 }
 0x332   : > { %v2216_v49 = vpop.f32.mrb[112].mxu0  ;;  %v2487_v44 = vmul.f32 %v10288_v11, %v2416_v22 }
 0x333   : > { %v2217_v10 = vadd.f32 %v10282_v14, %v2216_v49  ;;  %v2218_v35 = vpop.f32.mrb[113].mxu0  ;;  %v2288_v48 = vpop.f32.mrb[84].mxu1  ;;  %2556 = vadd.xlane.f32.xlu0 %v2469_v19 }
 0x334   : > { %v2219_v62 = vpop.f32.mrb[114].mxu0  ;;  %v2290_v3 = vpop.f32.mrb[85].mxu1  ;;  %v2289_v60 = vadd.f32 %v10282_v14, %v2288_v48 }
 0x335   : > { %v2399_v43 = vmax.f32 %v2217_v10, 0.0  ;;  %v2220_v46 = vadd.f32 %v10282_v14, %v2219_v62  ;;  %v2221_v57 = vpop.f32.mrb[115].mxu0  ;;  %v2291_v42 = vpop.f32.mrb[86].mxu1  ;;  %2586 = vadd.xlane.f32.xlu1 %v2484_v16 }
 0x336   : > { %v2293_v23 = vpop.f32.mrb[87].mxu1  ;;  %v2292_v47 = vadd.f32 %v10282_v14, %v2291_v42  ;;  %v2417_v53 = vmax.f32 %v2289_v60, 0.0 }
 0x337   : > { %v2470_v0 = vmul.f32 %v10288_v11, %v2399_v43  ;;  %v2400_v8 = vmax.f32 %v2220_v46, 0.0  ;;  %2588 = vadd.xlane.f32.xlu0 %v2485_v51 }
 0x338   : > { %v2418_v6 = vmax.f32 %v2292_v47, 0.0  ;;  %v2488_v63 = vmul.f32 %v10288_v11, %v2417_v53 }
 0x339   : > { %v2471_v20 = vmul.f32 %v10288_v11, %v2400_v8  ;;  %2558 = vadd.xlane.f32.xlu1 %v2470_v0 }
 0x33a   : > { %v2224_v28 = vpop.f32.mrb[116].mxu0  ;;  %v2489_v41 = vmul.f32 %v10288_v11, %v2418_v6  ;;  %v10393_v6 = vstv %s2638_s9  ;;  %s9073_s9 = sshll.u32 %s9137_s19, 4  ;;  %s9074_s9 = int_to_ptr.vmem [resolvable:$false] %s9073_s9 }
 0x33b   : > { %v2225_v32 = vadd.f32 %v10282_v14, %v2224_v28  ;;  %v2226_v7 = vpop.f32.mrb[117].mxu0  ;;  %2560 = vadd.xlane.f32.xlu0 %v2471_v20  ;;  %12593 = vst [vmem:[#allocation8_spill] sm:$0xff] %v10393_v6  ;;  %s9075_s10 = scalar_lea.vmem %s9074_s9, 128  ;;  %p9076_p0 = scmp.lt.s32.totalorder %s12474_s22, %s9074_s9 }
 0x33c   : > { %v2227_v56 = vpop.f32.mrb[118].mxu0  ;;  %p9077_p1 = scmp.lt.s32.totalorder %s9075_s10, %s9069_s30 }
 0x33d   : > { %v2401_v5 = vmax.f32 %v2225_v32, 0.0  ;;  %v2228_v4 = vadd.f32 %v10282_v14, %v2227_v56  ;;  %v2229_v52 = vpop.f32.mrb[119].mxu0  ;;  %2590 = vadd.xlane.f32.xlu1 %v2486_v1 }
 0x33e   : > { %p9078_p2 = por %p9077_p1, %p9076_p0 }
 0x33f   : > { %v2472_v21 = vmul.f32 %v10288_v11, %v2401_v5  ;;  %v2402_v24 = vmax.f32 %v2228_v4, 0.0  ;;  %2592 = vadd.xlane.f32.xlu0 %v2487_v44  ;;  %v9136_v44 = vmov 1966171168   ;;  %v12591_v5 = vlaneseq }
 0x340   : > { %v4821_v47 = vunpack.c.l.s4 %v9136_v44  ;;  %p9079_p3 = pnand %p9078_p2, %p9072_p13 }
 0x341   : > { %v2473_v17 = vmul.f32 %v10288_v11, %v2402_v24  ;;  %2562 = vadd.xlane.f32.xlu1 %v2472_v21  ;;  %v10389_v4 = vshrl.u32 %v12591_v5, 7 }
 0x342   : > { %v2232_v37 = vpop.f32.mrb[120].mxu0 }
 0x343   : > { %v2233_v18 = vadd.f32 %v10282_v14, %v2232_v37  ;;  %v2234_v40 = vpop.f32.mrb[121].mxu0  ;;  %v2296_v33 = vpop.f32.mrb[88].mxu1  ;;  %2564 = vadd.xlane.f32.xlu0 %v2473_v17  ;;  %12592 = vst [vmem:[#allocation7_spill] sm:$0xff] %v10389_v4  ;;  %v4822_v17 = vunpack.c.0.s8 %v4821_v47 }
 0x344   : > { %v2297_v55 = vadd.f32 %v10282_v14, %v2296_v33  ;;  %v2235_v50 = vpop.f32.mrb[122].mxu0  ;;  %v2298_v45 = vpop.f32.mrb[89].mxu1  ;;  %v10402_v40 = vsub.s32 2, %v10389_v4  ;;  %v10405_v33 = vsub.s32 3, %v10389_v4 }
 0x345   : > { %v2403_v58 = vmax.f32 %v2233_v18, 0.0  ;;  %v2236_v38 = vadd.f32 %v10282_v14, %v2235_v50  ;;  %v2237_v29 = vpop.f32.mrb[123].mxu0  ;;  %v2299_v30 = vpop.f32.mrb[90].mxu1  ;;  %2594 = vadd.xlane.f32.xlu1 %v2488_v63  ;;  %v10396_v63 = vsub.s32 0, %v10389_v4  ;;  %v10399_v18 = vsub.s32 1, %v10389_v4 }
 0x346   : > { %v2300_v61 = vadd.f32 %v10282_v14, %v2299_v30  ;;  %v2301_v36 = vpop.f32.mrb[91].mxu1  ;;  %v2419_v25 = vmax.f32 %v2297_v55, 0.0  ;;  %v10416_v30 = vsub.s32 6, %v10389_v4 }
 0x347   : > { %v2474_v13 = vmul.f32 %v10288_v11, %v2403_v58  ;;  %v2404_v34 = vmax.f32 %v2236_v38, 0.0  ;;  %2596 = vadd.xlane.f32.xlu0 %v2489_v41  ;;  %v10409_v58 = vsub.s32 4, %v10389_v4  ;;  %v10412_v38 = vsub.s32 5, %v10389_v4 }
 0x348   : > { %v2420_v54 = vmax.f32 %v2300_v61, 0.0  ;;  %v2490_v39 = vmul.f32 %v10288_v11, %v2419_v25  ;;  %v10419_v61 = vsub.s32 7, %v10389_v4 }
 0x349   : > { %v2475_v15 = vmul.f32 %v10288_v11, %v2404_v34  ;;  %2566 = vadd.xlane.f32.xlu1 %v2474_v13  ;;  %v10423_v34 = vsub.s32 %v4822_v17, %v10389_v4 }
 0x34a   : > { %v2240_v2 = vpop.f32.mrb[124].mxu0  ;;  %v2491_v10 = vmul.f32 %v10288_v11, %v2420_v54 }
 0x34b   : > { %v2241_v59 = vadd.f32 %v10282_v14, %v2240_v2  ;;  %v2242_v12 = vpop.f32.mrb[125].mxu0  ;;  %v2304_v19 = vpop.f32.mrb[92].mxu1  ;;  %2568 = vadd.xlane.f32.xlu0 %v2475_v15 }
 0x34c   : > { %v2305_v49 = vadd.f32 %v10282_v14, %v2304_v19  ;;  %v2243_v16 = vpop.f32.mrb[126].mxu0  ;;  %v2306_v27 = vpop.f32.mrb[93].mxu1 }
 0x34d   : > { %v2405_v35 = vmax.f32 %v2241_v59, 0.0  ;;  %v2244_v48 = vadd.f32 %v10282_v14, %v2243_v16  ;;  %v2245_v62 = vpop.f32.mrb[127].mxu0  ;;  %v2307_v3 = vpop.f32.mrb[94].mxu1  ;;  %2598 = vadd.xlane.f32.xlu1 %v2490_v39 }
 0x34e   : > { %v2308_v51 = vadd.f32 %v10282_v14, %v2307_v3  ;;  %v2309_v31 = vpop.f32.mrb[95].mxu1  ;;  %v2421_v46 = vmax.f32 %v2305_v49, 0.0 }
 0x34f   : > { %v2476_v43 = vmul.f32 %v10288_v11, %v2405_v35  ;;  %v2406_v57 = vmax.f32 %v2244_v48, 0.0  ;;  %2600 = vadd.xlane.f32.xlu0 %v2491_v10 }
 0x350   : > { %v2422_v23 = vmax.f32 %v2308_v51, 0.0  ;;  %v2492_v26 = vmul.f32 %v10288_v11, %v2421_v46 }
 0x351   : > { %v2477_v42 = vmul.f32 %v10288_v11, %v2406_v57  ;;  %2570 = vadd.xlane.f32.xlu1 %v2476_v43 }
 0x352   : > { %v2493_v0 = vmul.f32 %v10288_v11, %v2422_v23 }
 0x353   : > { %2572 = vadd.xlane.f32.xlu0 %v2477_v42 }
 0x355   : > { %2602 = vadd.xlane.f32.xlu1 %v2492_v26 }
 0x357   : > { %2604 = vadd.xlane.f32.xlu0 %v2493_v0 }
 0x35b   : > { %v2312_v8 = vpop.f32.mrb[96].mxu1 }
 0x35c   : > { %v2313_v22 = vadd.f32 %v10282_v14, %v2312_v8  ;;  %v2314_v20 = vpop.f32.mrb[97].mxu1 }
 0x35d   : > { %v2315_v28 = vpop.f32.mrb[98].mxu1 }
 0x35e   : > { %v2423_v1 = vmax.f32 %v2313_v22, 0.0  ;;  %v2316_v60 = vadd.f32 %v10282_v14, %v2315_v28  ;;  %v2317_v32 = vpop.f32.mrb[99].mxu1 }
 0x360   : > { %v2494_v7 = vmul.f32 %v10288_v11, %v2423_v1  ;;  %v2424_v56 = vmax.f32 %v2316_v60, 0.0 }
 0x362   : > { %v2495_v52 = vmul.f32 %v10288_v11, %v2424_v56  ;;  %2606 = vadd.xlane.f32.xlu1 %v2494_v7 }
 0x363   : > { %v2320_v53 = vpop.f32.mrb[100].mxu1 }
 0x364   : > { %v2321_v21 = vadd.f32 %v10282_v14, %v2320_v53  ;;  %v2322_v24 = vpop.f32.mrb[101].mxu1  ;;  %2608 = vadd.xlane.f32.xlu0 %v2495_v52 }
 0x365   : > { %v2323_v37 = vpop.f32.mrb[102].mxu1 }
 0x366   : > { %v2425_v55 = vmax.f32 %v2321_v21, 0.0  ;;  %v2324_v50 = vadd.f32 %v10282_v14, %v2323_v37  ;;  %v2325_v45 = vpop.f32.mrb[103].mxu1  ;;  %v2511_v41 = vpop.xlane.xlu1 %2510 }
 0x367   : > { %v2640_v29 = vadd.f32 %v10393_v6, %v2511_v41 }
 0x368   : > { %v2496_v36 = vmul.f32 %v10288_v11, %v2425_v55  ;;  %v2426_v13 = vmax.f32 %v2324_v50, 0.0  ;;  %v2513_v25 = vpop.xlane.xlu0 %2512 }
 0x369   : > { %v2641_v15 = vadd.f32 %v10393_v6, %v2513_v25  ;;  %v2771_v54 = vrot.slane %v2640_v29, %v10396_v63  ;;  %v2775_v2 = vrot.slane %v2640_v29, %v10399_v18  ;;  %v2779_v39 = vrot.slane %v2640_v29, %v10402_v40 }
 0x36a   : > { %v2497_v59 = vmul.f32 %v10288_v11, %v2426_v13  ;;  %2610 = vadd.xlane.f32.xlu1 %v2496_v36  ;;  %v2783_v12 = vrot.slane %v2640_v29, %v10405_v33  ;;  %v2787_v19 = vrot.slane %v2640_v29, %v10409_v58  ;;  %v2791_v49 = vrot.slane %v2640_v29, %v10412_v38 }
 0x36b   : > { %v2795_v16 = vrot.slane %v2640_v29, %v10416_v30  ;;  %v2799_v27 = vrot.slane %v2640_v29, %v10419_v61  ;;  %v4816_v10 = vcombine.low %v2771_v54, %v2775_v2  ;;  %v2803_v35 = vrot.slane %v2641_v15, %v10396_v63 }
 0x36c   : > { %2612 = vadd.xlane.f32.xlu0 %v2497_v59  ;;  %v4817_v48 = vcombine.low %v2779_v39, %v2783_v12  ;;  %v4818_v62 = vcombine.low %v2787_v19, %v2791_v49  ;;  %v2807_v3 = vrot.slane %v2641_v15, %v10399_v18  ;;  %v2811_v51 = vrot.slane %v2641_v15, %v10402_v40 }
 0x36d   : > { %v4819_v31 = vcombine.low %v2795_v16, %v2799_v27  ;;  %v2815_v43 = vrot.slane %v2641_v15, %v10405_v33  ;;  %v2819_v46 = vrot.slane %v2641_v15, %v10409_v58  ;;  %v2823_v42 = vrot.slane %v2641_v15, %v10412_v38 }
 0x36e   : > { %v2515_v57 = vpop.xlane.xlu1 %2514  ;;  %v2827_v23 = vrot.slane %v2641_v15, %v10416_v30  ;;  %v4826_v26 = vrot.slane %v4816_v10, %v10423_v34  ;;  %v2831_v0 = vrot.slane %v2641_v15, %v10419_v61  ;;  %v4865_v8 = vcombine.low %v2803_v35, %v2807_v3 }
 0x36f   : > { %v4833_v22 = vrot.slane %v4817_v48, %v10423_v34  ;;  %v4840_v20 = vrot.slane %v4818_v62, %v10423_v34  ;;  %v4866_v28 = vcombine.low %v2811_v51, %v2815_v43  ;;  %v4867_v1 = vcombine.low %v2819_v46, %v2823_v42 }
 0x370   : > { %v2642_v60 = vadd.f32 %v10393_v6, %v2515_v57  ;;  %v4847_v32 = vrot.slane %v4819_v31, %v10423_v34  ;;  %v4868_v7 = vcombine.low %v2827_v23, %v2831_v0  ;;  %v4875_v56 = vrot.slane %v4865_v8, %v10423_v34  ;;  %v2517_v21 = vpop.xlane.xlu0 %2516 }
 0x371   : > { %v4882_v44 = vrot.slane %v4866_v28, %v10423_v34  ;;  %v4889_v52 = vrot.slane %v4867_v1, %v10423_v34  ;;  %v4848_v37 = vcombine.low %v4826_v26, %v4833_v22  ;;  %v2643_v2 = vadd.f32 %v10393_v6, %v2517_v21 }
 0x372   : > { %v4896_v53 = vrot.slane %v4868_v7, %v10423_v34  ;;  %v4849_v50 = vcombine.low %v4840_v20, %v4847_v32  ;;  %v2835_v41 = vrot.slane %v2642_v60, %v10396_v63  ;;  %v2839_v29 = vrot.slane %v2642_v60, %v10399_v18 }
 0x373   : > { %v2328_v47 = vpop.f32.mrb[104].mxu1  ;;  %v4897_v45 = vcombine.low %v4875_v56, %v4882_v44  ;;  %v2843_v15 = vrot.slane %v2642_v60, %v10402_v40  ;;  %v2847_v54 = vrot.slane %v2642_v60, %v10405_v33  ;;  %v2851_v12 = vrot.slane %v2642_v60, %v10409_v58 }
 0x374   : > { %v2329_v24 = vadd.f32 %v10282_v14, %v2328_v47  ;;  %v2330_v17 = vpop.f32.mrb[105].mxu1  ;;  %v4898_v59 = vcombine.low %v4889_v52, %v4896_v53  ;;  %v2855_v19 = vrot.slane %v2642_v60, %v10412_v38  ;;  %v2859_v27 = vrot.slane %v2642_v60, %v10416_v30 }
 0x375   : > { %v2331_v55 = vpop.f32.mrb[106].mxu1  ;;  %v2863_v10 = vrot.slane %v2642_v60, %v10419_v61  ;;  %v4856_v35 = vrot.slane %v4848_v37, %v10423_v34  ;;  %v4863_v48 = vrot.slane %v4849_v50, %v10423_v34  ;;  %v4905_v62 = vrot.slane %v4897_v45, %v10423_v34 }
 0x376   : > { %v2427_v36 = vmax.f32 %v2329_v24, 0.0  ;;  %v2332_v13 = vadd.f32 %v10282_v14, %v2331_v55  ;;  %v2333_v25 = vpop.f32.mrb[107].mxu1  ;;  %v2519_v39 = vpop.xlane.xlu1 %2518  ;;  %v4914_v31 = vcombine.low %v2835_v41, %v2839_v29  ;;  %v4915_v43 = vcombine.low %v2843_v15, %v2847_v54 }
 0x377   : > { %v2644_v51 = vadd.f32 %v10393_v6, %v2519_v39  ;;  %v4912_v57 = vrot.slane %v4898_v59, %v10423_v34  ;;  %v4916_v42 = vcombine.low %v2851_v12, %v2855_v19  ;;  %v2867_v23 = vrot.slane %v2643_v2, %v10396_v63 }
 0x378   : > { %v2498_v49 = vmul.f32 %v10288_v11, %v2427_v36  ;;  %v2428_v16 = vmax.f32 %v2332_v13, 0.0  ;;  %v2871_v26 = vrot.slane %v2643_v2, %v10399_v18  ;;  %v2521_v0 = vpop.xlane.xlu0 %2520  ;;  %v4917_v20 = vcombine.low %v2859_v27, %v2863_v10 }
 0x379   : > { %v2875_v28 = vrot.slane %v2643_v2, %v10402_v40  ;;  %v2879_v1 = vrot.slane %v2643_v2, %v10405_v33  ;;  %v2883_v32 = vrot.slane %v2643_v2, %v10409_v58  ;;  %v2887_v7 = vrot.slane %v2643_v2, %v10412_v38 }
 0x37a   : > { %v2499_v3 = vmul.f32 %v10288_v11, %v2428_v16  ;;  %2614 = vadd.xlane.f32.xlu1 %v2498_v49  ;;  %v2891_v56 = vrot.slane %v2643_v2, %v10416_v30  ;;  %v2895_v44 = vrot.slane %v2643_v2, %v10419_v61  ;;  %v4924_v21 = vrot.slane %v4914_v31, %v10423_v34 }
 0x37b   : > { %v2336_v46 = vpop.f32.mrb[108].mxu1  ;;  %v4931_v24 = vrot.slane %v4915_v43, %v10423_v34  ;;  %v2645_v17 = vadd.f32 %v10393_v6, %v2521_v0  ;;  %v10483_v37 = vcombine.low %v4856_v35, %v4863_v48  ;;  %v10485_v55 = vcombine.low %v4905_v62, %v4912_v57 }
 0x37c   : > { %v2337_v8 = vadd.f32 %v10282_v14, %v2336_v46  ;;  %v2338_v22 = vpop.f32.mrb[109].mxu1  ;;  %2616 = vadd.xlane.f32.xlu0 %v2499_v3  ;;  %v4963_v50 = vcombine.low %v2867_v23, %v2871_v26  ;;  %v4938_v29 = vrot.slane %v4916_v42, %v10423_v34  ;;  %v4964_v36 = vcombine.low %v2875_v28, %v2879_v1 }
 0x37d   : > { %v2339_v60 = vpop.f32.mrb[110].mxu1  ;;  %v4945_v13 = vrot.slane %v4917_v20, %v10423_v34  ;;  %v4965_v25 = vcombine.low %v2883_v32, %v2887_v7  ;;  %v4966_v15 = vcombine.low %v2891_v56, %v2895_v44  ;;  %v2899_v54 = vrot.slane %v2644_v51, %v10396_v63 }
 0x37e   : > { %v2429_v47 = vmax.f32 %v2337_v8, 0.0  ;;  %v2340_v52 = vadd.f32 %v10282_v14, %v2339_v60  ;;  %v2341_v53 = vpop.f32.mrb[111].mxu1  ;;  %v10492_v39 = vcombine.low %v4924_v21, %v4931_v24  ;;  %v2903_v59 = vrot.slane %v2644_v51, %v10399_v18  ;;  %v2523_v46 = vpop.xlane.xlu1 %2522 }
 0x37f   : > { %v2907_v12 = vrot.slane %v2644_v51, %v10402_v40  ;;  %v4973_v19 = vrot.slane %v4963_v50, %v10423_v34  ;;  %v2911_v49 = vrot.slane %v2644_v51, %v10405_v33  ;;  %v2915_v16 = vrot.slane %v2644_v51, %v10409_v58 }
 0x380   : > { %v2500_v45 = vmul.f32 %v10288_v11, %v2429_v47  ;;  %v2430_v41 = vmax.f32 %v2340_v52, 0.0  ;;  %v2919_v27 = vrot.slane %v2644_v51, %v10412_v38  ;;  %v4980_v10 = vrot.slane %v4964_v36, %v10423_v34  ;;  %v2525_v47 = vpop.xlane.xlu0 %2524 }
 0x381   : > { %v2927_v35 = vrot.slane %v2644_v51, %v10419_v61  ;;  %v5012_v48 = vcombine.low %v2899_v54, %v2903_v59  ;;  %v4987_v62 = vrot.slane %v4965_v25, %v10423_v34  ;;  %v4994_v3 = vrot.slane %v4966_v15, %v10423_v34 }
 0x382   : > { %v2501_v2 = vmul.f32 %v10288_v11, %v2430_v41  ;;  %2618 = vadd.xlane.f32.xlu1 %v2500_v45  ;;  %v2923_v11 = vrot.slane %v2644_v51, %v10416_v30  ;;  %v5013_v31 = vcombine.low %v2907_v12, %v2911_v49  ;;  %v5014_v43 = vcombine.low %v2915_v16, %v2919_v27 }
 0x383   : > { %v2931_v42 = vrot.slane %v2645_v17, %v10396_v63  ;;  %v2935_v23 = vrot.slane %v2645_v17, %v10399_v18  ;;  %v2939_v26 = vrot.slane %v2645_v17, %v10402_v40  ;;  %v4947_v0 = vcombine.low %v4938_v29, %v4945_v13 }
 0x384   : > { %2620 = vadd.xlane.f32.xlu0 %v2501_v2  ;;  %v5015_v57 = vcombine.low %v2923_v11, %v2927_v35  ;;  %v5022_v8 = vrot.slane %v5012_v48, %v10423_v34  ;;  %v5029_v51 = vrot.slane %v5013_v31, %v10423_v34  ;;  %v5036_v22 = vrot.slane %v5014_v43, %v10423_v34 }
 0x385   : > { %v2943_v28 = vrot.slane %v2645_v17, %v10405_v33  ;;  %v2947_v1 = vrot.slane %v2645_v17, %v10409_v58  ;;  %v2951_v60 = vrot.slane %v2645_v17, %v10412_v38  ;;  %v2646_v32 = vadd.f32 %v10393_v6, %v2523_v46 }
 0x386   : > { %v5043_v20 = vrot.slane %v5015_v57, %v10423_v34  ;;  %v4995_v7 = vcombine.low %v4973_v19, %v4980_v10  ;;  %v2955_v56 = vrot.slane %v2645_v17, %v10416_v30  ;;  %v2959_v44 = vrot.slane %v2645_v17, %v10419_v61  ;;  %v2527_v13 = vpop.xlane.xlu1 %2526 }
 0x387   : > { %v4996_v52 = vcombine.low %v4987_v62, %v4994_v3  ;;  %v5061_v53 = vcombine.low %v2931_v42, %v2935_v23  ;;  %v5062_v21 = vcombine.low %v2939_v26, %v2943_v28  ;;  %v5063_v24 = vcombine.low %v2947_v1, %v2951_v60 }
 0x388   : > { %v4954_v45 = vrot.slane %v10492_v39, %v10423_v34  ;;  %v5044_v41 = vcombine.low %v5022_v8, %v5029_v51  ;;  %v5045_v29 = vcombine.low %v5036_v22, %v5043_v20  ;;  %v5064_v36 = vcombine.low %v2955_v56, %v2959_v44  ;;  %v2529_v16 = vpop.xlane.xlu0 %2528 }
 0x389   : > { %v4961_v54 = vrot.slane %v4947_v0, %v10423_v34  ;;  %v5071_v17 = vrot.slane %v5061_v53, %v10423_v34  ;;  %v5078_v2 = vrot.slane %v5062_v21, %v10423_v34  ;;  %v5085_v12 = vrot.slane %v5063_v24, %v10423_v34 }
 0x38a   : > { %v5092_v19 = vrot.slane %v5064_v36, %v10423_v34  ;;  %v2963_v39 = vrot.slane %v2646_v32, %v10396_v63  ;;  %v2967_v49 = vrot.slane %v2646_v32, %v10399_v18  ;;  %v5003_v10 = vrot.slane %v4995_v7, %v10423_v34 }
 0x38b   : > { %v2344_v50 = vpop.f32.mrb[112].mxu1  ;;  %v5010_v11 = vrot.slane %v4996_v52, %v10423_v34  ;;  %v2971_v35 = vrot.slane %v2646_v32, %v10402_v40  ;;  %v2975_v48 = vrot.slane %v2646_v32, %v10405_v33  ;;  %v5052_v31 = vrot.slane %v5044_v41, %v10423_v34 }
 0x38c   : > { %v2345_v25 = vadd.f32 %v10282_v14, %v2344_v50  ;;  %v2346_v15 = vpop.f32.mrb[113].mxu1  ;;  %v5059_v43 = vrot.slane %v5045_v29, %v10423_v34  ;;  %v5093_v57 = vcombine.low %v5071_v17, %v5078_v2  ;;  %v2979_v42 = vrot.slane %v2646_v32, %v10409_v58 }
 0x38d   : > { %v2347_v59 = vpop.f32.mrb[114].mxu1  ;;  %v2983_v23 = vrot.slane %v2646_v32, %v10412_v38  ;;  %v2987_v26 = vrot.slane %v2646_v32, %v10416_v30  ;;  %v10538_v0 = vcombine.low %v4954_v45, %v4961_v54  ;;  %v5094_v8 = vcombine.low %v5085_v12, %v5092_v19 }
 0x38e   : > { %v2349_v27 = vpop.f32.mrb[115].mxu1  ;;  %v2431_v62 = vmax.f32 %v2345_v25, 0.0  ;;  %v2348_v3 = vadd.f32 %v10282_v14, %v2347_v59  ;;  %v2531_v46 = vpop.xlane.xlu1 %2530  ;;  %v2991_v51 = vrot.slane %v2646_v32, %v10419_v61  ;;  %v5110_v22 = vcombine.low %v2963_v39, %v2967_v49 }
 0x38f   : > { %v2647_v14 = vadd.f32 %v10393_v6, %v2525_v47  ;;  %v10543_v20 = vadd.f32 %v10393_v6, %v2527_v13  ;;  %v10545_v1 = vcombine.low %v5003_v10, %v5010_v11  ;;  %v5111_v60 = vcombine.low %v2971_v35, %v2975_v48  ;;  %v10559_v47 = vld [vmem:[%s12519_s5] ss:$0 sm:$0xff] }
 0x390   : > { %v2533_v28 = vpop.xlane.xlu0 %2532  ;;  %v10548_v7 = vadd.f32 %v10393_v6, %v2529_v16  ;;  %v10551_v56 = vadd.f32 %v10393_v6, %v2531_v46  ;;  %v2432_v44 = vmax.f32 %v2348_v3, 0.0  ;;  %v10554_v52 = vcombine.low %v5052_v31, %v5059_v43 }
 0x391   : > { %v10562_v53 = vmul.f32 %v10559_v47, %v2431_v62  ;;  %v5101_v24 = vrot.slane %v5093_v57, %v10423_v34  ;;  %v5112_v50 = vcombine.low %v2979_v42, %v2983_v23  ;;  %v5113_v45 = vcombine.low %v2987_v26, %v2991_v51 }
 0x392   : > { %v10566_v41 = vadd.f32 %v10393_v6, %v2533_v28  ;;  %v5108_v13 = vrot.slane %v5094_v8, %v10423_v34  ;;  %v5120_v25 = vrot.slane %v5110_v22, %v10423_v34  ;;  %v5127_v54 = vrot.slane %v5111_v60, %v10423_v34 }
 0x393   : > { %7953 = vperm.xlu1 %9042, %v10483_v37   ;;  %v2352_v32 = vpop.f32.mrb[116].mxu1  ;;  %v10571_v37 = vld [vmem:[%s12518_s4] ss:$0 sm:$0xff]  ;;  %v2995_v17 = vrot.slane %v2647_v14, %v10396_v63  ;;  %v2999_v2 = vrot.slane %v2647_v14, %v10399_v18  ;;  %v3003_v59 = vrot.slane %v2647_v14, %v10402_v40  ;;  %v10583_v12 = vmul.f32 %v10559_v47, %v2432_v44 }
 0x394   : > { %v2354_v21 = vpop.f32.mrb[117].mxu1  ;;  %v10574_v29 = vadd.f32 %v10571_v37, %v2352_v32  ;;  %v10587_v19 = vsub.s32 %v9435_v9, %v10389_v4  ;;  %v3007_v39 = vrot.slane %v2647_v14, %v10405_v33  ;;  %v3011_v49 = vrot.slane %v2647_v14, %v10409_v58 }
 0x395   : > { %v2355_v36 = vpop.f32.mrb[118].mxu1  ;;  %v5134_v16 = vrot.slane %v5112_v50, %v10423_v34  ;;  %v5141_v27 = vrot.slane %v5113_v45, %v10423_v34  ;;  %v8148_v10 = vadd.s32 4294967288, %v9435_v9  ;;  %v3015_v11 = vrot.slane %v2647_v14, %v10412_v38 }
 0x396   : > { %v2357_v15 = vpop.f32.mrb[119].mxu1  ;;  %12594 = vst [vmem:[#allocation9_spill] sm:$0xff] %v10587_v19  ;;  %v2535_v35 = vpop.xlane.xlu1 %2534  ;;  %v2433_v48 = vmax.f32 %v10574_v29, 0.0  ;;  %v10596_v62 = vcombine.low %v5101_v24, %v5108_v13  ;;  %v3019_v3 = vrot.slane %v2647_v14, %v10416_v30  ;;  %v3023_v31 = vrot.slane %v2647_v14, %v10419_v61 }
 0x397   : > { %v2356_v43 = vadd.f32 %v10571_v37, %v2355_v36  ;;  %v5142_v46 = vcombine.low %v5120_v25, %v5127_v54  ;;  %v5159_v57 = vcombine.low %v2995_v17, %v2999_v2  ;;  %v5160_v42 = vcombine.low %v3003_v59, %v3007_v39 }
 0x398   : > { %v5161_v23 = vcombine.low %v3011_v49, %v3015_v11  ;;  %v5162_v26 = vcombine.low %v3019_v3, %v3023_v31  ;;  %v3027_v8 = vrot.slane %v10543_v20, %v10396_v63  ;;  %v3031_v51 = vrot.slane %v10543_v20, %v10399_v18  ;;  %v2537_v54 = vpop.xlane.xlu0 %2536 }
 0x399   : > { %v10607_v22 = vadd.f32 %v10393_v6, %v2535_v35  ;;  %v5143_v28 = vcombine.low %v5134_v16, %v5141_v27  ;;  %v10610_v14 = vsub.s32 %v8148_v10, %v10389_v4  ;;  %v5169_v60 = vrot.slane %v5159_v57, %v10423_v34 }
 0x39a   : > { %7956 = vperm.xlu0 %9040, %v10485_v55   ;;  %v3035_v55 = vrot.slane %v10543_v20, %v10402_v40  ;;  %v3039_v44 = vrot.slane %v10543_v20, %v10405_v33  ;;  %v3043_v32 = vrot.slane %v10543_v20, %v10409_v58  ;;  %v3047_v21 = vrot.slane %v10543_v20, %v10412_v38 }
 0x39b   : > { %12595 = vst [vmem:[#allocation10_spill] sm:$0xff] %v10610_v14  ;;  %v5176_v24 = vrot.slane %v5160_v42, %v10423_v34  ;;  %v3051_v50 = vrot.slane %v10543_v20, %v10416_v30  ;;  %v3055_v45 = vrot.slane %v10543_v20, %v10419_v61  ;;  %v5208_v29 = vcombine.low %v3027_v8, %v3031_v51 }
 0x39c   : > { %v5183_v36 = vrot.slane %v5161_v23, %v10423_v34  ;;  %v5190_v13 = vrot.slane %v5162_v26, %v10423_v34  ;;  %v5209_v25 = vcombine.low %v3035_v55, %v3039_v44  ;;  %v5210_v15 = vcombine.low %v3043_v32, %v3047_v21 }
 0x39d   : > { %v2434_v17 = vmax.f32 %v2356_v43, 0.0  ;;  %v5150_v2 = vrot.slane %v5142_v46, %v10423_v34  ;;  %v5211_v59 = vcombine.low %v3051_v50, %v3055_v45  ;;  %v5218_v39 = vrot.slane %v5208_v29, %v10423_v34 }
 0x39e   : > { %v5157_v49 = vrot.slane %v5143_v28, %v10423_v34  ;;  %v5225_v16 = vrot.slane %v5209_v25, %v10423_v34  ;;  %v5232_v20 = vrot.slane %v5210_v15, %v10423_v34  ;;  %v3091_v27 = vrot.slane %v10551_v56, %v10396_v63  ;;  %v2539_v10 = vpop.xlane.xlu1 %2538 }
 0x39f   : > { %v5239_v11 = vrot.slane %v5211_v59, %v10423_v34  ;;  %v3095_v35 = vrot.slane %v10551_v56, %v10399_v18  ;;  %v3099_v3 = vrot.slane %v10551_v56, %v10402_v40  ;;  %v3103_v31 = vrot.slane %v10551_v56, %v10405_v33 }
 0x3a0   : > { %v5191_v46 = vcombine.low %v5169_v60, %v5176_v24  ;;  %v5192_v57 = vcombine.low %v5183_v36, %v5190_v13  ;;  %v3107_v42 = vrot.slane %v10551_v56, %v10409_v58  ;;  %v3111_v23 = vrot.slane %v10551_v56, %v10412_v38  ;;  %v2541_v26 = vpop.xlane.xlu0 %2540 }
 0x3a1   : > { %v5240_v28 = vcombine.low %v5218_v39, %v5225_v16  ;;  %v3115_v55 = vrot.slane %v10551_v56, %v10416_v30  ;;  %v3119_v44 = vrot.slane %v10551_v56, %v10419_v61  ;;  %v5241_v60 = vcombine.low %v5232_v20, %v5239_v11 }
 0x3a2   : > { %v5306_v21 = vcombine.low %v3091_v27, %v3095_v35  ;;  %v5307_v24 = vcombine.low %v3099_v3, %v3103_v31  ;;  %v5308_v50 = vcombine.low %v3107_v42, %v3111_v23  ;;  %v10652_v45 = vadd.f32 %v10393_v6, %v2537_v54 }
 0x3a3   : > { %v2360_v43 = vpop.f32.mrb[120].mxu1  ;;  %v10655_v29 = vmul.f32 %v10559_v47, %v2433_v48  ;;  %v10658_v36 = vmul.f32 %v10559_v47, %v2434_v17  ;;  %v5309_v15 = vcombine.low %v3115_v55, %v3119_v44  ;;  %v10661_v59 = vadd.f32 %v10393_v6, %v2539_v10 }
 0x3a4   : > { %v2361_v8 = vadd.f32 %v10571_v37, %v2360_v43  ;;  %v2362_v51 = vpop.f32.mrb[121].mxu1  ;;  %v10664_v39 = vcombine.low %v5150_v2, %v5157_v49  ;;  %v5199_v16 = vrot.slane %v5191_v46, %v10423_v34  ;;  %v5316_v20 = vrot.slane %v5306_v21, %v10423_v34 }
 0x3a5   : > { %v2363_v32 = vpop.f32.mrb[122].mxu1  ;;  %v5323_v48 = vrot.slane %v5307_v24, %v10423_v34  ;;  %v5330_v17 = vrot.slane %v5308_v50, %v10423_v34  ;;  %v5337_v27 = vrot.slane %v5309_v15, %v10423_v34  ;;  %v5206_v35 = vrot.slane %v5192_v57, %v10423_v34 }
 0x3a6   : > { %v2543_v13 = vpop.xlane.xlu1 %2542  ;;  %v2365_v25 = vpop.f32.mrb[123].mxu1  ;;  %v2364_v56 = vadd.f32 %v10571_v37, %v2363_v32  ;;  %v2435_v11 = vmax.f32 %v2361_v8, 0.0  ;;  %v5248_v10 = vrot.slane %v5240_v28, %v10423_v34  ;;  %v5255_v3 = vrot.slane %v5241_v60, %v10423_v34 }
 0x3a7   : > { %v3155_v49 = vrot.slane %v10607_v22, %v10396_v63  ;;  %v3159_v31 = vrot.slane %v10607_v22, %v10399_v18  ;;  %v3163_v43 = vrot.slane %v10607_v22, %v10402_v40  ;;  %v3167_v46 = vrot.slane %v10607_v22, %v10405_v33 }
 0x3a8   : > { %v2545_v54 = vpop.xlane.xlu0 %2544  ;;  %v10683_v42 = vadd.f32 %v10393_v6, %v2541_v26  ;;  %v2436_v57 = vmax.f32 %v2364_v56, 0.0  ;;  %v3171_v8 = vrot.slane %v10607_v22, %v10409_v58  ;;  %v3175_v51 = vrot.slane %v10607_v22, %v10412_v38 }
 0x3a9   : > { %v5338_v44 = vcombine.low %v5316_v20, %v5323_v48  ;;  %v5339_v32 = vcombine.low %v5330_v17, %v5337_v27  ;;  %v3179_v60 = vrot.slane %v10607_v22, %v10416_v30  ;;  %v3183_v21 = vrot.slane %v10607_v22, %v10419_v61 }
 0x3aa   : > { %v2575_v2 = vpop.xlane.xlu1 %2574  ;;  %v10694_v26 = vadd.f32 %v10393_v6, %v2543_v13  ;;  %v10697_v24 = vmul.f32 %v10559_v47, %v2435_v11  ;;  %v10700_v15 = vcombine.low %v5199_v16, %v5206_v35  ;;  %v10703_v56 = vadd.f32 %v10393_v6, %v2545_v54 }
 0x3ab   : > { %v2368_v23 = vpop.f32.mrb[124].mxu1  ;;  %v10705_v17 = vcombine.low %v5248_v10, %v5255_v3  ;;  %v5404_v27 = vcombine.low %v3155_v49, %v3159_v31  ;;  %v5405_v22 = vcombine.low %v3163_v43, %v3167_v46  ;;  %v10708_v13 = vadd.f32 %v10393_v6, %v2575_v2 }
 0x3ac   : > { %v2577_v28 = vpop.xlane.xlu0 %2576  ;;  %v2370_v55 = vpop.f32.mrb[125].mxu1  ;;  %v2369_v50 = vadd.f32 %v10571_v37, %v2368_v23  ;;  %12596 = vst [vmem:[#allocation11_spill] sm:$0xff] %v10700_v15  ;;  %v10711_v11 = vmul.f32 %v10559_v47, %v2436_v57  ;;  %v5407_v23 = vcombine.low %v3179_v60, %v3183_v21  ;;  %v5346_v54 = vrot.slane %v5338_v44, %v10423_v34 }
 0x3ad   : > { %v2371_v25 = vpop.f32.mrb[126].mxu1  ;;  %12597 = vst [vmem:[#allocation12_spill] sm:$0xff] %v10705_v17  ;;  %v5406_v55 = vcombine.low %v3171_v8, %v3175_v51  ;;  %v5353_v35 = vrot.slane %v5339_v32, %v10423_v34  ;;  %v3219_v10 = vrot.slane %v10661_v59, %v10396_v63  ;;  %v10719_v3 = vadd.f32 %v10393_v6, %v2577_v28 }
 0x3ae   : > { %v2547_v20 = vpop.xlane.xlu1 %2546  ;;  %v2373_v48 = vpop.f32.mrb[127].mxu1  ;;  %v2372_v16 = vadd.f32 %v10571_v37, %v2371_v25  ;;  %v2437_v2 = vmax.f32 %v2369_v50, 0.0  ;;  %v3223_v49 = vrot.slane %v10661_v59, %v10399_v18  ;;  %v3227_v31 = vrot.slane %v10661_v59, %v10402_v40 }
 0x3af   : > { %v5414_v37 = vrot.slane %v5404_v27, %v10423_v34  ;;  %v5421_v46 = vrot.slane %v5405_v22, %v10423_v34  ;;  %v3231_v57 = vrot.slane %v10661_v59, %v10405_v33  ;;  %v3235_v8 = vrot.slane %v10661_v59, %v10409_v58 }
 0x3b0   : > { %v2549_v5 = vpop.xlane.xlu0 %2548  ;;  %v5428_v51 = vrot.slane %v5406_v55, %v10423_v34  ;;  %v5435_v28 = vrot.slane %v5407_v23, %v10423_v34  ;;  %v3239_v44 = vrot.slane %v10661_v59, %v10412_v38  ;;  %v3243_v32 = vrot.slane %v10661_v59, %v10416_v30 }
 0x3b1   : > { %v2438_v21 = vmax.f32 %v2372_v16, 0.0  ;;  %v10737_v50 = vcombine.low %v5346_v54, %v5353_v35  ;;  %v3247_v25 = vrot.slane %v10661_v59, %v10419_v61  ;;  %v5502_v48 = vcombine.low %v3219_v10, %v3223_v49 }
 0x3b2   : > { %v2579_v43 = vpop.xlane.xlu1 %2578  ;;  %v10742_v27 = vadd.f32 %v10393_v6, %v2547_v20  ;;  %v5503_v22 = vcombine.low %v3227_v31, %v3231_v57  ;;  %v3283_v55 = vrot.slane %v10694_v26, %v10396_v63  ;;  %v3287_v23 = vrot.slane %v10694_v26, %v10399_v18 }
 0x3b3   : > { %12598 = vst [vmem:[#allocation13_spill] sm:$0xff] %v10737_v50  ;;  %v10749_v17 = vadd.f32 %v10393_v6, %v2549_v5  ;;  %v10752_v54 = vmul.f32 %v10559_v47, %v2437_v2  ;;  %v5504_v35 = vcombine.low %v3235_v8, %v3239_v44  ;;  %v5505_v59 = vcombine.low %v3243_v32, %v3247_v25 }
 0x3b4   : > { %v2581_v60 = vpop.xlane.xlu0 %2580  ;;  %v5436_v20 = vcombine.low %v5414_v37, %v5421_v46  ;;  %v5437_v10 = vcombine.low %v5428_v51, %v5435_v28  ;;  %v3291_v49 = vrot.slane %v10694_v26, %v10402_v40  ;;  %v3295_v31 = vrot.slane %v10694_v26, %v10405_v33 }
 0x3b5   : > { %12599 = vst [vmem:[#allocation14_spill] sm:$0xff] %v10749_v17  ;;  %12600 = vst [vmem:[#allocation15_spill] sm:$0xff] %v10752_v54  ;;  %v10760_v5 = vmul.f32 %v10559_v47, %v2438_v21  ;;  %v5512_v50 = vrot.slane %v5502_v48, %v10423_v34  ;;  %v3299_v2 = vrot.slane %v10694_v26, %v10409_v58 }
 0x3b6   : > { %v2551_v16 = vpop.xlane.xlu1 %2550  ;;  %v5519_v37 = vrot.slane %v5503_v22, %v10423_v34  ;;  %v3307_v46 = vrot.slane %v10694_v26, %v10416_v30  ;;  %v3311_v8 = vrot.slane %v10694_v26, %v10419_v61  ;;  %v5600_v47 = vcombine.low %v3283_v55, %v3287_v23 }
 0x3b7   : > { %2622 = vadd.xlane.f32.xlu1 %v10562_v53  ;;  %v3303_v53 = vrot.slane %v10694_v26, %v10412_v38  ;;  %v5526_v28 = vrot.slane %v5504_v35, %v10423_v34  ;;  %v5533_v44 = vrot.slane %v5505_v59, %v10423_v34  ;;  %v5601_v32 = vcombine.low %v3291_v49, %v3295_v31 }
 0x3b8   : > { %v2553_v57 = vpop.xlane.xlu0 %2552  ;;  %v10776_v25 = vadd.f32 %v10393_v6, %v2579_v43  ;;  %v5451_v48 = vrot.slane %v5437_v10, %v10423_v34  ;;  %v5603_v22 = vcombine.low %v3307_v46, %v3311_v8  ;;  %v5610_v15 = vrot.slane %v5600_v47, %v10423_v34 }
 0x3b9   : > { %2624 = vadd.xlane.f32.xlu0 %v10583_v12  ;;  %v5602_v21 = vcombine.low %v3299_v2, %v3303_v53  ;;  %v5444_v12 = vrot.slane %v5436_v20, %v10423_v34  ;;  %v5617_v26 = vrot.slane %v5601_v32, %v10423_v34  ;;  %v3795_v55 = vrot.slane %v10708_v13, %v10396_v63 }
 0x3ba   : > { %v2583_v51 = vpop.xlane.xlu1 %2582  ;;  %v3799_v23 = vrot.slane %v10708_v13, %v10399_v18  ;;  %v5631_v35 = vrot.slane %v5603_v22, %v10423_v34  ;;  %v3803_v59 = vrot.slane %v10708_v13, %v10402_v40  ;;  %v3807_v20 = vrot.slane %v10708_v13, %v10405_v33 }
 0x3bb   : > { %v5624_v43 = vrot.slane %v5602_v21, %v10423_v34  ;;  %v5534_v49 = vcombine.low %v5512_v50, %v5519_v37  ;;  %v5535_v31 = vcombine.low %v5526_v28, %v5533_v44  ;;  %v3811_v2 = vrot.slane %v10708_v13, %v10409_v58 }
 0x3bc   : > { %v2585_v54 = vpop.xlane.xlu0 %2584  ;;  %v3815_v53 = vrot.slane %v10708_v13, %v10412_v38  ;;  %v10800_v46 = vcombine.low %v5444_v12, %v5451_v48  ;;  %v3819_v8 = vrot.slane %v10708_v13, %v10416_v30  ;;  %v3823_v47 = vrot.slane %v10708_v13, %v10419_v61 }
 0x3bd   : > { %2628 = vadd.xlane.f32.xlu0 %v10658_v36  ;;  %v10798_v36 = vadd.f32 %v10393_v6, %v2581_v60  ;;  %v10807_v50 = vadd.f32 %v10393_v6, %v2551_v16  ;;  %v6384_v28 = vcombine.low %v3795_v55, %v3799_v23  ;;  %v6385_v44 = vcombine.low %v3803_v59, %v3807_v20 }
 0x3be   : > { %v2555_v10 = vpop.xlane.xlu1 %2554  ;;  %12602 = vst [vmem:[#allocation17_spill] sm:$0xff] %v10800_v46  ;;  %v6386_v32 = vcombine.low %v3811_v2, %v3815_v53  ;;  %v10810_v21 = vadd.f32 %v10393_v6, %v2553_v57  ;;  %v5632_v60 = vcombine.low %v5610_v15, %v5617_v26  ;;  %v5633_v22 = vcombine.low %v5624_v43, %v5631_v35 }
 0x3bf   : > { %12601 = vst [vmem:[#allocation16_spill] sm:$0xff] %v10798_v36  ;;  %v6387_v12 = vcombine.low %v3819_v8, %v3823_v47  ;;  %v5542_v46 = vrot.slane %v5534_v49, %v10423_v34  ;;  %v5549_v36 = vrot.slane %v5535_v31, %v10423_v34  ;;  %v3347_v13 = vrot.slane %v10742_v27, %v10396_v63 }
 0x3c0   : > { %v2557_v37 = vpop.xlane.xlu0 %2556  ;;  %12603 = vst [vmem:[#allocation18_spill] sm:$0xff] %v10810_v21  ;;  %v3351_v16 = vrot.slane %v10742_v27, %v10399_v18  ;;  %v6394_v55 = vrot.slane %v6384_v28, %v10423_v34  ;;  %v6401_v23 = vrot.slane %v6385_v44, %v10423_v34  ;;  %v6408_v57 = vrot.slane %v6386_v32, %v10423_v34 }
 0x3c1   : > { %v3355_v15 = vrot.slane %v10742_v27, %v10402_v40  ;;  %v6415_v43 = vrot.slane %v6387_v12, %v10423_v34  ;;  %v3359_v35 = vrot.slane %v10742_v27, %v10405_v33  ;;  %v3363_v59 = vrot.slane %v10742_v27, %v10409_v58 }
 0x3c2   : > { %v2587_v48 = vpop.xlane.xlu1 %2586  ;;  %v3367_v20 = vrot.slane %v10742_v27, %v10412_v38  ;;  %v5640_v49 = vrot.slane %v5632_v60, %v10423_v34  ;;  %v5647_v31 = vrot.slane %v5633_v22, %v10423_v34  ;;  %v3371_v2 = vrot.slane %v10742_v27, %v10416_v30 }
 0x3c3   : > { %v3375_v53 = vrot.slane %v10742_v27, %v10419_v61  ;;  %v10837_v8 = vadd.f32 %v10393_v6, %v2583_v51  ;;  %v5698_v28 = vcombine.low %v3347_v13, %v3351_v16  ;;  %v5699_v44 = vcombine.low %v3355_v15, %v3359_v35 }
 0x3c4   : > { %v2589_v26 = vpop.xlane.xlu0 %2588  ;;  %v5700_v32 = vcombine.low %v3363_v59, %v3367_v20  ;;  %v10840_v12 = vadd.f32 %v10393_v6, %v2585_v54  ;;  %v10843_v60 = vadd.f32 %v10393_v6, %v2555_v10  ;;  %v10845_v22 = vcombine.low %v5542_v46, %v5549_v36 }
 0x3c5   : > { %v6416_v21 = vcombine.low %v6394_v55, %v6401_v23  ;;  %v10848_v17 = vadd.f32 %v10393_v6, %v2557_v37  ;;  %v10851_v27 = vadd.f32 %v10393_v6, %v2587_v48  ;;  %v6417_v13 = vcombine.low %v6408_v57, %v6415_v43 }
 0x3c6   : > { %v2559_v47 = vpop.xlane.xlu1 %2558  ;;  %12604 = vst [vmem:[#allocation19_spill] sm:$0xff] %v10840_v12  ;;  %12605 = vst [vmem:[#allocation20_spill] sm:$0xff] %v10845_v22  ;;  %v5701_v16 = vcombine.low %v3371_v2, %v3375_v53  ;;  %v10854_v15 = vcombine.low %v5640_v49, %v5647_v31  ;;  %v5708_v54 = vrot.slane %v5698_v28, %v10423_v34  ;;  %v8155_v57 = vadd.s32 4294967280, %v9435_v9 }
 0x3c7   : > { %12606 = vst [vmem:[#allocation21_spill] sm:$0xff] %v10848_v17  ;;  %v5715_v10 = vrot.slane %v5699_v44, %v10423_v34  ;;  %v5722_v36 = vrot.slane %v5700_v32, %v10423_v34  ;;  %v3859_v48 = vrot.slane %v10776_v25, %v10396_v63  ;;  %v3863_v55 = vrot.slane %v10776_v25, %v10399_v18 }
 0x3c8   : > { %v2561_v51 = vpop.xlane.xlu0 %2560  ;;  %7959 = vperm.xlu1 %9042, %v10538_v0   ;;  %12607 = vst [vmem:[#allocation22_spill] sm:$0xff] %v10854_v15  ;;  %v5729_v37 = vrot.slane %v5701_v16, %v10423_v34  ;;  %v3867_v0 = vrot.slane %v10776_v25, %v10402_v40  ;;  %v10867_v23 = vadd.f32 %v10393_v6, %v2589_v26 }
 0x3c9   : > { %v6424_v43 = vrot.slane %v6416_v21, %v10423_v34  ;;  %v3871_v35 = vrot.slane %v10776_v25, %v10405_v33  ;;  %v10874_v59 = vadd.f32 %v10393_v6, %v2559_v47  ;;  %v6431_v49 = vrot.slane %v6417_v13, %v10423_v34 }
 0x3ca   : > { %v2591_v46 = vpop.xlane.xlu1 %2590  ;;  %12608 = vst [vmem:[#allocation23_spill] sm:$0xff] %v10867_v23  ;;  %v3875_v31 = vrot.slane %v10776_v25, %v10409_v58  ;;  %v3879_v26 = vrot.slane %v10776_v25, %v10412_v38  ;;  %v5730_v2 = vcombine.low %v5708_v54, %v5715_v10  ;;  %v5731_v53 = vcombine.low %v5722_v36, %v5729_v37 }
 0x3cb   : > { %v3883_v21 = vrot.slane %v10776_v25, %v10416_v30  ;;  %v3887_v47 = vrot.slane %v10776_v25, %v10419_v61  ;;  %v10887_v28 = vadd.f32 %v10393_v6, %v2561_v51  ;;  %v6482_v44 = vcombine.low %v3859_v48, %v3863_v55 }
 0x3cc   : > { %v2593_v20 = vpop.xlane.xlu0 %2592  ;;  %7962 = vperm.xlu1 %9042, %v10545_v1   ;;  %v6483_v32 = vcombine.low %v3867_v0, %v3871_v35  ;;  %v6484_v13 = vcombine.low %v3875_v31, %v3879_v26  ;;  %v10890_v16 = vsub.s32 %v8155_v57, %v10389_v4  ;;  %v8162_v23 = vadd.s32 4294967272, %v9435_v9 }
 0x3cd   : > { %12609 = vst [vmem:[#allocation24_spill] sm:$0xff] %v10887_v28  ;;  %v6485_v54 = vcombine.low %v3883_v21, %v3887_v47  ;;  %v3411_v10 = vrot.slane %v10807_v50, %v10396_v63  ;;  %v6492_v37 = vrot.slane %v6482_v44, %v10423_v34  ;;  %v3415_v48 = vrot.slane %v10807_v50, %v10399_v18 }
 0x3ce   : > { %v2563_v1 = vpop.xlane.xlu1 %2562  ;;  %12610 = vst [vmem:[#allocation25_spill] sm:$0xff] %v10890_v16  ;;  %v6499_v25 = vrot.slane %v6483_v32, %v10423_v34  ;;  %v6506_v51 = vrot.slane %v6484_v13, %v10423_v34  ;;  %v10900_v55 = vcombine.low %v6424_v43, %v6431_v49  ;;  %v5738_v0 = vrot.slane %v5730_v2, %v10423_v34 }
 0x3cf   : > { %v5745_v57 = vrot.slane %v5731_v53, %v10423_v34  ;;  %v6513_v35 = vrot.slane %v6485_v54, %v10423_v34  ;;  %v10906_v31 = vadd.f32 %v10393_v6, %v2591_v46  ;;  %v3419_v21 = vrot.slane %v10807_v50, %v10402_v40 }
 0x3d0   : > { %v2565_v36 = vpop.xlane.xlu0 %2564  ;;  %12611 = vst [vmem:[#allocation26_spill] sm:$0xff] %v10900_v55  ;;  %v3423_v47 = vrot.slane %v10807_v50, %v10405_v33  ;;  %v3427_v43 = vrot.slane %v10807_v50, %v10409_v58  ;;  %v10915_v49 = vadd.f32 %v10393_v6, %v2593_v20  ;;  %v10919_v2 = vsub.s32 %v8162_v23, %v10389_v4 }
 0x3d1   : > { %v6514_v46 = vcombine.low %v6492_v37, %v6499_v25  ;;  %v3431_v53 = vrot.slane %v10807_v50, %v10412_v38  ;;  %v6515_v32 = vcombine.low %v6506_v51, %v6513_v35  ;;  %v3435_v13 = vrot.slane %v10807_v50, %v10416_v30 }
 0x3d2   : > { %v2595_v26 = vpop.xlane.xlu1 %2594  ;;  %12612 = vst [vmem:[#allocation27_spill] sm:$0xff] %v10915_v49  ;;  %12613 = vst [vmem:[#allocation28_spill] sm:$0xff] %v10919_v2  ;;  %v3439_v54 = vrot.slane %v10807_v50, %v10419_v61  ;;  %v5796_v28 = vcombine.low %v3411_v10, %v3415_v48  ;;  %v10928_v20 = vadd.f32 %v10393_v6, %v2563_v1  ;;  %v8169_v50 = vadd.s32 4294967264, %v9435_v9 }
 0x3d3   : > { %7965 = vperm.xlu0 %9040, %v10554_v52   ;;  %v10930_v52 = vcombine.low %v5738_v0, %v5745_v57  ;;  %v5797_v23 = vcombine.low %v3419_v21, %v3423_v47  ;;  %v5798_v49 = vcombine.low %v3427_v43, %v3431_v53  ;;  %v3923_v51 = vrot.slane %v10837_v8, %v10396_v63 }
 0x3d4   : > { %v2597_v44 = vpop.xlane.xlu0 %2596  ;;  %v5799_v25 = vcombine.low %v3435_v13, %v3439_v54  ;;  %v5806_v17 = vrot.slane %v5796_v28, %v10423_v34  ;;  %v3927_v35 = vrot.slane %v10837_v8, %v10399_v18  ;;  %v6522_v10 = vrot.slane %v6514_v46, %v10423_v34 }
 0x3d5   : > { %12614 = vst [vmem:[#allocation29_spill] sm:$0xff] %v10930_v52  ;;  %v5813_v1 = vrot.slane %v5797_v23, %v10423_v34  ;;  %v5820_v48 = vrot.slane %v5798_v49, %v10423_v34  ;;  %v6529_v57 = vrot.slane %v6515_v32, %v10423_v34  ;;  %v3931_v28 = vrot.slane %v10837_v8, %v10402_v40 }
 0x3d6   : > { %v2567_v37 = vpop.xlane.xlu1 %2566  ;;  %v5827_v21 = vrot.slane %v5799_v25, %v10423_v34  ;;  %v3935_v47 = vrot.slane %v10837_v8, %v10405_v33  ;;  %v10948_v43 = vadd.f32 %v10393_v6, %v2565_v36  ;;  %v3939_v46 = vrot.slane %v10837_v8, %v10409_v58 }
 0x3d7   : > { %v3943_v49 = vrot.slane %v10837_v8, %v10412_v38  ;;  %v3947_v53 = vrot.slane %v10837_v8, %v10416_v30  ;;  %v5828_v32 = vcombine.low %v5806_v17, %v5813_v1  ;;  %v3951_v54 = vrot.slane %v10837_v8, %v10419_v61 }
 0x3d8   : > { %v2569_v0 = vpop.xlane.xlu0 %2568  ;;  %12615 = vst [vmem:[#allocation30_spill] sm:$0xff] %v10948_v43  ;;  %v5829_v13 = vcombine.low %v5820_v48, %v5827_v21  ;;  %v6580_v23 = vcombine.low %v3923_v51, %v3927_v35  ;;  %v10959_v25 = vadd.f32 %v10393_v6, %v2595_v26  ;;  %v10962_v36 = vadd.f32 %v10393_v6, %v2597_v44 }
 0x3d9   : > { %v10965_v43 = vsub.s32 %v8169_v50, %v10389_v4  ;;  %v6581_v52 = vcombine.low %v3931_v28, %v3935_v47  ;;  %v10968_v55 = vadd.f32 %v10393_v6, %v2567_v37  ;;  %v10971_v17 = vadd.f32 %v10393_v6, %v2569_v0 }
 0x3da   : > { %v2599_v1 = vpop.xlane.xlu1 %2598  ;;  %v10973_v48 = vcombine.low %v6522_v10, %v6529_v57  ;;  %v3475_v8 = vrot.slane %v10843_v60, %v10396_v63  ;;  %v6582_v51 = vcombine.low %v3939_v46, %v3943_v49  ;;  %v6583_v44 = vcombine.low %v3947_v53, %v3951_v54 }
 0x3db   : > { %12616 = vst [vmem:[#allocation31_spill] sm:$0xff] %v10965_v43  ;;  %12617 = vst [vmem:[#allocation32_spill] sm:$0xff] %v10971_v17  ;;  %v3479_v35 = vrot.slane %v10843_v60, %v10399_v18  ;;  %v3483_v50 = vrot.slane %v10843_v60, %v10402_v40  ;;  %v5836_v37 = vrot.slane %v5828_v32, %v10423_v34 }
 0x3dc   : > { %12618 = vst [vmem:[#allocation33_spill] sm:$0xff] %v10973_v48  ;;  %v2601_v26 = vpop.xlane.xlu0 %2600  ;;  %v5843_v0 = vrot.slane %v5829_v13, %v10423_v34  ;;  %v6590_v21 = vrot.slane %v6580_v23, %v10423_v34  ;;  %v3487_v10 = vrot.slane %v10843_v60, %v10405_v33  ;;  %v6597_v57 = vrot.slane %v6581_v52, %v10423_v34 }
 0x3dd   : > { %v3491_v28 = vrot.slane %v10843_v60, %v10409_v58  ;;  %v3495_v47 = vrot.slane %v10843_v60, %v10412_v38  ;;  %v3499_v46 = vrot.slane %v10843_v60, %v10416_v30  ;;  %v10994_v49 = vadd.f32 %v10393_v6, %v2599_v1 }
 0x3de   : > { %v10997_v53 = vadd.f32 %v10393_v6, %v2601_v26  ;;  %v3503_v32 = vrot.slane %v10843_v60, %v10419_v61  ;;  %v5894_v13 = vcombine.low %v3475_v8, %v3479_v35  ;;  %v6604_v52 = vrot.slane %v6582_v51, %v10423_v34  ;;  %v2571_v48 = vpop.xlane.xlu1 %2570 }
 0x3df   : > { %v6611_v54 = vrot.slane %v6583_v44, %v10423_v34  ;;  %v5895_v23 = vcombine.low %v3483_v50, %v3487_v10  ;;  %v5896_v17 = vcombine.low %v3491_v28, %v3495_v47  ;;  %v3987_v1 = vrot.slane %v10851_v27, %v10396_v63 }
 0x3e0   : > { %v5897_v43 = vcombine.low %v3499_v46, %v3503_v32  ;;  %v5904_v15 = vrot.slane %v5894_v13, %v10423_v34  ;;  %v3991_v26 = vrot.slane %v10851_v27, %v10399_v18  ;;  %v11008_v2 = vcombine.low %v5836_v37, %v5843_v0 }
 0x3e1   : > { %v6612_v60 = vcombine.low %v6590_v21, %v6597_v57  ;;  %v5911_v8 = vrot.slane %v5895_v23, %v10423_v34  ;;  %v3995_v51 = vrot.slane %v10851_v27, %v10402_v40  ;;  %v5918_v44 = vrot.slane %v5896_v17, %v10423_v34 }
 0x3e2   : > { %12619 = vst [vmem:[#allocation34_spill] sm:$0xff] %v11008_v2  ;;  %v5925_v35 = vrot.slane %v5897_v43, %v10423_v34  ;;  %v3999_v50 = vrot.slane %v10851_v27, %v10405_v33  ;;  %v4003_v10 = vrot.slane %v10851_v27, %v10409_v58  ;;  %v11020_v28 = vadd.f32 %v10393_v6, %v2571_v48 }
 0x3e3   : > { %v6613_v37 = vcombine.low %v6604_v52, %v6611_v54  ;;  %v4007_v0 = vrot.slane %v10851_v27, %v10412_v38  ;;  %v4011_v21 = vrot.slane %v10851_v27, %v10416_v30  ;;  %v5926_v57 = vcombine.low %v5904_v15, %v5911_v8  ;;  %v2573_v8 = vpop.xlane.xlu0 %2572 }
 0x3e4   : > { %v4015_v43 = vrot.slane %v10851_v27, %v10419_v61  ;;  %v6678_v17 = vcombine.low %v3987_v1, %v3991_v26  ;;  %v6679_v47 = vcombine.low %v3995_v51, %v3999_v50  ;;  %v6620_v46 = vrot.slane %v6612_v60, %v10423_v34 }
 0x3e5   : > { %v6680_v32 = vcombine.low %v4003_v10, %v4007_v0  ;;  %v3059_v48 = vrot.slane %v10548_v7, %v10396_v63  ;;  %v3063_v13 = vrot.slane %v10548_v7, %v10399_v18  ;;  %v5927_v52 = vcombine.low %v5918_v44, %v5925_v35 }
 0x3e6   : > { %v6681_v54 = vcombine.low %v4011_v21, %v4015_v43  ;;  %v6688_v23 = vrot.slane %v6678_v17, %v10423_v34  ;;  %v6695_v15 = vrot.slane %v6679_v47, %v10423_v34  ;;  %v6627_v27 = vrot.slane %v6613_v37, %v10423_v34 }
 0x3e7   : > { %v3067_v1 = vrot.slane %v10548_v7, %v10402_v40  ;;  %v3071_v26 = vrot.slane %v10548_v7, %v10405_v33  ;;  %v3075_v60 = vrot.slane %v10548_v7, %v10409_v58  ;;  %v5934_v51 = vrot.slane %v5926_v57, %v10423_v34 }
 0x3e8   : > { %v6702_v44 = vrot.slane %v6680_v32, %v10423_v34  ;;  %v6709_v35 = vrot.slane %v6681_v54, %v10423_v34  ;;  %v3079_v50 = vrot.slane %v10548_v7, %v10412_v38  ;;  %v3083_v10 = vrot.slane %v10548_v7, %v10416_v30  ;;  %v2603_v32 = vpop.xlane.xlu1 %2602 }
 0x3e9   : > { %v3087_v37 = vrot.slane %v10548_v7, %v10419_v61  ;;  %v5257_v0 = vcombine.low %v3059_v48, %v3063_v13  ;;  %v5258_v21 = vcombine.low %v3067_v1, %v3071_v26  ;;  %v5941_v43 = vrot.slane %v5927_v52, %v10423_v34  ;;  %v2605_v52 = vpop.xlane.xlu0 %2604 }
 0x3ea   : > { %v6710_v17 = vcombine.low %v6688_v23, %v6695_v15  ;;  %v5259_v47 = vcombine.low %v3075_v60, %v3079_v50  ;;  %v3539_v57 = vrot.slane %v10874_v59, %v10396_v63  ;;  %v3543_v22 = vrot.slane %v10874_v59, %v10399_v18 }
 0x3eb   : > { %v5260_v54 = vcombine.low %v3083_v10, %v3087_v37  ;;  %v5267_v2 = vrot.slane %v5257_v0, %v10423_v34  ;;  %v5274_v12 = vrot.slane %v5258_v21, %v10423_v34  ;;  %v6711_v16 = vcombine.low %v6702_v44, %v6709_v35 }
 0x3ec   : > { %v5281_v7 = vrot.slane %v5259_v47, %v10423_v34  ;;  %v3547_v48 = vrot.slane %v10874_v59, %v10402_v40  ;;  %v3551_v13 = vrot.slane %v10874_v59, %v10405_v33  ;;  %v3555_v1 = vrot.slane %v10874_v59, %v10409_v58 }
 0x3ed   : > { %v5288_v23 = vrot.slane %v5260_v54, %v10423_v34  ;;  %v5289_v15 = vcombine.low %v5267_v2, %v5274_v12  ;;  %v3559_v26 = vrot.slane %v10874_v59, %v10412_v38  ;;  %v11069_v60 = vadd.f32 %v10393_v6, %v2573_v8 }
 0x3ee   : > { %v11072_v44 = vadd.f32 %v10393_v6, %v2603_v32  ;;  %v3563_v35 = vrot.slane %v10874_v59, %v10416_v30  ;;  %v3567_v12 = vrot.slane %v10874_v59, %v10419_v61  ;;  %v11079_v2 = vcombine.low %v6620_v46, %v6627_v27 }
 0x3ef   : > { %12620 = vst [vmem:[#allocation35_spill] sm:$0xff] %v11069_v60  ;;  %v5290_v50 = vcombine.low %v5281_v7, %v5288_v23  ;;  %v5992_v10 = vcombine.low %v3539_v57, %v3543_v22  ;;  %v5993_v37 = vcombine.low %v3547_v48, %v3551_v13  ;;  %v11082_v0 = vadd.f32 %v10393_v6, %v2605_v52  ;;  %v2607_v47 = vpop.xlane.xlu1 %2606 }
 0x3f0   : > { %12621 = vst [vmem:[#allocation36_spill] sm:$0xff] %v11072_v44  ;;  %2626 = vadd.xlane.f32.xlu1 %v10655_v29  ;;  %v11085_v8 = vcombine.low %v5934_v51, %v5941_v43  ;;  %v6718_v29 = vrot.slane %v6710_v17, %v10423_v34  ;;  %v3123_v21 = vrot.slane %v10566_v41, %v10396_v63 }
 0x3f1   : > { %12622 = vst [vmem:[#allocation37_spill] sm:$0xff] %v11082_v0  ;;  %v6725_v59 = vrot.slane %v6711_v16, %v10423_v34  ;;  %v5297_v46 = vrot.slane %v5289_v15, %v10423_v34  ;;  %v5994_v27 = vcombine.low %v3555_v1, %v3559_v26  ;;  %v3127_v22 = vrot.slane %v10566_v41, %v10399_v18  ;;  %v2609_v57 = vpop.xlane.xlu0 %2608 }
 0x3f2   : > { %2632 = vadd.xlane.f32.xlu0 %v10711_v11  ;;  %v5304_v32 = vrot.slane %v5290_v50, %v10423_v34  ;;  %v5995_v11 = vcombine.low %v3563_v35, %v3567_v12  ;;  %v3131_v51 = vrot.slane %v10566_v41, %v10402_v40  ;;  %v3135_v43 = vrot.slane %v10566_v41, %v10405_v33 }
 0x3f3   : > { %v6002_v17 = vrot.slane %v5992_v10, %v10423_v34  ;;  %v6009_v16 = vrot.slane %v5993_v37, %v10423_v34  ;;  %v3139_v54 = vrot.slane %v10566_v41, %v10409_v58  ;;  %v3143_v7 = vrot.slane %v10566_v41, %v10412_v38 }
 0x3f4   : > { %v11106_v48 = vadd.f32 %v10393_v6, %v2607_v47  ;;  %v3147_v13 = vrot.slane %v10566_v41, %v10416_v30  ;;  %v3151_v52 = vrot.slane %v10566_v41, %v10419_v61  ;;  %v5355_v23 = vcombine.low %v3123_v21, %v3127_v22 }
 0x3f5   : > { %v11113_v15 = vadd.f32 %v10393_v6, %v2609_v57  ;;  %v11115_v1 = vcombine.low %v6718_v29, %v6725_v59  ;;  %v5356_v26 = vcombine.low %v3131_v51, %v3135_v43  ;;  %v5357_v35 = vcombine.low %v3139_v54, %v3143_v7 }
 0x3f6   : > { %v6016_v12 = vrot.slane %v5994_v27, %v10423_v34  ;;  %v6023_v50 = vrot.slane %v5995_v11, %v10423_v34  ;;  %v5358_v10 = vcombine.low %v3147_v13, %v3151_v52  ;;  %v4051_v37 = vrot.slane %v10906_v31, %v10396_v63 }
 0x3f7   : > { %12623 = vst [vmem:[#allocation38_spill] sm:$0xff] %v11113_v15  ;;  %v11121_v47 = vcombine.low %v5297_v46, %v5304_v32  ;;  %v6024_v60 = vcombine.low %v6002_v17, %v6009_v16  ;;  %v4055_v41 = vrot.slane %v10906_v31, %v10399_v18  ;;  %v4059_v29 = vrot.slane %v10906_v31, %v10402_v40 }
 0x3f8   : > { %v5365_v21 = vrot.slane %v5355_v23, %v10423_v34  ;;  %v5372_v59 = vrot.slane %v5356_v26, %v10423_v34  ;;  %v5379_v27 = vrot.slane %v5357_v35, %v10423_v34  ;;  %v4063_v22 = vrot.slane %v10906_v31, %v10405_v33 }
 0x3f9   : > { %v5386_v57 = vrot.slane %v5358_v10, %v10423_v34  ;;  %v4067_v46 = vrot.slane %v10906_v31, %v10409_v58  ;;  %v4071_v32 = vrot.slane %v10906_v31, %v10412_v38  ;;  %v4075_v11 = vrot.slane %v10906_v31, %v10416_v30 }
 0x3fa   : > { %v6025_v51 = vcombine.low %v6016_v12, %v6023_v50  ;;  %v4079_v43 = vrot.slane %v10906_v31, %v10419_v61  ;;  %v6776_v17 = vcombine.low %v4051_v37, %v4055_v41  ;;  %v6777_v16 = vcombine.low %v4059_v29, %v4063_v22  ;;  %v2611_v50 = vpop.xlane.xlu1 %2610 }
 0x3fb   : > { %v6032_v54 = vrot.slane %v6024_v60, %v10423_v34  ;;  %v6778_v7 = vcombine.low %v4067_v46, %v4071_v32  ;;  %v3187_v13 = vrot.slane %v10652_v45, %v10396_v63  ;;  %v3191_v52 = vrot.slane %v10652_v45, %v10399_v18 }
 0x3fc   : > { %v5387_v23 = vcombine.low %v5365_v21, %v5372_v59  ;;  %v6779_v26 = vcombine.low %v4075_v11, %v4079_v43  ;;  %v6786_v35 = vrot.slane %v6776_v17, %v10423_v34  ;;  %v6793_v12 = vrot.slane %v6777_v16, %v10423_v34 }
 0x3fd   : > { %v5388_v10 = vcombine.low %v5379_v27, %v5386_v57  ;;  %v6800_v31 = vrot.slane %v6778_v7, %v10423_v34  ;;  %v3195_v60 = vrot.slane %v10652_v45, %v10402_v40  ;;  %v3199_v37 = vrot.slane %v10652_v45, %v10405_v33 }
 0x3fe   : > { %v6807_v41 = vrot.slane %v6779_v26, %v10423_v34  ;;  %v6808_v29 = vcombine.low %v6786_v35, %v6793_v12  ;;  %v3203_v21 = vrot.slane %v10652_v45, %v10409_v58  ;;  %v3207_v59 = vrot.slane %v10652_v45, %v10412_v38 }
 0x3ff   : > { %v3211_v27 = vrot.slane %v10652_v45, %v10416_v30  ;;  %v3215_v22 = vrot.slane %v10652_v45, %v10419_v61  ;;  %v5453_v57 = vcombine.low %v3187_v13, %v3191_v52  ;;  %v5454_v46 = vcombine.low %v3195_v60, %v3199_v37  ;;  %v2613_v13 = vpop.xlane.xlu0 %2612 }
 0x400   : > { %v11164_v32 = vadd.f32 %v10393_v6, %v2611_v50  ;;  %v6039_v11 = vrot.slane %v6025_v51, %v10423_v34  ;;  %v6809_v43 = vcombine.low %v6800_v31, %v6807_v41  ;;  %v3603_v17 = vrot.slane %v10928_v20, %v10396_v63 }
 0x401   : > { %7968 = vperm.xlu1 %9042, %v10596_v62   ;;  %v5395_v16 = vrot.slane %v5387_v23, %v10423_v34  ;;  %v5402_v62 = vrot.slane %v5388_v10, %v10423_v34  ;;  %v6816_v7 = vrot.slane %v6808_v29, %v10423_v34  ;;  %v3607_v45 = vrot.slane %v10928_v20, %v10399_v18 }
 0x402   : > { %v5455_v52 = vcombine.low %v3203_v21, %v3207_v59  ;;  %v5456_v26 = vcombine.low %v3211_v27, %v3215_v22  ;;  %v3611_v35 = vrot.slane %v10928_v20, %v10402_v40  ;;  %v3615_v51 = vrot.slane %v10928_v20, %v10405_v33 }
 0x403   : > { %v5463_v12 = vrot.slane %v5453_v57, %v10423_v34  ;;  %v5470_v23 = vrot.slane %v5454_v46, %v10423_v34  ;;  %v3619_v50 = vrot.slane %v10928_v20, %v10409_v58  ;;  %v3623_v10 = vrot.slane %v10928_v20, %v10412_v38 }
 0x404   : > { %v6823_v31 = vrot.slane %v6809_v43, %v10423_v34  ;;  %v3627_v60 = vrot.slane %v10928_v20, %v10416_v30  ;;  %v3631_v37 = vrot.slane %v10928_v20, %v10419_v61  ;;  %v6090_v41 = vcombine.low %v3603_v17, %v3607_v45 }
 0x405   : > { %v11190_v29 = vadd.f32 %v10393_v6, %v2613_v13  ;;  %v11192_v21 = vcombine.low %v6032_v54, %v6039_v11  ;;  %v6091_v59 = vcombine.low %v3611_v35, %v3615_v51  ;;  %v6092_v27 = vcombine.low %v3619_v50, %v3623_v10 }
 0x406   : > { %v5477_v22 = vrot.slane %v5455_v52, %v10423_v34  ;;  %v5484_v57 = vrot.slane %v5456_v26, %v10423_v34  ;;  %v6093_v46 = vcombine.low %v3627_v60, %v3631_v37  ;;  %v3251_v43 = vrot.slane %v10683_v42, %v10396_v63 }
 0x407   : > { %12624 = vst [vmem:[#allocation39_spill] sm:$0xff] %v11190_v29  ;;  %v11199_v15 = vcombine.low %v5463_v12, %v5470_v23  ;;  %v6100_v20 = vrot.slane %v6090_v41, %v10423_v34  ;;  %v6107_v17 = vrot.slane %v6091_v59, %v10423_v34  ;;  %v3255_v54 = vrot.slane %v10683_v42, %v10399_v18  ;;  %v2615_v52 = vpop.xlane.xlu1 %2614 }
 0x408   : > { %7971 = vperm.xlu0 %9040, %v10664_v39   ;;  %v11205_v11 = vcombine.low %v5395_v16, %v5402_v62  ;;  %v11207_v39 = vcombine.low %v6816_v7, %v6823_v31  ;;  %v3259_v45 = vrot.slane %v10683_v42, %v10402_v40  ;;  %v3263_v13 = vrot.slane %v10683_v42, %v10405_v33 }
 0x409   : > { %v6114_v26 = vrot.slane %v6092_v27, %v10423_v34  ;;  %v6121_v35 = vrot.slane %v6093_v46, %v10423_v34  ;;  %v3267_v51 = vrot.slane %v10683_v42, %v10409_v58  ;;  %v3271_v16 = vrot.slane %v10683_v42, %v10412_v38 }
 0x40a   : > { %v11219_v62 = vcombine.low %v5477_v22, %v5484_v57  ;;  %v3275_v7 = vrot.slane %v10683_v42, %v10416_v30  ;;  %v3279_v12 = vrot.slane %v10683_v42, %v10419_v61  ;;  %v5551_v23 = vcombine.low %v3251_v43, %v3255_v54  ;;  %v2617_v22 = vpop.xlane.xlu0 %2616 }
 0x40b   : > { %v11227_v10 = vcombine.low %v6100_v20, %v6107_v17  ;;  %v5552_v31 = vcombine.low %v3259_v45, %v3263_v13  ;;  %v5553_v60 = vcombine.low %v3267_v51, %v3271_v16  ;;  %v4115_v59 = vrot.slane %v10959_v25, %v10396_v63 }
 0x40c   : > { %v5554_v37 = vcombine.low %v3275_v7, %v3279_v12  ;;  %v5561_v41 = vrot.slane %v5551_v23, %v10423_v34  ;;  %v4119_v27 = vrot.slane %v10959_v25, %v10399_v18  ;;  %v11236_v42 = vcombine.low %v6114_v26, %v6121_v35 }
 0x40d   : > { %v5568_v46 = vrot.slane %v5552_v31, %v10423_v34  ;;  %v4123_v43 = vrot.slane %v10959_v25, %v10402_v40  ;;  %v4127_v20 = vrot.slane %v10959_v25, %v10405_v33  ;;  %v11244_v17 = vadd.f32 %v10393_v6, %v2615_v52 }
 0x40e   : > { %v5575_v54 = vrot.slane %v5553_v60, %v10423_v34  ;;  %v5582_v45 = vrot.slane %v5554_v37, %v10423_v34  ;;  %v4131_v13 = vrot.slane %v10959_v25, %v10409_v58  ;;  %v4135_v35 = vrot.slane %v10959_v25, %v10412_v38 }
 0x40f   : > { %v11234_v57 = vpop.xlane.xlu1 %2618  ;;  %v4139_v51 = vrot.slane %v10959_v25, %v10416_v30  ;;  %v4143_v52 = vrot.slane %v10959_v25, %v10419_v61  ;;  %v11259_v16 = vadd.f32 %v10393_v6, %v2617_v22  ;;  %v11261_v7 = vcombine.low %v5561_v41, %v5568_v46 }
 0x410   : > { %v6874_v12 = vcombine.low %v4115_v59, %v4119_v27  ;;  %v6875_v23 = vcombine.low %v4123_v43, %v4127_v20  ;;  %v6876_v50 = vcombine.low %v4131_v13, %v4135_v35  ;;  %v11267_v29 = vcombine.low %v5575_v54, %v5582_v45 }
 0x411   : > { %12625 = vst [vmem:[#allocation40_spill] sm:$0xff] %v11259_v16  ;;  %v6877_v26 = vcombine.low %v4139_v51, %v4143_v52  ;;  %v3315_v41 = vrot.slane %v10703_v56, %v10396_v63  ;;  %v2621_v59 = vpop.xlane.xlu0 %2620  ;;  %v3319_v43 = vrot.slane %v10703_v56, %v10399_v18  ;;  %v3323_v20 = vrot.slane %v10703_v56, %v10402_v40 }
 0x412   : > { %v6884_v25 = vrot.slane %v6874_v12, %v10423_v34  ;;  %v6891_v22 = vrot.slane %v6875_v23, %v10423_v34  ;;  %v6898_v27 = vrot.slane %v6876_v50, %v10423_v34  ;;  %v5591_v45 = vrot.slane %v11261_v7, %v10423_v34 }
 0x413   : > { %v7954_v31 = vpop.permute.xlu1 %7953  ;;  %v6905_v46 = vrot.slane %v6877_v26, %v10423_v34  ;;  %v3327_v13 = vrot.slane %v10703_v56, %v10405_v33  ;;  %v3331_v35 = vrot.slane %v10703_v56, %v10409_v58  ;;  %v3335_v26 = vrot.slane %v10703_v56, %v10412_v38 }
 0x414   : > { %v8147_v54 = vrot.slane %v7954_v31, %v10587_v19  ;;  %v6906_v50 = vcombine.low %v6884_v25, %v6891_v22  ;;  %v3339_v51 = vrot.slane %v10703_v56, %v10416_v30  ;;  %v3343_v52 = vrot.slane %v10703_v56, %v10419_v61 }
 0x415   : > { %v5598_v12 = vrot.slane %v11267_v29, %v10423_v34  ;;  %v6907_v7 = vcombine.low %v6898_v27, %v6905_v46  ;;  %v5649_v23 = vcombine.low %v3315_v41, %v3319_v43  ;;  %v5650_v31 = vcombine.low %v3323_v20, %v3327_v13 }
 0x416   : > { %v5651_v37 = vcombine.low %v3331_v35, %v3335_v26  ;;  %v5652_v19 = vcombine.low %v3339_v51, %v3343_v52  ;;  %v4147_v25 = vrot.slane %v10962_v36, %v10396_v63  ;;  %v4151_v22 = vrot.slane %v10962_v36, %v10399_v18 }
 0x417   : > { %v5659_v0 = vrot.slane %v5649_v23, %v10423_v34  ;;  %v5666_v56 = vrot.slane %v5650_v31, %v10423_v34  ;;  %v4155_v29 = vrot.slane %v10962_v36, %v10402_v40  ;;  %v6914_v41 = vrot.slane %v6906_v50, %v10423_v34 }
 0x418   : > { %v5673_v27 = vrot.slane %v5651_v37, %v10423_v34  ;;  %v5680_v46 = vrot.slane %v5652_v19, %v10423_v34  ;;  %v4159_v43 = vrot.slane %v10962_v36, %v10405_v33  ;;  %v4163_v13 = vrot.slane %v10962_v36, %v10409_v58 }
 0x419   : > { %v7957_v60 = vpop.permute.xlu0 %7956  ;;  %v4167_v35 = vrot.slane %v10962_v36, %v10412_v38  ;;  %v4171_v50 = vrot.slane %v10962_v36, %v10416_v30  ;;  %v4175_v19 = vrot.slane %v10962_v36, %v10419_v61  ;;  %v6923_v37 = vcombine.low %v4147_v25, %v4151_v22 }
 0x41a   : > { %v8152_v16 = vrot.slane %v7957_v60, %v10610_v14  ;;  %v5681_v60 = vcombine.low %v5659_v0, %v5666_v56  ;;  %v5682_v26 = vcombine.low %v5673_v27, %v5680_v46  ;;  %v6921_v51 = vrot.slane %v6907_v7, %v10423_v34 }
 0x41b   : > { %v6925_v0 = vcombine.low %v4163_v13, %v4167_v35  ;;  %v6926_v52 = vcombine.low %v4171_v50, %v4175_v19  ;;  %v6933_v23 = vrot.slane %v6923_v37, %v10423_v34  ;;  %v3827_v31 = vrot.slane %v10719_v3, %v10396_v63 }
 0x41c   : > { %v11309_v20 = vsel %vm8153_vm2, %v8152_v16, %v8147_v54  ;;  %v5689_v16 = vrot.slane %v5681_v60, %v10423_v34  ;;  %v6924_v54 = vcombine.low %v4155_v29, %v4159_v43  ;;  %v3831_v56 = vrot.slane %v10719_v3, %v10399_v18 }
 0x41d   : > { %v6947_v36 = vrot.slane %v6925_v0, %v10423_v34  ;;  %v3835_v7 = vrot.slane %v10719_v3, %v10402_v40  ;;  %v3839_v25 = vrot.slane %v10719_v3, %v10405_v33  ;;  %v5696_v22 = vrot.slane %v5682_v26, %v10423_v34 }
 0x41e   : > { %v6940_v27 = vrot.slane %v6924_v54, %v10423_v34  ;;  %v6954_v29 = vrot.slane %v6926_v52, %v10423_v34  ;;  %v3843_v46 = vrot.slane %v10719_v3, %v10409_v58  ;;  %v3847_v43 = vrot.slane %v10719_v3, %v10412_v38 }
 0x41f   : > { %v12626_v60 = vrot.slane %v11219_v62, %v10423_v34  ;;  %v12627_v13 = vrot.slane %v11199_v15, %v10423_v34  ;;  %v3851_v26 = vrot.slane %v10719_v3, %v10416_v30  ;;  %v3855_v19 = vrot.slane %v10719_v3, %v10419_v61 }
 0x420   : > { %v11346_v50 = vcombine.low %v6933_v23, %v6940_v27  ;;  %v11354_v37 = vadd.f32 %v10393_v6, %v11234_v57  ;;  %v12628_v62 = vrot.slane %v11236_v42, %v10423_v34  ;;  %v12629_v15 = vrot.slane %v11227_v10, %v10423_v34 }
 0x421   : > { %v11344_v35 = vcombine.low %v12627_v13, %v12626_v60  ;;  %v6956_v0 = vcombine.low %v6947_v36, %v6954_v29  ;;  %v6433_v52 = vcombine.low %v3827_v31, %v3831_v56  ;;  %v11365_v23 = vadd.f32 %v10393_v6, %v2621_v59 }
 0x422   : > { %v11362_v54 = vcombine.low %v12629_v15, %v12628_v62  ;;  %v11367_v27 = vcombine.low %v5591_v45, %v5598_v12  ;;  %v11369_v3 = vcombine.low %v6914_v41, %v6921_v51  ;;  %v6434_v60 = vcombine.low %v3835_v7, %v3839_v25 }
 0x423   : > { %12630 = vst [vmem:[#allocation41_spill] sm:$0xff] %v11365_v23  ;;  %v11372_v57 = vcombine.low %v5689_v16, %v5696_v22  ;;  %v6435_v42 = vcombine.low %v3843_v46, %v3847_v43  ;;  %v6436_v13 = vcombine.low %v3851_v26, %v3855_v19  ;;  %v8176_v10 = vadd.s32 4294967256, %v9435_v9  ;;  %v12631_v26 = vld [vmem:[#allocation14_spill] sm:$0xff] }
 0x424   : > { %v6963_v36 = vrot.slane %v11346_v50, %v10423_v34  ;;  %v3667_v59 = vrot.slane %v10968_v55, %v10396_v63  ;;  %v3671_v45 = vrot.slane %v10968_v55, %v10399_v18  ;;  %v3675_v12 = vrot.slane %v10968_v55, %v10402_v40 }
 0x425   : > { %2630 = vadd.xlane.f32.xlu1 %v10697_v24  ;;  %v6970_v24 = vrot.slane %v6956_v0, %v10423_v34  ;;  %v6443_v41 = vrot.slane %v6433_v52, %v10423_v34  ;;  %v3679_v51 = vrot.slane %v10968_v55, %v10405_v33  ;;  %v3683_v16 = vrot.slane %v10968_v55, %v10409_v58 }
 0x426   : > { %v6450_v31 = vrot.slane %v6434_v60, %v10423_v34  ;;  %v3687_v56 = vrot.slane %v10968_v55, %v10412_v38  ;;  %v3691_v7 = vrot.slane %v10968_v55, %v10416_v30  ;;  %v6457_v25 = vrot.slane %v6435_v42, %v10423_v34 }
 0x427   : > { %2636 = vadd.xlane.f32.xlu0 %v10760_v5  ;;  %v3695_v5 = vrot.slane %v10968_v55, %v10419_v61  ;;  %v6464_v22 = vrot.slane %v6436_v13, %v10423_v34  ;;  %v6188_v29 = vcombine.low %v3667_v59, %v3671_v45  ;;  %v6189_v46 = vcombine.low %v3675_v12, %v3679_v51 }
 0x428   : > { %v6190_v43 = vcombine.low %v3683_v16, %v3687_v56  ;;  %v3379_v19 = vrot.slane %v12631_v26, %v10396_v63  ;;  %v3383_v62 = vrot.slane %v12631_v26, %v10399_v18  ;;  %v3387_v55 = vrot.slane %v12631_v26, %v10402_v40 }
 0x429   : > { %v6191_v50 = vcombine.low %v3691_v7, %v3695_v5  ;;  %v6198_v15 = vrot.slane %v6188_v29, %v10423_v34  ;;  %v6205_v0 = vrot.slane %v6189_v46, %v10423_v34  ;;  %v3391_v52 = vrot.slane %v12631_v26, %v10405_v33 }
 0x42a   : > { %v11410_v60 = vsub.s32 %v8176_v10, %v10389_v4  ;;  %v6212_v42 = vrot.slane %v6190_v43, %v10423_v34  ;;  %v3395_v59 = vrot.slane %v12631_v26, %v10409_v58  ;;  %v11416_v45 = vcombine.low %v6443_v41, %v6450_v31 }
 0x42b   : > { %v6219_v13 = vrot.slane %v6191_v50, %v10423_v34  ;;  %v3399_v12 = vrot.slane %v12631_v26, %v10412_v38  ;;  %v3403_v51 = vrot.slane %v12631_v26, %v10416_v30  ;;  %v3407_v16 = vrot.slane %v12631_v26, %v10419_v61 }
 0x42c   : > { %v11424_v10 = vcombine.low %v6457_v25, %v6464_v22  ;;  %v11426_v56 = vcombine.low %v6198_v15, %v6205_v0  ;;  %v5747_v7 = vcombine.low %v3379_v19, %v3383_v62  ;;  %v5748_v5 = vcombine.low %v3387_v55, %v3391_v52 }
 0x42d   : > { %v5749_v29 = vcombine.low %v3395_v59, %v3399_v12  ;;  %v5750_v46 = vcombine.low %v3403_v51, %v3407_v16  ;;  %v4179_v41 = vrot.slane %v10994_v49, %v10396_v63  ;;  %v4183_v31 = vrot.slane %v10994_v49, %v10399_v18 }
 0x42e   : > { %v11432_v43 = vcombine.low %v6212_v42, %v6219_v13  ;;  %v5757_v50 = vrot.slane %v5747_v7, %v10423_v34  ;;  %v5764_v26 = vrot.slane %v5748_v5, %v10423_v34  ;;  %v4187_v25 = vrot.slane %v10994_v49, %v10402_v40 }
 0x42f   : > { %v5771_v22 = vrot.slane %v5749_v29, %v10423_v34  ;;  %v5778_v19 = vrot.slane %v5750_v46, %v10423_v34  ;;  %v4191_v62 = vrot.slane %v10994_v49, %v10405_v33  ;;  %v4195_v15 = vrot.slane %v10994_v49, %v10409_v58 }
 0x430   : > { %v11444_v0 = vcombine.low %v6963_v36, %v6970_v24  ;;  %v11446_v55 = vcombine.low %v5757_v50, %v5764_v26  ;;  %v4199_v52 = vrot.slane %v10994_v49, %v10412_v38  ;;  %v4203_v42 = vrot.slane %v10994_v49, %v10416_v30  ;;  %v12633_v26 = vld [vmem:[#allocation16_spill] sm:$0xff] }
 0x431   : > { %v4207_v59 = vrot.slane %v10994_v49, %v10419_v61  ;;  %v6972_v12 = vcombine.low %v4179_v41, %v4183_v31  ;;  %v6973_v51 = vcombine.low %v4187_v25, %v4191_v62  ;;  %v11462_v5 = vcombine.low %v5771_v22, %v5778_v19  ;;  %v12632_v49 = vld [vmem:[#allocation11_spill] sm:$0xff] }
 0x432   : > { %v6974_v7 = vcombine.low %v4195_v15, %v4199_v52  ;;  %v3891_v25 = vrot.slane %v12633_v26, %v10396_v63  ;;  %v3895_v62 = vrot.slane %v12633_v26, %v10399_v18  ;;  %v8183_v15 = vadd.s32 4294967248, %v9435_v9 }
 0x433   : > { %v6975_v29 = vcombine.low %v4203_v42, %v4207_v59  ;;  %v6982_v46 = vrot.slane %v6972_v12, %v10423_v34  ;;  %v6989_v50 = vrot.slane %v6973_v51, %v10423_v34  ;;  %v3899_v52 = vrot.slane %v12633_v26, %v10402_v40 }
 0x434   : > { %v6996_v31 = vrot.slane %v6974_v7, %v10423_v34  ;;  %v3903_v42 = vrot.slane %v12633_v26, %v10405_v33  ;;  %v3907_v59 = vrot.slane %v12633_v26, %v10409_v58  ;;  %v3911_v12 = vrot.slane %v12633_v26, %v10412_v38 }
 0x435   : > { %v7003_v22 = vrot.slane %v6975_v29, %v10423_v34  ;;  %v11475_v19 = vcombine.low %v6982_v46, %v6989_v50  ;;  %v3915_v51 = vrot.slane %v12633_v26, %v10416_v30  ;;  %v5794_v7 = vrot.slane %v11462_v5, %v10423_v34 }
 0x436   : > { %7974 = vperm.xlu1 %9042, %v12632_v49   ;;  %v3919_v46 = vrot.slane %v12633_v26, %v10419_v61  ;;  %v6531_v50 = vcombine.low %v3891_v25, %v3895_v62  ;;  %v6532_v49 = vcombine.low %v3899_v52, %v3903_v42  ;;  %v6533_v41 = vcombine.low %v3907_v59, %v3911_v12 }
 0x437   : > { %v7005_v29 = vcombine.low %v6996_v31, %v7003_v22  ;;  %v4211_v24 = vrot.slane %v10997_v53, %v10396_v63  ;;  %v4215_v16 = vrot.slane %v10997_v53, %v10399_v18  ;;  %v7012_v13 = vrot.slane %v11475_v19, %v10423_v34  ;;  %v12634_v22 = vld [vmem:[#allocation12_spill] sm:$0xff] }
 0x438   : > { %v6534_v36 = vcombine.low %v3915_v51, %v3919_v46  ;;  %v6541_v14 = vrot.slane %v6531_v50, %v10423_v34  ;;  %v4219_v5 = vrot.slane %v10997_v53, %v10402_v40  ;;  %v6548_v31 = vrot.slane %v6532_v49, %v10423_v34 }
 0x439   : > { %v6555_v26 = vrot.slane %v6533_v41, %v10423_v34  ;;  %v4223_v25 = vrot.slane %v10997_v53, %v10405_v33  ;;  %v4227_v62 = vrot.slane %v10997_v53, %v10409_v58  ;;  %v7019_v19 = vrot.slane %v7005_v29, %v10423_v34 }
 0x43a   : > { %v6562_v52 = vrot.slane %v6534_v36, %v10423_v34  ;;  %v4231_v42 = vrot.slane %v10997_v53, %v10412_v38  ;;  %v4235_v59 = vrot.slane %v10997_v53, %v10416_v30  ;;  %v6563_v12 = vcombine.low %v6541_v14, %v6548_v31  ;;  %v12636_v31 = vld [vmem:[#allocation13_spill] sm:$0xff] }
 0x43b   : > { %v4239_v41 = vrot.slane %v10997_v53, %v10419_v61  ;;  %v7021_v51 = vcombine.low %v4211_v24, %v4215_v16  ;;  %v7022_v46 = vcombine.low %v4219_v5, %v4223_v25 }
 0x43c   : > { %v6564_v50 = vcombine.low %v6555_v26, %v6562_v52  ;;  %v7023_v49 = vcombine.low %v4227_v62, %v4231_v42  ;;  %v6571_v29 = vrot.slane %v6563_v12, %v10423_v34  ;;  %v12637_v42 = vrot.slane %v11424_v10, %v10423_v34 }
 0x43d   : > { %7977 = vperm.xlu0 %9040, %v12634_v22   ;;  %v12635_v22 = vld [vmem:[#allocation18_spill] sm:$0xff]  ;;  %v7024_v23 = vcombine.low %v4235_v59, %v4239_v41  ;;  %v7031_v44 = vrot.slane %v7021_v51, %v10423_v34  ;;  %v7038_v14 = vrot.slane %v7022_v46, %v10423_v34  ;;  %v12638_v59 = vrot.slane %v11416_v45, %v10423_v34 }
 0x43e   : > { %v3443_v9 = vrot.slane %v12635_v22, %v10396_v63  ;;  %v3447_v36 = vrot.slane %v12635_v22, %v10399_v18  ;;  %v6578_v53 = vrot.slane %v6564_v50, %v10423_v34  ;;  %v7045_v24 = vrot.slane %v7023_v49, %v10423_v34 }
 0x43f   : > { %v3451_v16 = vrot.slane %v12635_v22, %v10402_v40  ;;  %v3455_v5 = vrot.slane %v12635_v22, %v10405_v33  ;;  %v7052_v26 = vrot.slane %v7024_v23, %v10423_v34  ;;  %v7053_v25 = vcombine.low %v7031_v44, %v7038_v14 }
 0x440   : > { %v3459_v62 = vrot.slane %v12635_v22, %v10409_v58  ;;  %v3463_v52 = vrot.slane %v12635_v22, %v10412_v38  ;;  %v11541_v12 = vcombine.low %v12638_v59, %v12637_v42  ;;  %v12639_v41 = vrot.slane %v11432_v43, %v10423_v34  ;;  %v12641_v43 = vld [vmem:[#allocation17_spill] sm:$0xff] }
 0x441   : > { %7983 = vperm.xlu0 %9040, %v12636_v31   ;;  %v12640_v44 = vrot.slane %v11426_v56, %v10423_v34  ;;  %v3467_v51 = vrot.slane %v12635_v22, %v10416_v30  ;;  %v3471_v46 = vrot.slane %v12635_v22, %v10419_v61  ;;  %v11556_v45 = vsub.s32 %v8183_v15, %v10389_v4 }
 0x442   : > { %v7054_v50 = vcombine.low %v7045_v24, %v7052_v26  ;;  %v5845_v49 = vcombine.low %v3443_v9, %v3447_v36  ;;  %v5846_v14 = vcombine.low %v3451_v16, %v3455_v5  ;;  %v12642_v56 = vrot.slane %v11446_v55, %v10423_v34  ;;  %v12643_v26 = vld [vmem:[#allocation25_spill] sm:$0xff] }
 0x443   : > { %v11549_v23 = vcombine.low %v12640_v44, %v12639_v41  ;;  %v11564_v42 = vcombine.low %v7012_v13, %v7019_v19  ;;  %v11566_v59 = vcombine.low %v6571_v29, %v6578_v53  ;;  %v5847_v22 = vcombine.low %v3459_v62, %v3463_v52  ;;  %v12644_v62 = vld [vmem:[#allocation20_spill] sm:$0xff] }
 0x444   : > { %v2623_v10 = vpop.xlane.xlu1 %2622  ;;  %v11562_v31 = vcombine.low %v12642_v56, %v5794_v7  ;;  %v7061_v41 = vrot.slane %v7053_v25, %v10423_v34  ;;  %v5848_v44 = vcombine.low %v3467_v51, %v3471_v46  ;;  %v3731_v15 = vrot.slane %v11020_v28, %v10396_v63 }
 0x445   : > { %7989 = vperm.xlu0 %9040, %v12641_v43   ;;  %v3735_v9 = vrot.slane %v11020_v28, %v10399_v18  ;;  %v11574_v36 = vadd.f32 %v10393_v6, %v2623_v10  ;;  %v7068_v55 = vrot.slane %v7054_v50, %v10423_v34  ;;  %v3739_v13 = vrot.slane %v11020_v28, %v10402_v40 }
 0x446   : > { %v3743_v7 = vrot.slane %v11020_v28, %v10405_v33  ;;  %v2625_v19 = vpop.xlane.xlu0 %2624  ;;  %v5855_v53 = vrot.slane %v5845_v49, %v10423_v34  ;;  %v5862_v24 = vrot.slane %v5846_v14, %v10423_v34  ;;  %v3747_v16 = vrot.slane %v11020_v28, %v10409_v58 }
 0x447   : > { %v3751_v5 = vrot.slane %v11020_v28, %v10412_v38  ;;  %v5869_v52 = vrot.slane %v5847_v22, %v10423_v34  ;;  %v3755_v51 = vrot.slane %v11020_v28, %v10416_v30  ;;  %v3759_v46 = vrot.slane %v11020_v28, %v10419_v61 }
 0x448   : > { %v7960_v29 = vpop.permute.xlu1 %7959  ;;  %v5876_v10 = vrot.slane %v5848_v44, %v10423_v34  ;;  %v6286_v50 = vcombine.low %v3731_v15, %v3735_v9  ;;  %v6287_v49 = vcombine.low %v3739_v13, %v3743_v7  ;;  %v11596_v43 = vadd.f32 %v10393_v6, %v2625_v19  ;;  %v12646_v44 = vld [vmem:[#allocation19_spill] sm:$0xff]  ;;  %v12647_v9 = vld [vmem:[#allocation28_spill] sm:$0xff]  ;;  %v12648_v7 = vld [vmem:[#allocation22_spill] sm:$0xff] }
 0x449   : > { %v8159_v25 = vrot.slane %v7960_v29, %v12643_v26  ;;  %7995 = vperm.xlu0 %9040, %v12644_v62   ;;  %v6288_v14 = vcombine.low %v3747_v16, %v3751_v5  ;;  %v11600_v29 = vcombine.low %v7061_v41, %v7068_v55  ;;  %v6289_v22 = vcombine.low %v3755_v51, %v3759_v46 }
 0x44a   : > { %12645 = vst [vmem:[#allocation14_spill] sm:$0xff] %v11596_v43  ;;  %v11602_v26 = vcombine.low %v5855_v53, %v5862_v24  ;;  %v6296_v28 = vrot.slane %v6286_v50, %v10423_v34  ;;  %v6303_v4 = vrot.slane %v6287_v49, %v10423_v34  ;;  %v3955_v15 = vrot.slane %v12646_v44, %v10396_v63  ;;  %v11614_v55 = vpop.xlane.xlu0 %2628 }
 0x44b   : > { %v8161_v56 = vsel %vm8160_vm9, %v8159_v25, %v11309_v20  ;;  %v6310_v19 = vrot.slane %v6288_v14, %v10423_v34  ;;  %v6317_v20 = vrot.slane %v6289_v22, %v10423_v34  ;;  %v3959_v41 = vrot.slane %v12646_v44, %v10399_v18  ;;  %12649 = vst [vmem:[#allocation11_spill] sm:$0xff] %v11614_v55  ;;  %v12650_v22 = vld [vmem:[#allocation26_spill] sm:$0xff] }
 0x44c   : > { %v7963_v62 = vpop.permute.xlu1 %7962  ;;  %v5878_v53 = vcombine.low %v5869_v52, %v5876_v10  ;;  %v3963_v24 = vrot.slane %v12646_v44, %v10402_v40  ;;  %v3967_v16 = vrot.slane %v12646_v44, %v10405_v33  ;;  %v3971_v5 = vrot.slane %v12646_v44, %v10409_v58 }
 0x44d   : > { %v8166_v13 = vrot.slane %v7963_v62, %v12647_v9  ;;  %8001 = vperm.xlu0 %9040, %v12648_v7   ;;  %v6318_v51 = vcombine.low %v6296_v28, %v6303_v4  ;;  %v3975_v46 = vrot.slane %v12646_v44, %v10412_v38  ;;  %v3979_v50 = vrot.slane %v12646_v44, %v10416_v30 }
 0x44e   : > { %v5885_v52 = vrot.slane %v11602_v26, %v10423_v34  ;;  %v3983_v10 = vrot.slane %v12646_v44, %v10419_v61  ;;  %v6629_v49 = vcombine.low %v3955_v15, %v3959_v41  ;;  %v6630_v14 = vcombine.low %v3963_v24, %v3967_v16  ;;  %v12651_v15 = vld [vmem:[#allocation31_spill] sm:$0xff] }
 0x44f   : > { %v8168_v25 = vsel %vm8167_vm10, %v8166_v13, %v8161_v56  ;;  %v6319_v62 = vcombine.low %v6310_v19, %v6317_v20  ;;  %v6631_v7 = vcombine.low %v3971_v5, %v3975_v46  ;;  %v4307_v4 = vrot.slane %v11106_v48, %v10396_v63 }
 0x450   : > { %v4311_v56 = vrot.slane %v11106_v48, %v10399_v18  ;;  %v6632_v13 = vcombine.low %v3979_v50, %v3983_v10  ;;  %v6639_v9 = vrot.slane %v6629_v49, %v10423_v34  ;;  %v6646_v26 = vrot.slane %v6630_v14, %v10423_v34  ;;  %v12652_v49 = vld [vmem:[#allocation29_spill] sm:$0xff] }
 0x451   : > { %8049 = vperm.xlu0 %9040, %v12650_v22   ;;  %v4315_v44 = vrot.slane %v11106_v48, %v10402_v40  ;;  %v5892_v19 = vrot.slane %v5878_v53, %v10423_v34  ;;  %v6326_v20 = vrot.slane %v6318_v51, %v10423_v34  ;;  %v4319_v24 = vrot.slane %v11106_v48, %v10405_v33 }
 0x452   : > { %v7966_v28 = vpop.permute.xlu0 %7965  ;;  %v6653_v16 = vrot.slane %v6631_v7, %v10423_v34  ;;  %v6660_v5 = vrot.slane %v6632_v13, %v10423_v34  ;;  %v4323_v46 = vrot.slane %v11106_v48, %v10409_v58  ;;  %v4327_v50 = vrot.slane %v11106_v48, %v10412_v38 }
 0x453   : > { %v8173_v41 = vrot.slane %v7966_v28, %v12651_v15  ;;  %v4331_v53 = vrot.slane %v11106_v48, %v10416_v30  ;;  %v4335_v51 = vrot.slane %v11106_v48, %v10419_v61  ;;  %v7168_v14 = vcombine.low %v4307_v4, %v4311_v56 }
 0x454   : > { %v6333_v22 = vrot.slane %v6319_v62, %v10423_v34  ;;  %v6661_v7 = vcombine.low %v6639_v9, %v6646_v26  ;;  %v7169_v28 = vcombine.low %v4315_v44, %v4319_v24  ;;  %v7170_v13 = vcombine.low %v4323_v46, %v4327_v50  ;;  %v12654_v9 = vld [vmem:[#allocation33_spill] sm:$0xff]  ;;  %v12655_v24 = vld [vmem:[#allocation15_spill] sm:$0xff] }
 0x455   : > { %v11652_v10 = vsel %vm8174_vm11, %v8173_v41, %v8168_v25  ;;  %8007 = vperm.xlu0 %9040, %v12652_v49   ;;  %v7171_v15 = vcombine.low %v4331_v53, %v4335_v51  ;;  %v7178_v43 = vrot.slane %v7168_v14, %v10423_v34  ;;  %v12653_v25 = vld [vmem:[#allocation21_spill] sm:$0xff]  ;;  %v6662_v6 = vcombine.low %v6653_v16, %v6660_v5 }
 0x456   : > { %v3507_v41 = vrot.slane %v12653_v25, %v10396_v63  ;;  %v3511_v49 = vrot.slane %v12653_v25, %v10399_v18  ;;  %v7185_v55 = vrot.slane %v7169_v28, %v10423_v34  ;;  %v7192_v48 = vrot.slane %v7170_v13, %v10423_v34 }
 0x457   : > { %v3515_v62 = vrot.slane %v12653_v25, %v10402_v40  ;;  %v7199_v4 = vrot.slane %v7171_v15, %v10423_v34  ;;  %v3519_v56 = vrot.slane %v12653_v25, %v10405_v33  ;;  %v3523_v26 = vrot.slane %v12653_v25, %v10409_v58 }
 0x458   : > { %v3527_v44 = vrot.slane %v12653_v25, %v10412_v38  ;;  %v11678_v16 = vcombine.low %v5885_v52, %v5892_v19  ;;  %v7200_v5 = vcombine.low %v7178_v43, %v7185_v55  ;;  %v3531_v46 = vrot.slane %v12653_v25, %v10416_v30  ;;  %v12656_v43 = vld [vmem:[#allocation34_spill] sm:$0xff] }
 0x459   : > { %8055 = vperm.xlu0 %9040, %v12654_v9   ;;  %v3535_v15 = vrot.slane %v12653_v25, %v10419_v61  ;;  %v7201_v50 = vcombine.low %v7192_v48, %v7199_v4  ;;  %v5943_v53 = vcombine.low %v3507_v41, %v3511_v49  ;;  %v5944_v51 = vcombine.low %v3515_v62, %v3519_v56 }
 0x45a   : > { %2634 = vadd.xlane.f32.xlu1 %v12655_v24  ;;  %v5945_v14 = vcombine.low %v3523_v26, %v3527_v44  ;;  %v11684_v28 = vcombine.low %v6326_v20, %v6333_v22  ;;  %v4371_v9 = vrot.slane %v11164_v32, %v10396_v63  ;;  %v4375_v52 = vrot.slane %v11164_v32, %v10399_v18 }
 0x45b   : > { %v5946_v13 = vcombine.low %v3531_v46, %v3535_v15  ;;  %v6669_v55 = vrot.slane %v6661_v7, %v10423_v34  ;;  %v6676_v19 = vrot.slane %v6662_v6, %v10423_v34  ;;  %v7208_v25 = vrot.slane %v7200_v5, %v10423_v34  ;;  %v12657_v15 = vld [vmem:[#allocation23_spill] sm:$0xff] }
 0x45c   : > { %v7215_v41 = vrot.slane %v7201_v50, %v10423_v34  ;;  %v5953_v20 = vrot.slane %v5943_v53, %v10423_v34  ;;  %v4379_v22 = vrot.slane %v11164_v32, %v10402_v40  ;;  %v4383_v49 = vrot.slane %v11164_v32, %v10405_v33 }
 0x45d   : > { %8013 = vperm.xlu0 %9040, %v12656_v43   ;;  %v4387_v48 = vrot.slane %v11164_v32, %v10409_v58  ;;  %v5960_v62 = vrot.slane %v5944_v51, %v10423_v34  ;;  %v5967_v7 = vrot.slane %v5945_v14, %v10423_v34  ;;  %v4391_v6 = vrot.slane %v11164_v32, %v10412_v38 }
 0x45e   : > { %v4395_v4 = vrot.slane %v11164_v32, %v10416_v30  ;;  %v5974_v56 = vrot.slane %v5946_v13, %v10423_v34  ;;  %v4399_v26 = vrot.slane %v11164_v32, %v10419_v61  ;;  %v7266_v44 = vcombine.low %v4371_v9, %v4375_v52 }
 0x45f   : > { %v7267_v24 = vcombine.low %v4379_v22, %v4383_v49  ;;  %v11712_v5 = vcombine.low %v6669_v55, %v6676_v19  ;;  %v7268_v46 = vcombine.low %v4387_v48, %v4391_v6  ;;  %v4019_v50 = vrot.slane %v12657_v15, %v10396_v63 }
 0x460   : > { %v4023_v53 = vrot.slane %v12657_v15, %v10399_v18  ;;  %v11718_v51 = vcombine.low %v7208_v25, %v7215_v41  ;;  %v7269_v14 = vcombine.low %v4395_v4, %v4399_v26  ;;  %v7276_v13 = vrot.slane %v7266_v44, %v10423_v34 }
 0x461   : > { %8061 = vperm.xlu0 %9040, %v11079_v2   ;;  %v7283_v32 = vrot.slane %v7267_v24, %v10423_v34  ;;  %v7290_v9 = vrot.slane %v7268_v46, %v10423_v34  ;;  %v4027_v2 = vrot.slane %v12657_v15, %v10402_v40  ;;  %v4031_v52 = vrot.slane %v12657_v15, %v10405_v33 }
 0x462   : > { %v4035_v43 = vrot.slane %v12657_v15, %v10409_v58  ;;  %v5975_v55 = vcombine.low %v5953_v20, %v5960_v62  ;;  %v5976_v19 = vcombine.low %v5967_v7, %v5974_v56  ;;  %v7297_v25 = vrot.slane %v7269_v14, %v10423_v34 }
 0x463   : > { %v4039_v41 = vrot.slane %v12657_v15, %v10412_v38  ;;  %v4043_v22 = vrot.slane %v12657_v15, %v10416_v30  ;;  %v4047_v49 = vrot.slane %v12657_v15, %v10419_v61  ;;  %v6727_v48 = vcombine.low %v4019_v50, %v4023_v53 }
 0x464   : > { %v6728_v6 = vcombine.low %v4027_v2, %v4031_v52  ;;  %v7298_v4 = vcombine.low %v7276_v13, %v7283_v32  ;;  %v7299_v26 = vcombine.low %v7290_v9, %v7297_v25  ;;  %v4435_v20 = vrot.slane %v11244_v17, %v10396_v63 }
 0x465   : > { %8019 = vperm.xlu0 %9040, %v11085_v8   ;;  %v6729_v44 = vcombine.low %v4035_v43, %v4039_v41  ;;  %v6730_v62 = vcombine.low %v4043_v22, %v4047_v49  ;;  %v6737_v7 = vrot.slane %v6727_v48, %v10423_v34  ;;  %v4439_v8 = vrot.slane %v11244_v17, %v10399_v18  ;;  %v12658_v49 = vld [vmem:[#allocation24_spill] sm:$0xff] }
 0x466   : > { %v6744_v56 = vrot.slane %v6728_v6, %v10423_v34  ;;  %v5983_v24 = vrot.slane %v5975_v55, %v10423_v34  ;;  %v5990_v46 = vrot.slane %v5976_v19, %v10423_v34  ;;  %v4443_v15 = vrot.slane %v11244_v17, %v10402_v40 }
 0x467   : > { %v4447_v50 = vrot.slane %v11244_v17, %v10405_v33  ;;  %v6751_v53 = vrot.slane %v6729_v44, %v10423_v34  ;;  %v6758_v14 = vrot.slane %v6730_v62, %v10423_v34  ;;  %v4451_v13 = vrot.slane %v11244_v17, %v10409_v58 }
 0x468   : > { %v4455_v32 = vrot.slane %v11244_v17, %v10412_v38  ;;  %v7306_v9 = vrot.slane %v7298_v4, %v10423_v34  ;;  %v4459_v2 = vrot.slane %v11244_v17, %v10416_v30  ;;  %v4463_v52 = vrot.slane %v11244_v17, %v10419_v61 }
 0x469   : > { %8067 = vperm.xlu0 %9040, %v11115_v1   ;;  %v7364_v43 = vcombine.low %v4435_v20, %v4439_v8  ;;  %v7313_v1 = vrot.slane %v7299_v26, %v10423_v34  ;;  %v6759_v55 = vcombine.low %v6737_v7, %v6744_v56  ;;  %v7365_v19 = vcombine.low %v4443_v15, %v4447_v50 }
 0x46a   : > { %v7366_v25 = vcombine.low %v4451_v13, %v4455_v32  ;;  %v7367_v41 = vcombine.low %v4459_v2, %v4463_v52  ;;  %v3571_v48 = vrot.slane %v12658_v49, %v10396_v63  ;;  %v3575_v6 = vrot.slane %v12658_v49, %v10399_v18 }
 0x46b   : > { %7980 = vperm.xlu1 %9042, %v11121_v47   ;;  %v7374_v22 = vrot.slane %v7364_v43, %v10423_v34  ;;  %v6760_v17 = vcombine.low %v6751_v53, %v6758_v14  ;;  %v7381_v4 = vrot.slane %v7365_v19, %v10423_v34  ;;  %v3579_v26 = vrot.slane %v12658_v49, %v10402_v40 }
 0x46c   : > { %v7388_v47 = vrot.slane %v7366_v25, %v10423_v34  ;;  %v7395_v44 = vrot.slane %v7367_v41, %v10423_v34  ;;  %v3583_v20 = vrot.slane %v12658_v49, %v10405_v33  ;;  %v3587_v62 = vrot.slane %v12658_v49, %v10409_v58 }
 0x46d   : > { %8025 = vperm.xlu0 %9040, %v11192_v21   ;;  %v3591_v7 = vrot.slane %v12658_v49, %v10412_v38  ;;  %v11781_v21 = vcombine.low %v5983_v24, %v5990_v46  ;;  %v7396_v56 = vcombine.low %v7374_v22, %v7381_v4  ;;  %v3595_v8 = vrot.slane %v12658_v49, %v10416_v30 }
 0x46e   : > { %v3599_v15 = vrot.slane %v12658_v49, %v10419_v61  ;;  %v7397_v50 = vcombine.low %v7388_v47, %v7395_v44  ;;  %v6041_v53 = vcombine.low %v3571_v48, %v3575_v6  ;;  %v6042_v14 = vcombine.low %v3579_v26, %v3583_v20  ;;  %v12659_v26 = vld [vmem:[#allocation27_spill] sm:$0xff] }
 0x46f   : > { %7986 = vperm.xlu1 %9042, %v11205_v11   ;;  %v6043_v13 = vcombine.low %v3587_v62, %v3591_v7  ;;  %v11788_v32 = vcombine.low %v7306_v9, %v7313_v1  ;;  %v4499_v11 = vrot.slane %v11354_v37, %v10396_v63  ;;  %v4503_v24 = vrot.slane %v11354_v37, %v10399_v18 }
 0x470   : > { %v6044_v2 = vcombine.low %v3595_v8, %v3599_v15  ;;  %v6767_v46 = vrot.slane %v6759_v55, %v10423_v34  ;;  %v6774_v52 = vrot.slane %v6760_v17, %v10423_v34  ;;  %v7404_v43 = vrot.slane %v7396_v56, %v10423_v34 }
 0x471   : > { %8073 = vperm.xlu0 %9040, %v11207_v39   ;;  %v7411_v19 = vrot.slane %v7397_v50, %v10423_v34  ;;  %v6051_v39 = vrot.slane %v6041_v53, %v10423_v34  ;;  %v4507_v9 = vrot.slane %v11354_v37, %v10402_v40  ;;  %v4511_v1 = vrot.slane %v11354_v37, %v10405_v33 }
 0x472   : > { %v4515_v25 = vrot.slane %v11354_v37, %v10409_v58  ;;  %v6058_v55 = vrot.slane %v6042_v14, %v10423_v34  ;;  %v6065_v41 = vrot.slane %v6043_v13, %v10423_v34  ;;  %v4519_v22 = vrot.slane %v11354_v37, %v10412_v38 }
 0x473   : > { %7992 = vperm.xlu1 %9042, %v11344_v35   ;;  %v4523_v35 = vrot.slane %v11354_v37, %v10416_v30  ;;  %v6072_v49 = vrot.slane %v6044_v2, %v10423_v34  ;;  %v4527_v48 = vrot.slane %v11354_v37, %v10419_v61  ;;  %v7462_v6 = vcombine.low %v4499_v11, %v4503_v24 }
 0x474   : > { %v7463_v17 = vcombine.low %v4507_v9, %v4511_v1  ;;  %v11816_v4 = vcombine.low %v6767_v46, %v6774_v52  ;;  %v7464_v47 = vcombine.low %v4515_v25, %v4519_v22  ;;  %v4083_v44 = vrot.slane %v12659_v26, %v10396_v63 }
 0x475   : > { %8031 = vperm.xlu0 %9040, %v11362_v54   ;;  %v4087_v20 = vrot.slane %v12659_v26, %v10399_v18  ;;  %v11823_v62 = vcombine.low %v7404_v43, %v7411_v19  ;;  %v7465_v54 = vcombine.low %v4523_v35, %v4527_v48  ;;  %v7472_v7 = vrot.slane %v7462_v6, %v10423_v34 }
 0x476   : > { %v7479_v37 = vrot.slane %v7463_v17, %v10423_v34  ;;  %v7486_v56 = vrot.slane %v7464_v47, %v10423_v34  ;;  %v4091_v8 = vrot.slane %v12659_v26, %v10402_v40  ;;  %v4095_v15 = vrot.slane %v12659_v26, %v10405_v33 }
 0x477   : > { %7998 = vperm.xlu1 %9042, %v11367_v27   ;;  %v4099_v50 = vrot.slane %v12659_v26, %v10409_v58  ;;  %v6073_v27 = vcombine.low %v6051_v39, %v6058_v55  ;;  %v6074_v53 = vcombine.low %v6065_v41, %v6072_v49  ;;  %v7493_v14 = vrot.slane %v7465_v54, %v10423_v34 }
 0x478   : > { %v4103_v13 = vrot.slane %v12659_v26, %v10412_v38  ;;  %v4107_v2 = vrot.slane %v12659_v26, %v10416_v30  ;;  %v4111_v11 = vrot.slane %v12659_v26, %v10419_v61  ;;  %v6825_v24 = vcombine.low %v4083_v44, %v4087_v20 }
 0x479   : > { %8079 = vperm.xlu0 %9040, %v11369_v3   ;;  %v6826_v46 = vcombine.low %v4091_v8, %v4095_v15  ;;  %v7494_v52 = vcombine.low %v7472_v7, %v7479_v37  ;;  %v7495_v3 = vcombine.low %v7486_v56, %v7493_v14  ;;  %v4563_v19 = vrot.slane %v11574_v36, %v10396_v63 }
 0x47a   : > { %v6827_v43 = vcombine.low %v4099_v50, %v4103_v13  ;;  %v6828_v39 = vcombine.low %v4107_v2, %v4111_v11  ;;  %v6835_v9 = vrot.slane %v6825_v24, %v10423_v34  ;;  %v4567_v25 = vrot.slane %v11574_v36, %v10399_v18  ;;  %v12660_v50 = vld [vmem:[#allocation30_spill] sm:$0xff] }
 0x47b   : > { %8004 = vperm.xlu1 %9042, %v11372_v57   ;;  %v6842_v1 = vrot.slane %v6826_v46, %v10423_v34  ;;  %v6081_v57 = vrot.slane %v6073_v27, %v10423_v34  ;;  %v4571_v22 = vrot.slane %v11574_v36, %v10402_v40  ;;  %v4575_v35 = vrot.slane %v11574_v36, %v10405_v33 }
 0x47c   : > { %v6849_v41 = vrot.slane %v6827_v43, %v10423_v34  ;;  %v6088_v49 = vrot.slane %v6074_v53, %v10423_v34  ;;  %v6856_v48 = vrot.slane %v6828_v39, %v10423_v34  ;;  %v4579_v17 = vrot.slane %v11574_v36, %v10409_v58 }
 0x47d   : > { %v11849_v55 = vpop.xlane.xlu1 %2626  ;;  %8082 = vperm.xlu0 %9040, %v11444_v0   ;;  %v6857_v6 = vcombine.low %v6835_v9, %v6842_v1  ;;  %v7502_v0 = vrot.slane %v7494_v52, %v10423_v34  ;;  %v4583_v47 = vrot.slane %v11574_v36, %v10412_v38  ;;  %v4587_v26 = vrot.slane %v11574_v36, %v10416_v30 }
 0x47e   : > { %v4591_v44 = vrot.slane %v11574_v36, %v10419_v61  ;;  %v7509_v20 = vrot.slane %v7495_v3, %v10423_v34  ;;  %v6858_v54 = vcombine.low %v6849_v41, %v6856_v48  ;;  %v7560_v37 = vcombine.low %v4563_v19, %v4567_v25 }
 0x47f   : > { %8052 = vperm.xlu1 %9042, %v11541_v12   ;;  %v6865_v7 = vrot.slane %v6857_v6, %v10423_v34  ;;  %v7561_v12 = vcombine.low %v4571_v22, %v4575_v35  ;;  %v7562_v8 = vcombine.low %v4579_v17, %v4583_v47  ;;  %v3635_v27 = vrot.slane %v12660_v50, %v10396_v63  ;;  %v11880_v2 = vpop.xlane.xlu0 %2632 }
 0x480   : > { %v7563_v15 = vcombine.low %v4587_v26, %v4591_v44  ;;  %v6872_v14 = vrot.slane %v6858_v54, %v10423_v34  ;;  %v7570_v36 = vrot.slane %v7560_v37, %v10423_v34  ;;  %v3639_v13 = vrot.slane %v12660_v50, %v10399_v18 }
 0x481   : > { %v7969_v56 = vpop.permute.xlu1 %7968  ;;  %8037 = vperm.xlu0 %9040, %v11549_v23   ;;  %v7577_v23 = vrot.slane %v7561_v12, %v10423_v34  ;;  %v7584_v11 = vrot.slane %v7562_v8, %v10423_v34  ;;  %v3643_v46 = vrot.slane %v12660_v50, %v10402_v40  ;;  %v11890_v3 = vcombine.low %v6081_v57, %v6088_v49  ;;  %v12661_v49 = vld [vmem:[#allocation36_spill] sm:$0xff] }
 0x482   : > { %v8180_v53 = vrot.slane %v7969_v56, %v11410_v60  ;;  %v7591_v24 = vrot.slane %v7563_v15, %v10423_v34  ;;  %v3647_v43 = vrot.slane %v12660_v50, %v10405_v33  ;;  %v11897_v19 = vcombine.low %v7502_v0, %v7509_v20 }
 0x483   : > { %8010 = vperm.xlu1 %9042, %v11562_v31   ;;  %v3651_v31 = vrot.slane %v12660_v50, %v10409_v58  ;;  %v11899_v39 = vcombine.low %v7570_v36, %v7577_v23  ;;  %v3655_v9 = vrot.slane %v12660_v50, %v10412_v38  ;;  %v11905_v1 = vcombine.low %v6865_v7, %v6872_v14  ;;  %v12662_v36 = vld [vmem:[#allocation32_spill] sm:$0xff] }
 0x484   : > { %v8182_v52 = vsel %vm8181_vm12, %v8180_v53, %v11652_v10  ;;  %v3659_v10 = vrot.slane %v12660_v50, %v10416_v30  ;;  %v3663_v25 = vrot.slane %v12660_v50, %v10419_v61  ;;  %v6139_v57 = vcombine.low %v3635_v27, %v3639_v13 }
 0x485   : > { %8085 = vperm.xlu0 %9040, %v11564_v42   ;;  %v6140_v41 = vcombine.low %v3643_v46, %v3647_v43  ;;  %v11910_v42 = vcombine.low %v7584_v11, %v7591_v24  ;;  %v6141_v35 = vcombine.low %v3651_v31, %v3655_v9  ;;  %v4243_v48 = vrot.slane %v12661_v49, %v10396_v63 }
 0x486   : > { %v4247_v6 = vrot.slane %v12661_v49, %v10399_v18  ;;  %v6142_v0 = vcombine.low %v3659_v10, %v3663_v25  ;;  %v6149_v47 = vrot.slane %v6139_v57, %v10423_v34  ;;  %v4251_v20 = vrot.slane %v12661_v49, %v10402_v40 }
 0x487   : > { %v7972_v22 = vpop.permute.xlu0 %7971  ;;  %8058 = vperm.xlu1 %9042, %v11566_v59   ;;  %v6156_v26 = vrot.slane %v6140_v41, %v10423_v34  ;;  %v7600_v59 = vrot.slane %v11899_v39, %v10423_v34  ;;  %v6163_v44 = vrot.slane %v6141_v35, %v10423_v34  ;;  %v4255_v54 = vrot.slane %v12661_v49, %v10405_v33 }
 0x488   : > { %v8187_v17 = vrot.slane %v7972_v22, %v11556_v45  ;;  %v6170_v37 = vrot.slane %v6142_v0, %v10423_v34  ;;  %v4263_v12 = vrot.slane %v12661_v49, %v10412_v38  ;;  %v4267_v8 = vrot.slane %v12661_v49, %v10416_v30 }
 0x489   : > { %8088 = vperm.xlu0 %9040, %v11600_v29   ;;  %v6171_v56 = vcombine.low %v6149_v47, %v6156_v26  ;;  %v4259_v29 = vrot.slane %v12661_v49, %v10409_v58  ;;  %v4271_v15 = vrot.slane %v12661_v49, %v10419_v61  ;;  %v7070_v50 = vcombine.low %v4243_v48, %v4247_v6 }
 0x48a   : > { %v11928_v7 = vsel %vm8188_vm13, %v8187_v17, %v8182_v52  ;;  %v7607_v27 = vrot.slane %v11910_v42, %v10423_v34  ;;  %v6172_v53 = vcombine.low %v6163_v44, %v6170_v37  ;;  %v7071_v14 = vcombine.low %v4251_v20, %v4255_v54  ;;  %v12663_v17 = vld [vmem:[#allocation37_spill] sm:$0xff] }
 0x48b   : > { %8016 = vperm.xlu1 %9042, %v11678_v16   ;;  %v3699_v13 = vrot.slane %v12662_v36, %v10396_v63  ;;  %v7072_v16 = vcombine.low %v4259_v29, %v4263_v12  ;;  %v7073_v23 = vcombine.low %v4267_v8, %v4271_v15  ;;  %v7080_v11 = vrot.slane %v7070_v50, %v10423_v34 }
 0x48c   : > { %v3703_v24 = vrot.slane %v12662_v36, %v10399_v18  ;;  %v6179_v46 = vrot.slane %v6171_v56, %v10423_v34  ;;  %v7087_v52 = vrot.slane %v7071_v14, %v10423_v34  ;;  %v3707_v43 = vrot.slane %v12662_v36, %v10402_v40 }
 0x48d   : > { %8043 = vperm.xlu0 %9040, %v11684_v28   ;;  %v3711_v31 = vrot.slane %v12662_v36, %v10405_v33  ;;  %v7094_v28 = vrot.slane %v7072_v16, %v10423_v34  ;;  %v7101_v39 = vrot.slane %v7073_v23, %v10423_v34  ;;  %v3715_v9 = vrot.slane %v12662_v36, %v10409_v58 }
 0x48e   : > { %v3719_v10 = vrot.slane %v12662_v36, %v10412_v38  ;;  %v6186_v25 = vrot.slane %v6172_v53, %v10423_v34  ;;  %v7102_v57 = vcombine.low %v7080_v11, %v7087_v52  ;;  %v3723_v41 = vrot.slane %v12662_v36, %v10416_v30 }
 0x48f   : > { %8064 = vperm.xlu1 %9042, %v11712_v5   ;;  %v3727_v22 = vrot.slane %v12662_v36, %v10419_v61  ;;  %v7103_v5 = vcombine.low %v7094_v28, %v7101_v39  ;;  %v6237_v42 = vcombine.low %v3699_v13, %v3703_v24  ;;  %v6238_v35 = vcombine.low %v3707_v43, %v3711_v31 }
 0x490   : > { %v6239_v49 = vcombine.low %v3715_v9, %v3719_v10  ;;  %v7110_v48 = vrot.slane %v7102_v57, %v10423_v34  ;;  %v4275_v0 = vrot.slane %v12663_v17, %v10396_v63  ;;  %v4279_v47 = vrot.slane %v12663_v17, %v10399_v18 }
 0x491   : > { %8097 = vperm.xlu0 %9040, %v11718_v51   ;;  %v6240_v6 = vcombine.low %v3723_v41, %v3727_v22  ;;  %v7117_v26 = vrot.slane %v7103_v5, %v10423_v34  ;;  %v6247_v44 = vrot.slane %v6237_v42, %v10423_v34  ;;  %v6254_v51 = vrot.slane %v6238_v35, %v10423_v34  ;;  %v12665_v35 = vld [vmem:[#allocation38_spill] sm:$0xff] }
 0x492   : > { %v6261_v20 = vrot.slane %v6239_v49, %v10423_v34  ;;  %v4283_v37 = vrot.slane %v12663_v17, %v10402_v40  ;;  %v4287_v56 = vrot.slane %v12663_v17, %v10405_v33  ;;  %v4291_v29 = vrot.slane %v12663_v17, %v10409_v58 }
 0x493   : > { %8022 = vperm.xlu1 %9042, %v11781_v21   ;;  %v6268_v54 = vrot.slane %v6240_v6, %v10423_v34  ;;  %v7608_v21 = vcombine.low %v7600_v59, %v7607_v27  ;;  %v6269_v12 = vcombine.low %v6247_v44, %v6254_v51  ;;  %v4295_v8 = vrot.slane %v12663_v17, %v10412_v38 }
 0x494   : > { %v4299_v15 = vrot.slane %v12663_v17, %v10416_v30  ;;  %v4303_v53 = vrot.slane %v12663_v17, %v10419_v61  ;;  %v7119_v14 = vcombine.low %v4275_v0, %v4279_v47  ;;  %v7120_v36 = vcombine.low %v4283_v37, %v4287_v56 }
 0x495   : > { %8103 = vperm.xlu0 %9040, %v11788_v32   ;;  %v6270_v50 = vcombine.low %v6261_v20, %v6268_v54  ;;  %v6187_v13 = vcombine.low %v6179_v46, %v6186_v25  ;;  %v7121_v16 = vcombine.low %v4291_v29, %v4295_v8  ;;  %v12664_v32 = vld [vmem:[#allocation35_spill] sm:$0xff]  ;;  %v7118_v23 = vcombine.low %v7110_v48, %v7117_v26 }
 0x496   : > { %v3763_v59 = vrot.slane %v12664_v32, %v10396_v63  ;;  %v3767_v27 = vrot.slane %v12664_v32, %v10399_v18  ;;  %v7122_v11 = vcombine.low %v4299_v15, %v4303_v53  ;;  %v7129_v24 = vrot.slane %v7119_v14, %v10423_v34 }
 0x497   : > { %8070 = vperm.xlu1 %9042, %v11816_v4   ;;  %v7136_v52 = vrot.slane %v7120_v36, %v10423_v34  ;;  %v7143_v43 = vrot.slane %v7121_v16, %v10423_v34  ;;  %v3771_v4 = vrot.slane %v12664_v32, %v10402_v40  ;;  %v3775_v46 = vrot.slane %v12664_v32, %v10405_v33  ;;  %v12666_v36 = vld [vmem:[#allocation39_spill] sm:$0xff] }
 0x498   : > { %v3779_v31 = vrot.slane %v12664_v32, %v10409_v58  ;;  %v6277_v28 = vrot.slane %v6269_v12, %v10423_v34  ;;  %v6284_v39 = vrot.slane %v6270_v50, %v10423_v34  ;;  %v7150_v9 = vrot.slane %v7122_v11, %v10423_v34 }
 0x499   : > { %8109 = vperm.xlu0 %9040, %v11823_v62   ;;  %v3783_v62 = vrot.slane %v12664_v32, %v10412_v38  ;;  %v3787_v10 = vrot.slane %v12664_v32, %v10416_v30  ;;  %v3791_v25 = vrot.slane %v12664_v32, %v10419_v61  ;;  %v6335_v57 = vcombine.low %v3763_v59, %v3767_v27 }
 0x49a   : > { %v6336_v41 = vcombine.low %v3771_v4, %v3775_v46  ;;  %v7151_v22 = vcombine.low %v7129_v24, %v7136_v52  ;;  %v7152_v5 = vcombine.low %v7143_v43, %v7150_v9  ;;  %v4339_v49 = vrot.slane %v12665_v35, %v10396_v63 }
 0x49b   : > { %8028 = vperm.xlu1 %9042, %v11890_v3   ;;  %v6337_v42 = vcombine.low %v3779_v31, %v3783_v62  ;;  %v6338_v48 = vcombine.low %v3787_v10, %v3791_v25  ;;  %v6345_v6 = vrot.slane %v6335_v57, %v10423_v34  ;;  %v4343_v17 = vrot.slane %v12665_v35, %v10399_v18  ;;  %v12667_v25 = vld [vmem:[#allocation11_spill] sm:$0xff]  ;;  %v12668_v57 = vld [vmem:[#allocation8_spill] sm:$0xff] }
 0x49c   : > { %v6352_v3 = vrot.slane %v6336_v41, %v10423_v34  ;;  %v6285_v0 = vcombine.low %v6277_v28, %v6284_v39  ;;  %v4347_v26 = vrot.slane %v12665_v35, %v10402_v40  ;;  %v4351_v44 = vrot.slane %v12665_v35, %v10405_v33 }
 0x49d   : > { %8115 = vperm.xlu0 %9040, %v11897_v19   ;;  %v6359_v47 = vrot.slane %v6337_v42, %v10423_v34  ;;  %v6366_v19 = vrot.slane %v6338_v48, %v10423_v34  ;;  %v4355_v20 = vrot.slane %v12665_v35, %v10409_v58  ;;  %v4359_v54 = vrot.slane %v12665_v35, %v10412_v38 }
 0x49e   : > { %v6367_v51 = vcombine.low %v6345_v6, %v6352_v3  ;;  %v7159_v37 = vrot.slane %v7151_v22, %v10423_v34  ;;  %v4363_v56 = vrot.slane %v12665_v35, %v10416_v30  ;;  %v4367_v29 = vrot.slane %v12665_v35, %v10419_v61 }
 0x49f   : > { %8076 = vperm.xlu1 %9042, %v11905_v1   ;;  %v7217_v12 = vcombine.low %v4339_v49, %v4343_v17  ;;  %v7166_v1 = vrot.slane %v7152_v5, %v10423_v34  ;;  %v6368_v8 = vcombine.low %v6359_v47, %v6366_v19  ;;  %v7218_v15 = vcombine.low %v4347_v26, %v4351_v44  ;;  %v12669_v17 = vld [vmem:[#allocation40_spill] sm:$0xff] }
 0x4a0   : > { %v7219_v50 = vcombine.low %v4355_v20, %v4359_v54  ;;  %v7220_v53 = vcombine.low %v4363_v56, %v4367_v29  ;;  %v4403_v16 = vrot.slane %v12666_v36, %v10396_v63  ;;  %v4407_v32 = vrot.slane %v12666_v36, %v10399_v18 }
 0x4a1   : > { %8121 = vperm.xlu0 %9040, %v7608_v21   ;;  %v7227_v14 = vrot.slane %v7217_v12, %v10423_v34  ;;  %v6375_v59 = vrot.slane %v6367_v51, %v10423_v34  ;;  %v7234_v27 = vrot.slane %v7218_v15, %v10423_v34  ;;  %v4411_v11 = vrot.slane %v12666_v36, %v10402_v40 }
 0x4a2   : > { %v7241_v21 = vrot.slane %v7219_v50, %v10423_v34  ;;  %v7248_v24 = vrot.slane %v7220_v53, %v10423_v34  ;;  %v4415_v52 = vrot.slane %v12666_v36, %v10405_v33  ;;  %v4419_v43 = vrot.slane %v12666_v36, %v10409_v58  ;;  %v12670_v53 = vld [vmem:[#allocation41_spill] sm:$0xff] }
 0x4a3   : > { %8034 = vperm.xlu1 %9042, %v6187_v13   ;;  %v4423_v13 = vrot.slane %v12666_v36, %v10412_v38  ;;  %v6382_v4 = vrot.slane %v6368_v8, %v10423_v34  ;;  %v7249_v46 = vcombine.low %v7227_v14, %v7234_v27  ;;  %v4427_v31 = vrot.slane %v12666_v36, %v10416_v30 }
 0x4a4   : > { %v4431_v28 = vrot.slane %v12666_v36, %v10419_v61  ;;  %v7250_v39 = vcombine.low %v7241_v21, %v7248_v24  ;;  %v7315_v9 = vcombine.low %v4403_v16, %v4407_v32  ;;  %v7316_v62 = vcombine.low %v4411_v11, %v4415_v52  ;;  %v12671_v21 = vld [vmem:[#allocation6_spill] sm:$0xff] }
 0x4a5   : > { %8091 = vperm.xlu0 %9040, %v7118_v23   ;;  %v7317_v10 = vcombine.low %v4419_v43, %v4423_v13  ;;  %v12064_v41 = vadd.f32 %v12668_v57, %v12667_v25  ;;  %v7167_v22 = vcombine.low %v7159_v37, %v7166_v1  ;;  %v7257_v23 = vrot.slane %v7249_v46, %v10423_v34 }
 0x4a6   : > { %v7318_v5 = vcombine.low %v4427_v31, %v4431_v28  ;;  %v7264_v42 = vrot.slane %v7250_v39, %v10423_v34  ;;  %v7325_v35 = vrot.slane %v7315_v9, %v10423_v34  ;;  %v7332_v49 = vrot.slane %v7316_v62, %v10423_v34 }
 0x4a7   : > { %8040 = vperm.xlu1 %9042, %v6285_v0   ;;  %v7339_v48 = vrot.slane %v7317_v10, %v10423_v34  ;;  %v6383_v6 = vcombine.low %v6375_v59, %v6382_v4  ;;  %v4467_v47 = vrot.slane %v12669_v17, %v10396_v63  ;;  %v4471_v0 = vrot.slane %v12669_v17, %v10399_v18 }
 0x4a8   : > { %v7346_v3 = vrot.slane %v7318_v5, %v10423_v34  ;;  %v7265_v26 = vcombine.low %v7257_v23, %v7264_v42  ;;  %v7347_v44 = vcombine.low %v7325_v35, %v7332_v49  ;;  %v4475_v19 = vrot.slane %v12669_v17, %v10402_v40  ;;  %v12672_v42 = vld [vmem:[#allocation7_spill] sm:$0xff] }
 0x4a9   : > { %8094 = vperm.xlu0 %9040, %v7167_v22   ;;  %v4479_v51 = vrot.slane %v12669_v17, %v10405_v33  ;;  %v4483_v54 = vrot.slane %v12669_v17, %v10409_v58  ;;  %v4487_v37 = vrot.slane %v12669_v17, %v10412_v38  ;;  %v4491_v56 = vrot.slane %v12669_v17, %v10416_v30 }
 0x4aa   : > { %v7348_v20 = vcombine.low %v7339_v48, %v7346_v3  ;;  %v7355_v29 = vrot.slane %v7347_v44, %v10423_v34  ;;  %v4495_v12 = vrot.slane %v12669_v17, %v10419_v61  ;;  %v7413_v1 = vcombine.low %v4467_v47, %v4471_v0  ;;  %v12673_v17 = vld [vmem:[#allocation14_spill] sm:$0xff] }
 0x4ab   : > { %8046 = vperm.xlu1 %9042, %v6383_v6   ;;  %v7414_v8 = vcombine.low %v4475_v19, %v4479_v51  ;;  %v7415_v50 = vcombine.low %v4483_v54, %v4487_v37  ;;  %v4531_v14 = vrot.slane %v12670_v53, %v10396_v63  ;;  %v4535_v36 = vrot.slane %v12670_v53, %v10399_v18 }
 0x4ac   : > { %v7362_v15 = vrot.slane %v7348_v20, %v10423_v34  ;;  %v7416_v16 = vcombine.low %v4491_v56, %v4495_v12  ;;  %v7423_v32 = vrot.slane %v7413_v1, %v10423_v34  ;;  %v4539_v27 = vrot.slane %v12670_v53, %v10402_v40 }
 0x4ad   : > { %v7430_v59 = vrot.slane %v7414_v8, %v10423_v34  ;;  %v8190_v11 = vadd.s32 4294967240, %v12671_v21  ;;  %v7437_v24 = vrot.slane %v7415_v50, %v10423_v34  ;;  %v4543_v52 = vrot.slane %v12670_v53, %v10405_v33 }
 0x4ae   : > { %v4547_v43 = vrot.slane %v12670_v53, %v10409_v58  ;;  %v7444_v13 = vrot.slane %v7416_v16, %v10423_v34  ;;  %v4551_v46 = vrot.slane %v12670_v53, %v10412_v38  ;;  %v4555_v31 = vrot.slane %v12670_v53, %v10416_v30 }
 0x4af   : > { %8100 = vperm.xlu1 %9042, %v7265_v26   ;;  %v7445_v4 = vcombine.low %v7423_v32, %v7430_v59  ;;  %v7363_v28 = vcombine.low %v7355_v29, %v7362_v15  ;;  %v4559_v39 = vrot.slane %v12670_v53, %v10419_v61  ;;  %v7511_v9 = vcombine.low %v4531_v14, %v4535_v36 }
 0x4b0   : > { %v7512_v62 = vcombine.low %v4539_v27, %v4543_v52  ;;  %v12113_v10 = vadd.f32 %v12668_v57, %v11849_v55  ;;  %v7446_v22 = vcombine.low %v7437_v24, %v7444_v13  ;;  %v7513_v5 = vcombine.low %v4547_v43, %v4551_v46 }
 0x4b1   : > { %v7453_v23 = vrot.slane %v7445_v4, %v10423_v34  ;;  %v12119_v35 = vsub.s32 %v8190_v11, %v12672_v42  ;;  %v7514_v49 = vcombine.low %v4555_v31, %v4559_v39  ;;  %v7521_v48 = vrot.slane %v7511_v9, %v10423_v34 }
 0x4b2   : > { %v12115_v25 = vpop.xlane.xlu1 %2630  ;;  %v7528_v6 = vrot.slane %v7512_v62, %v10423_v34  ;;  %v7460_v3 = vrot.slane %v7446_v22, %v10423_v34  ;;  %v7535_v55 = vrot.slane %v7513_v5, %v10423_v34  ;;  %v4595_v47 = vrot.slane %v12673_v17, %v10396_v63 }
 0x4b3   : > { %8106 = vperm.xlu1 %9042, %v7363_v28   ;;  %v7542_v0 = vrot.slane %v7514_v49, %v10423_v34  ;;  %v8197_v44 = vadd.s32 4294967232, %v12671_v21  ;;  %v4599_v19 = vrot.slane %v12673_v17, %v10399_v18  ;;  %v4603_v54 = vrot.slane %v12673_v17, %v10402_v40 }
 0x4b4   : > { %v7543_v26 = vcombine.low %v7521_v48, %v7528_v6  ;;  %v7461_v20 = vcombine.low %v7453_v23, %v7460_v3  ;;  %v4607_v37 = vrot.slane %v12673_v17, %v10405_v33  ;;  %v4611_v56 = vrot.slane %v12673_v17, %v10409_v58  ;;  %v12141_v15 = vpop.xlane.xlu0 %2636 }
 0x4b5   : > { %v7544_v12 = vcombine.low %v7535_v55, %v7542_v0  ;;  %v4615_v8 = vrot.slane %v12673_v17, %v10412_v38  ;;  %v4619_v50 = vrot.slane %v12673_v17, %v10416_v30  ;;  %v4623_v53 = vrot.slane %v12673_v17, %v10419_v61 }
 0x4b6   : > { %v7975_v51 = vpop.permute.xlu1 %7974  ;;  %v7551_v1 = vrot.slane %v7543_v26, %v10423_v34  ;;  %v7609_v14 = vcombine.low %v4595_v47, %v4599_v19  ;;  %v7610_v36 = vcombine.low %v4603_v54, %v4607_v37  ;;  %v12151_v59 = vsub.s32 %v8197_v44, %v12672_v42 }
 0x4b7   : > { %v8194_v29 = vrot.slane %v7975_v51, %v12119_v35  ;;  %8112 = vperm.xlu1 %9042, %v7461_v20   ;;  %v7558_v32 = vrot.slane %v7544_v12, %v10423_v34  ;;  %v7611_v27 = vcombine.low %v4611_v56, %v4615_v8  ;;  %v7612_v11 = vcombine.low %v4619_v50, %v4623_v53 }
 0x4b8   : > { %v7619_v24 = vrot.slane %v7609_v14, %v10423_v34  ;;  %v7626_v52 = vrot.slane %v7610_v36, %v10423_v34  ;;  %v4627_v43 = vrot.slane %v12113_v10, %v10396_v63  ;;  %v4635_v39 = vrot.slane %v12113_v10, %v10402_v40 }
 0x4b9   : > { %v8196_v16 = vsel %vm8195_vm14, %v8194_v29, %v11928_v7  ;;  %v7559_v13 = vcombine.low %v7551_v1, %v7558_v32  ;;  %v7633_v4 = vrot.slane %v7611_v27, %v10423_v34  ;;  %v4631_v7 = vrot.slane %v12113_v10, %v10399_v18 }
 0x4ba   : > { %v7640_v31 = vrot.slane %v7612_v11, %v10423_v34  ;;  %v7641_v28 = vcombine.low %v7619_v24, %v7626_v52  ;;  %v4639_v9 = vrot.slane %v12113_v10, %v10405_v33  ;;  %v4643_v22 = vrot.slane %v12113_v10, %v10409_v58 }
 0x4bb   : > { %8118 = vperm.xlu1 %9042, %v7559_v13   ;;  %v4647_v23 = vrot.slane %v12113_v10, %v10412_v38  ;;  %v4651_v5 = vrot.slane %v12113_v10, %v10416_v30  ;;  %v4655_v6 = vrot.slane %v12113_v10, %v10419_v61  ;;  %v7658_v3 = vcombine.low %v4627_v43, %v4631_v7 }
 0x4bc   : > { %v7978_v46 = vpop.permute.xlu0 %7977  ;;  %v7642_v49 = vcombine.low %v7633_v4, %v7640_v31  ;;  %v7649_v48 = vrot.slane %v7641_v28, %v10423_v34  ;;  %v7659_v17 = vcombine.low %v4635_v39, %v4639_v9  ;;  %v4659_v51 = vrot.slane %v12064_v41, %v10396_v63 }
 0x4bd   : > { %v8201_v62 = vrot.slane %v7978_v46, %v12151_v59  ;;  %v7660_v47 = vcombine.low %v4643_v22, %v4647_v23  ;;  %v7661_v44 = vcombine.low %v4651_v5, %v4655_v6  ;;  %v7668_v19 = vrot.slane %v7658_v3, %v10423_v34 }
 0x4be   : > { %v7656_v0 = vrot.slane %v7642_v49, %v10423_v34  ;;  %v2700_v20 = vadd.f32 %v12668_v57, %v12115_v25  ;;  %v7675_v10 = vrot.slane %v7659_v17, %v10423_v34  ;;  %v4663_v29 = vrot.slane %v12064_v41, %v10399_v18 }
 0x4bf   : > { %v12176_v55 = vsel %vm8202_vm15, %v8201_v62, %v8196_v16  ;;  %v7682_v54 = vrot.slane %v7660_v47, %v10423_v34  ;;  %v7689_v56 = vrot.slane %v7661_v44, %v10423_v34  ;;  %v4667_v12 = vrot.slane %v12064_v41, %v10402_v40 }
 0x4c0   : > { %v12179_v26 = vpop.permute.xlu0 %7983  ;;  %v7657_v37 = vcombine.low %v7649_v48, %v7656_v0  ;;  %v7690_v1 = vcombine.low %v7668_v19, %v7675_v10  ;;  %v4671_v8 = vrot.slane %v12064_v41, %v10405_v33  ;;  %v4675_v25 = vrot.slane %v12064_v41, %v10409_v58 }
 0x4c1   : > { %v4679_v50 = vrot.slane %v12064_v41, %v10412_v38  ;;  %v7691_v53 = vcombine.low %v7682_v54, %v7689_v56  ;;  %v4683_v36 = vrot.slane %v12064_v41, %v10416_v30  ;;  %v4687_v16 = vrot.slane %v12064_v41, %v10419_v61 }
 0x4c2   : > { %8124 = vperm.xlu1 %9042, %v7657_v37   ;;  %v7707_v32 = vcombine.low %v4659_v51, %v4663_v29  ;;  %v7698_v27 = vrot.slane %v7690_v1, %v10423_v34  ;;  %v7708_v11 = vcombine.low %v4667_v12, %v4671_v8  ;;  %v4691_v46 = vrot.slane %v2700_v20, %v10396_v63 }
 0x4c3   : > { %v7709_v24 = vcombine.low %v4675_v25, %v4679_v50  ;;  %v7705_v52 = vrot.slane %v7691_v53, %v10423_v34  ;;  %v7710_v43 = vcombine.low %v4683_v36, %v4687_v16  ;;  %v4695_v31 = vrot.slane %v2700_v20, %v10399_v18 }
 0x4c4   : > { %v12199_v14 = vpop.permute.xlu0 %7989  ;;  %v7717_v13 = vrot.slane %v7707_v32, %v10423_v34  ;;  %v7724_v4 = vrot.slane %v7708_v11, %v10423_v34  ;;  %v2701_v41 = vadd.f32 %v12668_v57, %v11880_v2  ;;  %v4699_v62 = vrot.slane %v2700_v20, %v10402_v40 }
 0x4c5   : > { %v7731_v7 = vrot.slane %v7709_v24, %v10423_v34  ;;  %v7706_v28 = vcombine.low %v7698_v27, %v7705_v52  ;;  %v7738_v39 = vrot.slane %v7710_v43, %v10423_v34  ;;  %v4703_v23 = vrot.slane %v2700_v20, %v10405_v33 }
 0x4c6   : > { %v7739_v22 = vcombine.low %v7717_v13, %v7724_v4  ;;  %v4707_v5 = vrot.slane %v2700_v20, %v10409_v58  ;;  %v4711_v49 = vrot.slane %v2700_v20, %v10412_v38  ;;  %v4715_v6 = vrot.slane %v2700_v20, %v10416_v30 }
 0x4c7   : > { %8127 = vperm.xlu1 %9042, %v7706_v28   ;;  %v7740_v48 = vcombine.low %v7731_v7, %v7738_v39  ;;  %v4719_v2 = vrot.slane %v2700_v20, %v10419_v61  ;;  %v7756_v17 = vcombine.low %v4691_v46, %v4695_v31  ;;  %v7757_v47 = vcombine.low %v4699_v62, %v4703_v23 }
 0x4c8   : > { %v12215_v9 = vpop.permute.xlu0 %7995  ;;  %v7747_v3 = vrot.slane %v7739_v22, %v10423_v34  ;;  %v7758_v0 = vcombine.low %v4707_v5, %v4711_v49  ;;  %v4723_v10 = vrot.slane %v2701_v41, %v10396_v63  ;;  %v4727_v54 = vrot.slane %v2701_v41, %v10399_v18 }
 0x4c9   : > { %v7754_v44 = vrot.slane %v7740_v48, %v10423_v34  ;;  %v7759_v19 = vcombine.low %v4715_v6, %v4719_v2  ;;  %v7766_v37 = vrot.slane %v7756_v17, %v10423_v34  ;;  %v7773_v56 = vrot.slane %v7757_v47, %v10423_v34 }
 0x4ca   : > { %v7780_v20 = vrot.slane %v7758_v0, %v10423_v34  ;;  %v4731_v1 = vrot.slane %v2701_v41, %v10402_v40  ;;  %v4735_v8 = vrot.slane %v2701_v41, %v10405_v33  ;;  %v4739_v50 = vrot.slane %v2701_v41, %v10409_v58 }
 0x4cb   : > { %v7755_v29 = vcombine.low %v7747_v3, %v7754_v44  ;;  %v7787_v12 = vrot.slane %v7759_v19, %v10423_v34  ;;  %v7788_v25 = vcombine.low %v7766_v37, %v7773_v56  ;;  %v4743_v53 = vrot.slane %v2701_v41, %v10412_v38 }
 0x4cc   : > { %v12225_v51 = vpop.permute.xlu0 %8001  ;;  %v4747_v36 = vrot.slane %v2701_v41, %v10416_v30  ;;  %v4751_v32 = vrot.slane %v2701_v41, %v10419_v61  ;;  %v7805_v27 = vcombine.low %v4723_v10, %v4727_v54  ;;  %v7806_v11 = vcombine.low %v4731_v1, %v4735_v8 }
 0x4cd   : > { %8130 = vperm.xlu1 %9042, %v7755_v29   ;;  %v7789_v16 = vcombine.low %v7780_v20, %v7787_v12  ;;  %v7796_v52 = vrot.slane %v7788_v25, %v10423_v34  ;;  %v7807_v43 = vcombine.low %v4739_v50, %v4743_v53  ;;  %v2703_v6 = vadd.f32 %v12668_v57, %v12141_v15 }
 0x4ce   : > { %v7808_v4 = vcombine.low %v4747_v36, %v4751_v32  ;;  %v7815_v7 = vrot.slane %v7805_v27, %v10423_v34  ;;  %v7822_v46 = vrot.slane %v7806_v11, %v10423_v34  ;;  %v8211_v2 = vadd.s32 4294967216, %v12671_v21 }
 0x4cf   : > { %v7803_v13 = vrot.slane %v7789_v16, %v10423_v34  ;;  %v7829_v31 = vrot.slane %v7807_v43, %v10423_v34  ;;  %v8225_v3 = vadd.s32 4294967200, %v12671_v21  ;;  %v4787_v47 = vrot.slane %v2703_v6, %v10396_v63 }
 0x4d0   : > { %v12239_v24 = vpop.permute.xlu0 %8049  ;;  %v7836_v39 = vrot.slane %v7808_v4, %v10423_v34  ;;  %v7837_v41 = vcombine.low %v7815_v7, %v7822_v46  ;;  %v4791_v0 = vrot.slane %v2703_v6, %v10399_v18  ;;  %v12262_v44 = vsub.s32 %v8211_v2, %v12672_v42 }
 0x4d1   : > { %v7804_v28 = vcombine.low %v7796_v52, %v7803_v13  ;;  %v12265_v19 = vsub.s32 %v8225_v3, %v12672_v42  ;;  %v8204_v10 = vadd.s32 4294967224, %v12671_v21  ;;  %v8218_v15 = vadd.s32 4294967208, %v12671_v21 }
 0x4d2   : > { %v7838_v22 = vcombine.low %v7829_v31, %v7836_v39  ;;  %v7845_v23 = vrot.slane %v7837_v41, %v10423_v34  ;;  %v4795_v54 = vrot.slane %v2703_v6, %v10402_v40  ;;  %v4799_v37 = vrot.slane %v2703_v6, %v10405_v33 }
 0x4d3   : > { %8133 = vperm.xlu1 %9042, %v7804_v28   ;;  %v4803_v56 = vrot.slane %v2703_v6, %v10409_v58  ;;  %v4807_v20 = vrot.slane %v2703_v6, %v10412_v38  ;;  %v4811_v29 = vrot.slane %v2703_v6, %v10416_v30  ;;  %v4815_v12 = vrot.slane %v2703_v6, %v10419_v61 }
 0x4d4   : > { %v12247_v62 = vpop.permute.xlu0 %8007  ;;  %v7852_v5 = vrot.slane %v7838_v22, %v10423_v34  ;;  %v7903_v1 = vcombine.low %v4787_v47, %v4791_v0  ;;  %v8215_v8 = vrot.slane %v12179_v26, %v12262_v44  ;;  %v8229_v50 = vrot.slane %v12199_v14, %v12265_v19 }
 0x4d5   : > { %v8239_v53 = vadd.s32 4294967184, %v12671_v21  ;;  %v12283_v16 = vsub.s32 %v8204_v10, %v12672_v42  ;;  %v8232_v27 = vadd.s32 4294967192, %v12671_v21  ;;  %v7904_v11 = vcombine.low %v4795_v54, %v4799_v37 }
 0x4d6   : > { %v7853_v49 = vcombine.low %v7845_v23, %v7852_v5  ;;  %v12288_v26 = vsub.s32 %v8218_v15, %v12672_v42  ;;  %v7905_v52 = vcombine.low %v4803_v56, %v4807_v20  ;;  %v7906_v43 = vcombine.low %v4811_v29, %v4815_v12 }
 0x4d7   : > { %v7913_v14 = vrot.slane %v7903_v1, %v10423_v34  ;;  %v12314_v10 = vsub.s32 %v8232_v27, %v12672_v42  ;;  %v12318_v54 = vsub.s32 %v8239_v53, %v12672_v42 }
 0x4d8   : > { %v12251_v48 = vpop.permute.xlu0 %8055  ;;  %8136 = vperm.xlu1 %9042, %v7853_v49  }
 0x4d9   : > { %v8243_v27 = vrot.slane %v12215_v9, %v12318_v54 }
 0x4dc   : > { %v12257_v17 = vpop.permute.xlu0 %8013 }
 0x4e0   : > { %v12277_v25 = vpop.permute.xlu0 %8061 }
 0x4e4   : > { %v12299_v22 = vpop.permute.xlu0 %8019 }
 0x4e7   : > { %v2635_v36 = vpop.xlane.xlu1 %2634 }
 0x4e8   : > { %v2702_v32 = vadd.f32 %v12668_v57, %v2635_v36  ;;  %v12320_v29 = vpop.permute.xlu0 %8067 }
 0x4ea   : > { %v4755_v13 = vrot.slane %v2702_v32, %v10396_v63  ;;  %v4759_v4 = vrot.slane %v2702_v32, %v10399_v18  ;;  %v4763_v7 = vrot.slane %v2702_v32, %v10402_v40  ;;  %v4767_v46 = vrot.slane %v2702_v32, %v10405_v33 }
 0x4eb   : > { %v7981_v57 = vpop.permute.xlu1 %7980  ;;  %v4771_v31 = vrot.slane %v2702_v32, %v10409_v58  ;;  %v4775_v28 = vrot.slane %v2702_v32, %v10412_v38  ;;  %v4779_v39 = vrot.slane %v2702_v32, %v10416_v30  ;;  %v4783_v41 = vrot.slane %v2702_v32, %v10419_v61 }
 0x4ec   : > { %v8208_v23 = vrot.slane %v7981_v57, %v12283_v16  ;;  %v7854_v63 = vcombine.low %v4755_v13, %v4759_v4  ;;  %v7855_v5 = vcombine.low %v4763_v7, %v4767_v46  ;;  %v7920_v18 = vrot.slane %v7904_v11, %v10423_v34  ;;  %v8026_v4 = vpop.permute.xlu0 %8025  ;;  %v12674_v57 = vld [vmem:[#allocation9_spill] sm:$0xff] }
 0x4ed   : > { %v7856_v40 = vcombine.low %v4771_v31, %v4775_v28  ;;  %v7857_v49 = vcombine.low %v4779_v39, %v4783_v41  ;;  %v7927_v33 = vrot.slane %v7905_v52, %v10423_v34  ;;  %v7934_v58 = vrot.slane %v7906_v43, %v10423_v34  ;;  %v12675_v28 = vld [vmem:[#allocation10_spill] sm:$0xff]  ;;  %v12676_v41 = vld [vmem:[#allocation25_spill] sm:$0xff] }
 0x4ee   : > { %v8210_v38 = vsel %vm8209_vm0, %v8208_v23, %v12176_v55  ;;  %v7864_v30 = vrot.slane %v7854_v63, %v10423_v34  ;;  %v7871_v61 = vrot.slane %v7855_v5, %v10423_v34  ;;  %v8246_v55 = vadd.s32 4294967176, %v12671_v21 }
 0x4ef   : > { %v8217_v6 = vsel %vm8216_vm1, %v8215_v8, %v8210_v38  ;;  %v7987_v2 = vpop.permute.xlu1 %7986  ;;  %v7878_v3 = vrot.slane %v7856_v40, %v10423_v34  ;;  %v7885_v47 = vrot.slane %v7857_v49, %v10423_v34  ;;  %v7935_v56 = vcombine.low %v7913_v14, %v7920_v18 }
 0x4f0   : > { %v8222_v0 = vrot.slane %v7987_v2, %v12288_v26  ;;  %v7886_v15 = vcombine.low %v7864_v30, %v7871_v61  ;;  %v7936_v20 = vcombine.low %v7927_v33, %v7934_v58  ;;  %v12328_v53 = vsub.s32 %v8246_v55, %v12672_v42  ;;  %v12345_v63 = vpop.permute.xlu0 %8073  ;;  %v12677_v61 = vld [vmem:[#allocation28_spill] sm:$0xff]  ;;  %v12678_v2 = vld [vmem:[#allocation31_spill] sm:$0xff] }
 0x4f1   : > { %v7887_v37 = vcombine.low %v7878_v3, %v7885_v47  ;;  %v7943_v52 = vrot.slane %v7935_v56, %v10423_v34  ;;  %v8256_v31 = vrot.slane %v12225_v51, %v12674_v57  ;;  %v8265_v23 = vrot.slane %v12247_v62, %v12676_v41 }
 0x4f2   : > { %v8224_v12 = vsel %vm8223_vm3, %v8222_v0, %v8217_v6  ;;  %v7894_v1 = vrot.slane %v7886_v15, %v10423_v34  ;;  %v7950_v43 = vrot.slane %v7936_v20, %v10423_v34  ;;  %v8335_v49 = vrot.slane %v12239_v24, %v12674_v57 }
 0x4f3   : > { %v8231_v8 = vsel %vm8230_vm4, %v8229_v50, %v8224_v12  ;;  %v7993_v36 = vpop.permute.xlu1 %7992  ;;  %v7901_v32 = vrot.slane %v7887_v37, %v10423_v34  ;;  %v8344_v51 = vrot.slane %v12251_v48, %v12676_v41  ;;  %v8275_v3 = vrot.slane %v12257_v17, %v12678_v2 }
 0x4f4   : > { %v8236_v21 = vrot.slane %v7993_v36, %v12314_v10  ;;  %v7951_v42 = vcombine.low %v7943_v52, %v7950_v43  ;;  %v8032_v30 = vpop.permute.xlu0 %8031 }
 0x4f5   : > { %v7902_v11 = vcombine.low %v7894_v1, %v7901_v32 }
 0x4f6   : > { %v8238_v50 = vsel %vm8237_vm5, %v8236_v21, %v8231_v8  ;;  %v8285_v21 = vrot.slane %v12299_v22, %v11556_v45  ;;  %v8305_v22 = vrot.slane %v8032_v30, %v12262_v44 }
 0x4f7   : > { %8139 = vperm.xlu1 %9042, %v7902_v11   ;;  %v8245_v14 = vsel %vm8244_vm6, %v8243_v27, %v8238_v50  ;;  %v7999_v13 = vpop.permute.xlu1 %7998 }
 0x4f8   : > { %v8250_v7 = vrot.slane %v7999_v13, %v12328_v53  ;;  %v12362_v55 = vpop.permute.xlu0 %8079 }
 0x4fa   : > { %v12338_v46 = vsel %vm8251_vm7, %v8250_v7, %v8245_v14  ;;  %v8295_v14 = vrot.slane %v8026_v4, %v12151_v59 }
 0x4fb   : > { %8142 = vperm.xlu1 %9042, %v7951_v42   ;;  %v8005_v9 = vpop.permute.xlu1 %8004 }
 0x4fc   : > { %v8260_v39 = vrot.slane %v8005_v9, %v12675_v28  ;;  %v12367_v1 = vpop.permute.xlu0 %8082 }
 0x4fe   : > { %v8261_v5 = vsel %vm8153_vm2, %v8260_v39, %v8256_v31 }
 0x4ff   : > { %v8053_v18 = vpop.permute.xlu1 %8052  ;;  %v8266_v40 = vsel %vm8160_vm9, %v8265_v23, %v8261_v5 }
 0x500   : > { %v8339_v33 = vrot.slane %v8053_v18, %v12675_v28  ;;  %v8038_v8 = vpop.permute.xlu0 %8037 }
 0x501   : > { %v8315_v18 = vrot.slane %v8038_v8, %v12265_v19 }
 0x502   : > { %v8340_v58 = vsel %vm8153_vm2, %v8339_v33, %v8335_v49 }
 0x503   : > { %v8011_v38 = vpop.permute.xlu1 %8010  ;;  %v8345_v62 = vsel %vm8160_vm9, %v8344_v51, %v8340_v58 }
 0x504   : > { %v8270_v6 = vrot.slane %v8011_v38, %v12677_v61  ;;  %v12372_v11 = vpop.permute.xlu0 %8085 }
 0x506   : > { %v8271_v47 = vsel %vm8167_vm10, %v8270_v6, %v8266_v40 }
 0x507   : > { %v8059_v0 = vpop.permute.xlu1 %8058  ;;  %v8276_v24 = vsel %vm8174_vm11, %v8275_v3, %v8271_v47 }
 0x508   : > { %v8349_v15 = vrot.slane %v8059_v0, %v12677_v61  ;;  %v12379_v42 = vpop.permute.xlu0 %8088 }
 0x50a   : > { %v8350_v48 = vsel %vm8167_vm10, %v8349_v15, %v8345_v62 }
 0x50b   : > { %v8017_v37 = vpop.permute.xlu1 %8016 }
 0x50c   : > { %v8280_v56 = vrot.slane %v8017_v37, %v11410_v60  ;;  %v8044_v4 = vpop.permute.xlu0 %8043 }
 0x50d   : > { %v8325_v58 = vrot.slane %v8044_v4, %v12318_v54 }
 0x50e   : > { %v8281_v20 = vsel %vm8181_vm12, %v8280_v56, %v8276_v24 }
 0x50f   : > { %v8065_v12 = vpop.permute.xlu1 %8064  ;;  %v8286_v52 = vsel %vm8188_vm13, %v8285_v21, %v8281_v20  ;;  %v8354_v21 = vrot.slane %v12277_v25, %v12678_v2 }
 0x510   : > { %v8098_v15 = vpop.permute.xlu0 %8097 }
 0x513   : > { %v8023_v17 = vpop.permute.xlu1 %8022 }
 0x514   : > { %v8290_v32 = vrot.slane %v8023_v17, %v12119_v35  ;;  %v8104_v56 = vpop.permute.xlu0 %8103 }
 0x515   : > { %v8423_v25 = vrot.slane %v8104_v56, %v12676_v41 }
 0x516   : > { %v8291_v43 = vsel %vm8195_vm14, %v8290_v32, %v8286_v52  ;;  %v8359_v32 = vrot.slane %v8065_v12, %v11410_v60  ;;  %v8355_v52 = vsel %vm8174_vm11, %v8354_v21, %v8350_v48 }
 0x517   : > { %v8071_v36 = vpop.permute.xlu1 %8070  ;;  %v8296_v7 = vsel %vm8202_vm15, %v8295_v14, %v8291_v43  ;;  %v8414_v14 = vrot.slane %v8098_v15, %v12674_v57  ;;  %v8374_v57 = vrot.slane %v12345_v63, %v12151_v59 }
 0x518   : > { %v8110_v17 = vpop.permute.xlu0 %8109 }
 0x51b   : > { %v8029_v27 = vpop.permute.xlu1 %8028 }
 0x51c   : > { %v8300_v50 = vrot.slane %v8029_v27, %v12283_v16  ;;  %v8116_v43 = vpop.permute.xlu0 %8115 }
 0x51e   : > { %v8301_v9 = vsel %vm8209_vm0, %v8300_v50, %v8296_v7  ;;  %v8360_v50 = vsel %vm8181_vm12, %v8359_v32, %v8355_v52  ;;  %v8369_v7 = vrot.slane %v8071_v36, %v12119_v35 }
 0x51f   : > { %v8077_v13 = vpop.permute.xlu1 %8076  ;;  %v8306_v23 = vsel %vm8216_vm1, %v8305_v22, %v8301_v9  ;;  %v8364_v9 = vrot.slane %v12320_v29, %v11556_v45 }
 0x520   : > { %v8122_v36 = vpop.permute.xlu0 %8121 }
 0x523   : > { %v8035_v31 = vpop.permute.xlu1 %8034 }
 0x524   : > { %v8310_v39 = vrot.slane %v8035_v31, %v12288_v26 }
 0x526   : > { %v8311_v5 = vsel %vm8223_vm3, %v8310_v39, %v8306_v23  ;;  %v8379_v39 = vrot.slane %v8077_v13, %v12283_v16  ;;  %v8384_v13 = vrot.slane %v12362_v55, %v12262_v44 }
 0x527   : > { %v8041_v40 = vpop.permute.xlu1 %8040  ;;  %v8316_v33 = vsel %vm8230_vm4, %v8315_v18, %v8311_v5 }
 0x528   : > { %v8320_v49 = vrot.slane %v8041_v40, %v12314_v10 }
 0x52a   : > { %v8321_v51 = vsel %vm8237_vm5, %v8320_v49, %v8316_v33  ;;  %v8443_v33 = vrot.slane %v8116_v43, %v11556_v45  ;;  %v8453_v45 = vrot.slane %v8122_v36, %v12151_v59 }
 0x52b   : > { %v8047_v38 = vpop.permute.xlu1 %8046  ;;  %v8326_v30 = vsel %vm8244_vm6, %v8325_v58, %v8321_v51  ;;  %v8092_v51 = vpop.permute.xlu0 %8091 }
 0x52c   : > { %v8330_v62 = vrot.slane %v8047_v38, %v12328_v53  ;;  %v8404_v59 = vrot.slane %v8092_v51, %v12318_v54 }
 0x52e   : > { %v12394_v6 = vsel %vm8251_vm7, %v8330_v62, %v8326_v30 }
 0x52f   : > { %v8490_v3 = vcombine.low %v12338_v46, %v12394_v6  ;;  %v8101_v47 = vpop.permute.xlu1 %8100 }
 0x530   : > { %v8418_v27 = vrot.slane %v8101_v47, %v12675_v28  ;;  %v8365_v28 = vsel %vm8188_vm13, %v8364_v9, %v8360_v50  ;;  %v12679_v9 = vlaneseq }
 0x531   : > { %v8370_v48 = vsel %vm8195_vm14, %v8369_v7, %v8365_v28 }
 0x532   : > { %v8419_v12 = vsel %vm8153_vm2, %v8418_v27, %v8414_v14  ;;  %v8375_v41 = vsel %vm8202_vm15, %v8374_v57, %v8370_v48  ;;  %v8498_v14 = vrot.slane %v8490_v3, %v10423_v34  ;;  %vm8517_vm8 = vcmp.lt.s32.totalorder %v12679_v9, 512 }
 0x533   : > { %v8107_v0 = vpop.permute.xlu1 %8106  ;;  %v8424_v23 = vsel %vm8160_vm9, %v8423_v25, %v8419_v12  ;;  %v8380_v40 = vsel %vm8209_vm0, %v8379_v39, %v8375_v41 }
 0x534   : > { %v8428_v31 = vrot.slane %v8107_v0, %v12677_v61  ;;  %v8433_v61 = vrot.slane %v8110_v17, %v12678_v2  ;;  %v8389_v2 = vrot.slane %v12367_v1, %v12288_v26 }
 0x536   : > { %v8429_v29 = vsel %vm8167_vm10, %v8428_v31, %v8424_v23 }
 0x537   : > { %v8113_v24 = vpop.permute.xlu1 %8112  ;;  %v8434_v4 = vsel %vm8174_vm11, %v8433_v61, %v8429_v29 }
 0x538   : > { %v8438_v5 = vrot.slane %v8113_v24, %v11410_v60  ;;  %v8385_v60 = vsel %vm8216_vm1, %v8384_v13, %v8380_v40  ;;  %v8095_v24 = vpop.permute.xlu0 %8094 }
 0x539   : > { %v8390_v62 = vsel %vm8223_vm3, %v8389_v2, %v8385_v60 }
 0x53a   : > { %v8439_v63 = vsel %vm8181_vm12, %v8438_v5, %v8434_v4 }
 0x53b   : > { %v8119_v37 = vpop.permute.xlu1 %8118  ;;  %v8444_v58 = vsel %vm8188_vm13, %v8443_v33, %v8439_v63 }
 0x53c   : > { %v8448_v49 = vrot.slane %v8119_v37, %v12119_v35  ;;  %v8394_v35 = vrot.slane %v12372_v11, %v12265_v19 }
 0x53e   : > { %v8449_v55 = vsel %vm8195_vm14, %v8448_v49, %v8444_v58  ;;  %v8395_v1 = vsel %vm8230_vm4, %v8394_v35, %v8390_v62 }
 0x53f   : > { %v8454_v15 = vsel %vm8202_vm15, %v8453_v45, %v8449_v55 }
 0x541   : > { %v8125_v20 = vpop.permute.xlu1 %8124 }
 0x542   : > { %v8458_v30 = vrot.slane %v8125_v20, %v12283_v16  ;;  %v8399_v16 = vrot.slane %v12379_v42, %v12314_v10 }
 0x544   : > { %v8459_v20 = vsel %vm8209_vm0, %v8458_v30, %v8454_v15  ;;  %v8400_v17 = vsel %vm8237_vm5, %v8399_v16, %v8395_v1 }
 0x545   : > { %v8405_v27 = vsel %vm8244_vm6, %v8404_v59, %v8400_v17 }
 0x546   : > { %v8128_v8 = vpop.permute.xlu1 %8127 }
 0x547   : > { %v8463_v47 = vrot.slane %v8128_v8, %v12262_v44  ;;  %v8409_v8 = vrot.slane %v8095_v24, %v12328_v53 }
 0x549   : > { %v8464_v44 = vsel %vm8216_vm1, %v8463_v47, %v8459_v20  ;;  %v8410_v52 = vsel %vm8251_vm7, %v8409_v8, %v8405_v27 }
 0x54c   : > { %v8131_v22 = vpop.permute.xlu1 %8130 }
 0x54d   : > { %v8468_v0 = vrot.slane %v8131_v22, %v12288_v26 }
 0x552   : > { %v8134_v18 = vpop.permute.xlu1 %8133 }
 0x553   : > { %v8473_v37 = vrot.slane %v8134_v18, %v12265_v19  ;;  %v8469_v19 = vsel %vm8223_vm3, %v8468_v0, %v8464_v44 }
 0x555   : > { %v8474_v32 = vsel %vm8230_vm4, %v8473_v37, %v8469_v19 }
 0x557   : > { %v8137_v38 = vpop.permute.xlu1 %8136 }
 0x558   : > { %v8478_v11 = vrot.slane %v8137_v38, %v12314_v10 }
 0x55a   : > { %v8479_v21 = vsel %vm8237_vm5, %v8478_v11, %v8474_v32 }
 0x576   : > { %v8140_v56 = vpop.permute.xlu1 %8139 }
 0x577   : > { %v8483_v26 = vrot.slane %v8140_v56, %v12318_v54 }
 0x579   : > { %v8484_v54 = vsel %vm8244_vm6, %v8483_v26, %v8479_v21 }
 0x57a   : > { %v8143_v42 = vpop.permute.xlu1 %8142 }
 0x57b   : > { %v8488_v10 = vrot.slane %v8143_v42, %v12328_v53 }
 0x57d   : > { %v8489_v43 = vsel %vm8251_vm7, %v8488_v10, %v8484_v54 }
 0x57e   : > { %v8491_v50 = vcombine.low %v8410_v52, %v8489_v43 }
 0x580   : > { %v8505_v7 = vrot.slane %v8491_v50, %v10423_v34 }
 0x582   : > { %v8506_v53 = vcombine.low %v8498_v14, %v8505_v7 }
 0x584   : > { %v8513_v22 = vrot.slane %v8506_v53, %v10423_v34 }
 0x586   : > { %8519 = vst.msk [vmem:[%s273_s21] sm:$0xf] %vm8517_vm8, %v8513_v22 }
 0x587   : > { %9082 = shalt.err (!%p9079_p3)
}
 0x588   : > { %s9083_s14 = scalar_lea.hbm %s12472_s25, 64  ;;  %s9087_s17 = scalar_lea.hbm %s12521_s7, 128 }
 0x589   : > { %p9084_p4 = scmp.ne.s32.totalorder %s12472_s25, %s9083_s14  ;;  %p9088_p9 = scmp.lt.u32.totalorder %s12472_s25, %s12521_s7 }
 0x58a   : > { %p9089_p10 = scmp.lt.u32.totalorder %s9087_s17, %s9083_s14  ;;  %p9091_p12 = scmp.lt.u32.totalorder %s9083_s14, %s12472_s25 }
 0x58b   : > { %p9085_p7 = pnand %p9084_p4, %p9216_p5 }
 0x58c   : > { %p9090_p11 = por %p9089_p10, %p9088_p9 }
 0x58d   : > { %p9086_p8 = pneg %p9085_p7 }
 0x58e   : > { %p9092_p13 = por %p9091_p12, %p9090_p11 }
 0x590   : > { %p9093_p0 = pnand %p9092_p13, %p9086_p8 }
 0x592   : > { %9096 = shalt.err (!%p9093_p0)
}
 0x593   : > { %8945 = dma.vmem_to_hbm [thread:$0]  (%p9216_p5), %s12474_s22, 64, %s12472_s25, %s8521_s6  }
 0x594 PF: > { %p8951_p1 = scmp.ge.s32.totalorder %s9131_s29, 2  ;;  %s8547_s21 = sand.u32 1, %s9119_s26  }
 0x595   : > { %s8548_s23 = scalar_lea.sflag [#allocation4], %s8547_s21 }
 0x596   : > { %p8948_p2 = pnand %p8951_p1, %p9220_p6 }
 0x598   : > { %9114 = dma.done.wait (!%p8948_p2), %s8548_s23, 64  }
 0x599   : > { %9116 = vsyncadd (!%p8948_p2), %s8548_s23, 4294967232  ;;  %p18_p3 = scmp.ge.s32.totalorder %s9204_s8, 4   ;;  %s12680_s26 = smov %s9123_s27 }
 0x59a   : > { %s12681_s27 = smov %s9127_s28  ;;  %s12682_s28 = smov %s9214_s11 }
 0x59b   : > { %s12683_s29 = smov %s9204_s8  ;;  %20 = sbr.rel (!%p18_p3) target bundleno = 5 (0x5), region = 83 }
 0x5a2   :  { %8553 = vsyncpa [#allocation4], 1 }
 0x5a3   :  { %8555 = vsyncpa [#allocation4 + $0x1], 1 }

</bundles_post_ra>
